<compile_context>
chip_gen: v7x
topology: tpu7x:2x2x1
jax: 0.10.0
libtpu: 0.0.40
codegen_flags: <defaults>
</compile_context>

<pallas_src>
import functools

import jax
import jax.numpy as jnp
from jax.experimental import pallas as pl
from jax.experimental.pallas import tpu as pltpu

ROW_TILE = 256  # rows per grid step (multiple of 128 for the MXU M dim)


# ----------------------------------------------------------------- kernels --

def _fused_conv_kernel(p_ref, w1_ref, wd_ref, bd_ref, w3_ref, b3_ref, o_ref,
                       *, n_valid):
    """Fused conv1 (1x1 + ReLU, bias folded into the ones channel of w1),
    depthwise 3x3/stride-2 accumulate over 9 pre-gathered taps (+bias, ReLU),
    and conv3 (1x1 + bias).  Rows >= n_valid (row-tile padding) are zeroed so
    the downstream BatchNorm statistics stay exact."""
    tm = o_ref.shape[0]
    w1 = w1_ref[...]                     # (C+1, hid)  hoisted once
    wd = wd_ref[...]                     # (9, 1, hid) hoisted once
    acc = None
    for k in range(9):                   # static unroll over the 3x3 taps
        yk = jnp.maximum(
            jnp.dot(p_ref[k], w1, preferred_element_type=jnp.float32), 0.0)
        contrib = yk * wd[k]             # (tm, hid) * (1, hid)
        acc = contrib if acc is None else acc + contrib
    y = jnp.maximum(acc + bd_ref[...], 0.0)          # depthwise bias + ReLU
    z = jnp.dot(y, w3_ref[...], preferred_element_type=jnp.float32)
    z = z + b3_ref[...]
    rows = pl.program_id(0) * tm + jax.lax.broadcasted_iota(
        jnp.int32, (tm, 1), 0)
    o_ref[...] = jnp.where(rows < n_valid, z, 0.0).astype(o_ref.dtype)


def _bn_stats_kernel(z_ref, stats_ref):
    """BatchNorm pass 1: accumulate per-channel sum (row 0) and
    sum-of-squares (row 1) across all row tiles (accumulator output)."""
    @pl.when(pl.program_id(0) == 0)
    def _():
        stats_ref[...] = jnp.zeros_like(stats_ref)
    z = z_ref[...]
    s = jnp.sum(z, axis=0, keepdims=True)
    sq = jnp.sum(z * z, axis=0, keepdims=True)
    stats_ref[...] += jnp.concatenate([s, sq], axis=0)


def _bn_norm_kernel(z_ref, stats_ref, g_ref, b_ref, o_ref, *, inv_n):
    """BatchNorm pass 2: normalize with batch statistics (biased variance)."""
    stats = stats_ref[...]
    mean = stats[0:1, :] * inv_n
    var = stats[1:2, :] * inv_n - mean * mean
    inv = jax.lax.rsqrt(var + 1e-5)
    scale = g_ref[...] * inv
    shift = b_ref[...] - mean * scale
    o_ref[...] = (z_ref[...] * scale + shift).astype(o_ref.dtype)


# ----------------------------------------------------------------- wrapper --

def patch_merging_forward(x, params, H, W):
    """x: (B, H*W, C) float32 -> (B, H2*W2, 2*C) float32."""
    B, L, C = x.shape
    assert L == H * W, "input feature has wrong size"
    hid = params["w1"].shape[1]
    out_c = params["w3"].shape[1]
    H2, W2 = (H + 1) // 2, (W + 1) // 2
    n2 = B * H2 * W2

    # ---- glue: pure data rearrangement on the NARROW (C+1)-channel tensor --
    # Append an all-ones channel (carries conv1's bias through the matmul so
    # zero spatial padding stays exactly zero after conv1 + ReLU), zero-pad by
    # one pixel, and gather the 9 taps of the 3x3 / stride-2 window.
    x4 = x.reshape(B, H, W, C)
    x_aug = jnp.concatenate([x4, jnp.ones((B, H, W, 1), x.dtype)], axis=-1)
    xpad = jnp.pad(x_aug, ((0, 0), (1, 1), (1, 1), (0, 0)))
    taps = [xpad[:, ki:ki + 2 * H2:2, kj:kj + 2 * W2:2, :]
            for ki in range(3) for kj in range(3)]
    C1 = C + 1
    taps = jnp.stack(taps, axis=0).reshape(9, n2, C1)

    tm = ROW_TILE
    n2p = pl.cdiv(n2, tm) * tm
    if n2p != n2:
        taps = jnp.pad(taps, ((0, 0), (0, n2p - n2), (0, 0)))
    grid = (n2p // tm,)

    # conv1 weight with the bias folded in as an extra input row.
    w1_aug = jnp.concatenate([params["w1"], params["b1"]], axis=0)  # (C+1,hid)

    # ---- fused conv1 + depthwise conv2 + conv3 (single Pallas kernel) ------
    z = pl.pallas_call(
        functools.partial(_fused_conv_kernel, n_valid=n2),
        out_shape=jax.ShapeDtypeStruct((n2p, out_c), jnp.float32),
        grid=grid,
        in_specs=[
            pl.BlockSpec((9, tm, C1), lambda i: (0, i, 0)),
            pl.BlockSpec((C1, hid), lambda i: (0, 0)),
            pl.BlockSpec((9, 1, hid), lambda i: (0, 0, 0)),
            pl.BlockSpec((1, hid), lambda i: (0, 0)),
            pl.BlockSpec((hid, out_c), lambda i: (0, 0)),
            pl.BlockSpec((1, out_c), lambda i: (0, 0)),
        ],
        out_specs=pl.BlockSpec((tm, out_c), lambda i: (i, 0)),
        compiler_params=pltpu.CompilerParams(
            dimension_semantics=("parallel",),
            vmem_limit_bytes=32 * 1024 * 1024),
    )(taps, w1_aug, params["wd"], params["bd"], params["w3"], params["b3"])

    # ---- BatchNorm pass 1: tiled per-channel sum / sum-of-squares ----------
    stats = pl.pallas_call(
        _bn_stats_kernel,
        out_shape=jax.ShapeDtypeStruct((2, out_c), jnp.float32),
        grid=grid,
        in_specs=[pl.BlockSpec((tm, out_c), lambda i: (i, 0))],
        out_specs=pl.BlockSpec((2, out_c), lambda i: (0, 0)),
        compiler_params=pltpu.CompilerParams(
            dimension_semantics=("arbitrary",)),
    )(z)

    # ---- BatchNorm pass 2: tiled normalize (reuses z's buffer) -------------
    out = pl.pallas_call(
        functools.partial(_bn_norm_kernel, inv_n=1.0 / n2),
        out_shape=jax.ShapeDtypeStruct((n2p, out_c), jnp.float32),
        grid=grid,
        in_specs=[
            pl.BlockSpec((tm, out_c), lambda i: (i, 0)),
            pl.BlockSpec((2, out_c), lambda i: (0, 0)),
            pl.BlockSpec((1, out_c), lambda i: (0, 0)),
            pl.BlockSpec((1, out_c), lambda i: (0, 0)),
        ],
        out_specs=pl.BlockSpec((tm, out_c), lambda i: (i, 0)),
        input_output_aliases={0: 0},
        compiler_params=pltpu.CompilerParams(
            dimension_semantics=("parallel",)),
    )(z, stats, params["gamma"], params["beta"])

    return out[:n2].reshape(B, H2 * W2, out_c)


# -------------------------------------------------------------- parameters --

def init_params(key, dim, ratio=4.0):
    hid = int(2 * dim * ratio)     # 8*dim for ratio=4
    out_c = 2 * dim
    ks = jax.random.split(key, 6)
    w1 = 0.1 * jax.random.normal(ks[0], (dim, hid), jnp.float32)
    b1 = 0.1 * jax.random.normal(ks[1], (1, hid), jnp.float32)
    wd3 = 0.1 * jax.random.normal(ks[2], (3, 3, hid), jnp.float32)
    wd = wd3.reshape(9, hid)[:, None, :]               # (9, 1, hid)
    bd = 0.1 * jax.random.normal(ks[3], (1, hid), jnp.float32)
    w3 = 0.1 * jax.random.normal(ks[4], (hid, out_c), jnp.float32)
    b3 = 0.1 * jax.random.normal(ks[5], (1, out_c), jnp.float32)
    gamma = jnp.ones((1, out_c), jnp.float32)          # BatchNorm2d defaults
    beta = jnp.zeros((1, out_c), jnp.float32)
    return dict(w1=w1, b1=b1, wd=wd, bd=bd, w3=w3, b3=b3, gamma=gamma, beta=beta)


# ------------------------------------------------------- pure-JAX reference -

def reference(x, params, H, W):
    B, L, C = x.shape
    hid = params["w1"].shape[1]
    out_c = params["w3"].shape[1]
    H2, W2 = (H + 1) // 2, (W + 1) // 2
    x4 = x.reshape(B, H, W, C)
    y1 = jax.nn.relu(jnp.einsum("bhwc,cf->bhwf", x4, params["w1"]) + params["b1"][0])
    rhs = params["wd"].reshape(3, 3, 1, hid)           # HWIO, I=1 (depthwise)
    y2 = jax.lax.conv_general_dilated(
        y1, rhs, window_strides=(2, 2), padding=((1, 1), (1, 1)),
        dimension_numbers=("NHWC", "HWIO", "NHWC"), feature_group_count=hid)
    y2 = jax.nn.relu(y2 + params["bd"][0])
    z = jnp.einsum("bhwf,fo->bhwo", y2, params["w3"]) + params["b3"][0]
    zf = z.reshape(-1, out_c)
    mean = zf.mean(axis=0)
    var = ((zf - mean) ** 2).mean(axis=0)
    out = params["gamma"][0] * (zf - mean) * jax.lax.rsqrt(var + 1e-5) + params["beta"][0]
    return out.reshape(B, H2 * W2, out_c)


# --------------------------------------------------------------------- main -

if __name__ == "__main__":
    B, H, W, dim = 2, 16, 16, 4
    key = jax.random.PRNGKey(0)
    kx, kp = jax.random.split(key)
    x = jax.random.normal(kx, (B, H * W, dim), jnp.float32)
    params = init_params(kp, dim, ratio=4.0)

    fwd = jax.jit(patch_merging_forward, static_argnums=(2, 3))
    out = fwd(x, params, H, W)
    out = jax.block_until_ready(out)

    H2, W2 = (H + 1) // 2, (W + 1) // 2
    assert out.shape == (B, H2 * W2, 2 * dim), out.shape

    ref = reference(x, params, H, W)
    assert jnp.allclose(out, ref, atol=1e-4, rtol=1e-4), (
        "mismatch vs. reference", float(jnp.max(jnp.abs(out - ref))))

    print("KERNEL_OK")
</pallas_src>

<mosaic_0001>
module attributes {stable_mosaic.version = 11 : i64} {
  func.func @_bn_stats_kernel(%arg0: i32, %arg1: memref<256x8xf32, #tpu.memory_space<vmem>>, %arg2: memref<2x8xf32, #tpu.memory_space<vmem>>) attributes {dimension_semantics = [#tpu.dimension_semantics<arbitrary>], iteration_bounds = array<i64: 1>, scalar_prefetch = 0 : i64, scratch_operands = 0 : i64, tpu.core_type = #tpu.core_type<tc>, window_params = [{transform_indices = @transform_0, window_bounds = array<i64: 256, 8>}, {pipeline_mode = #tpu.pipeline_mode<synchronous>, transform_indices = @transform_1, window_bounds = array<i64: 2, 8>}]} {
    %c0_i32 = arith.constant 0 : i32
    %0 = arith.cmpi eq, %arg0, %c0_i32 : i32
    %1 = arith.extui %0 : i1 to i32
    %c0_i32_0 = arith.constant 0 : i32
    %2 = arith.cmpi ne, %1, %c0_i32_0 : i32
    scf.if %2 {
      %cst_7 = arith.constant 0.000000e+00 : f32
      %13 = vector.broadcast %cst_7 : f32 to vector<2x8xf32>
      %c0_8 = arith.constant 0 : index
      %c0_9 = arith.constant 0 : index
      %14 = vector.load %arg2[%c0_8, %c0_9] : memref<2x8xf32, #tpu.memory_space<vmem>>, vector<2x8xf32>
      tpu.vector_store %arg2[%c0_8, %c0_9], %13 {strides = array<i32>} : memref<2x8xf32, #tpu.memory_space<vmem>>, vector<2x8xf32>,
    } else {
    }
    %c0 = arith.constant 0 : index
    %c0_1 = arith.constant 0 : index
    %3 = vector.load %arg1[%c0, %c0_1] : memref<256x8xf32, #tpu.memory_space<vmem>>, vector<256x8xf32>
    %cst = arith.constant dense<0.000000e+00> : vector<8xf32>
    %4 = vector.multi_reduction <add>, %3, %cst [0] : vector<256x8xf32> to vector<8xf32>
    %5 = vector.shape_cast %4 : vector<8xf32> to vector<1x8xf32>
    %6 = arith.mulf %3, %3 : vector<256x8xf32>
    %cst_2 = arith.constant dense<0.000000e+00> : vector<8xf32>
    %7 = vector.multi_reduction <add>, %6, %cst_2 [0] : vector<256x8xf32> to vector<8xf32>
    %8 = vector.shape_cast %7 : vector<8xf32> to vector<1x8xf32>
    %c0_3 = arith.constant 0 : index
    %c0_4 = arith.constant 0 : index
    %9 = vector.load %arg2[%c0_3, %c0_4] : memref<2x8xf32, #tpu.memory_space<vmem>>, vector<2x8xf32>
    %10 = tpu.concatenate %5, %8 in 0 : vector<1x8xf32>, vector<1x8xf32> -> vector<2x8xf32>
    %11 = arith.addf %9, %10 : vector<2x8xf32>
    %c0_5 = arith.constant 0 : index
    %c0_6 = arith.constant 0 : index
    %12 = vector.load %arg2[%c0_5, %c0_6] : memref<2x8xf32, #tpu.memory_space<vmem>>, vector<2x8xf32>
    tpu.vector_store %arg2[%c0_5, %c0_6], %11 {strides = array<i32>} : memref<2x8xf32, #tpu.memory_space<vmem>>, vector<2x8xf32>,
    return
  }
  func.func @transform_0(%arg0: i32) -> (i32, i32) {
    %c0_i32 = arith.constant 0 : i32
    %c0_i32_0 = arith.constant 0 : i32
    return %arg0, %c0_i32 : i32, i32
  }
  func.func @transform_1(%arg0: i32) -> (i32, i32) {
    %c0_i32 = arith.constant 0 : i32
    %c0_i32_0 = arith.constant 0 : i32
    %c0_i32_1 = arith.constant 0 : i32
    return %c0_i32, %c0_i32_0 : i32, i32
  }
}

module attributes {stable_mosaic.version = 11 : i64} {
  func.func @_fused_conv_kernel(%arg0: i32, %arg1: memref<9x256x5xf32, #tpu.memory_space<vmem>>, %arg2: memref<5x32xf32, #tpu.memory_space<vmem>>, %arg3: memref<9x1x32xf32, #tpu.memory_space<vmem>>, %arg4: memref<1x32xf32, #tpu.memory_space<vmem>>, %arg5: memref<32x8xf32, #tpu.memory_space<vmem>>, %arg6: memref<1x8xf32, #tpu.memory_space<vmem>>, %arg7: memref<256x8xf32, #tpu.memory_space<vmem>>) attributes {dimension_semantics = [#tpu.dimension_semantics<parallel>], iteration_bounds = array<i64: 1>, scalar_prefetch = 0 : i64, scratch_operands = 0 : i64, tpu.core_type = #tpu.core_type<tc>, window_params = [{transform_indices = @transform_0, window_bounds = array<i64: 9, 256, 5>}, {pipeline_mode = #tpu.pipeline_mode<synchronous>, transform_indices = @transform_1, window_bounds = array<i64: 5, 32>}, {pipeline_mode = #tpu.pipeline_mode<synchronous>, transform_indices = @transform_2, window_bounds = array<i64: 9, 1, 32>}, {pipeline_mode = #tpu.pipeline_mode<synchronous>, transform_indices = @transform_3, window_bounds = array<i64: 1, 32>}, {pipeline_mode = #tpu.pipeline_mode<synchronous>, transform_indices = @transform_4, window_bounds = array<i64: 32, 8>}, {pipeline_mode = #tpu.pipeline_mode<synchronous>, transform_indices = @transform_5, window_bounds = array<i64: 1, 8>}, {transform_indices = @transform_6, window_bounds = array<i64: 256, 8>}]} {
    %c0 = arith.constant 0 : index
    %c0_0 = arith.constant 0 : index
    %0 = vector.load %arg2[%c0, %c0_0] : memref<5x32xf32, #tpu.memory_space<vmem>>, vector<5x32xf32>
    %c0_1 = arith.constant 0 : index
    %c0_2 = arith.constant 0 : index
    %c0_3 = arith.constant 0 : index
    %1 = vector.load %arg3[%c0_1, %c0_2, %c0_3] : memref<9x1x32xf32, #tpu.memory_space<vmem>>, vector<9x1x32xf32>
    %c0_4 = arith.constant 0 : index
    %c0_5 = arith.constant 0 : index
    %c0_6 = arith.constant 0 : index
    %2 = vector.load %arg1[%c0_4, %c0_5, %c0_6] : memref<9x256x5xf32, #tpu.memory_space<vmem>>, vector<1x256x5xf32>
    %3 = vector.shape_cast %2 : vector<1x256x5xf32> to vector<256x5xf32>
    %cst = arith.constant dense<0.000000e+00> : vector<256x32xf32>
    %4 = tpu.matmul %3, %0, %cst {dimension_numbers = #tpu.dot_dimension_numbers<[1], [0], [0], [1], [0, 0, 1, 1], [], []>} : vector<256x5xf32>, vector<5x32xf32>, vector<256x32xf32> -> vector<256x32xf32>
    %cst_7 = arith.constant 0.000000e+00 : f32
    %5 = vector.broadcast %cst_7 : f32 to vector<256x32xf32>
    %6 = arith.maximumf %4, %5 : vector<256x32xf32>
    %7 = vector.extract_strided_slice %1 {offsets = [0, 0, 0], sizes = [1, 1, 32], strides = [1, 1, 1]} : vector<9x1x32xf32> to vector<1x1x32xf32>
    %8 = vector.shape_cast %7 : vector<1x1x32xf32> to vector<1x32xf32>
    %9 = vector.broadcast %8 : vector<1x32xf32> to vector<256x32xf32>
    %10 = arith.mulf %6, %9 : vector<256x32xf32>
    %c1 = arith.constant 1 : index
    %c0_8 = arith.constant 0 : index
    %c0_9 = arith.constant 0 : index
    %11 = vector.load %arg1[%c1, %c0_8, %c0_9] : memref<9x256x5xf32, #tpu.memory_space<vmem>>, vector<1x256x5xf32>
    %12 = vector.shape_cast %11 : vector<1x256x5xf32> to vector<256x5xf32>
    %cst_10 = arith.constant dense<0.000000e+00> : vector<256x32xf32>
    %13 = tpu.matmul %12, %0, %cst_10 {dimension_numbers = #tpu.dot_dimension_numbers<[1], [0], [0], [1], [0, 0, 1, 1], [], []>} : vector<256x5xf32>, vector<5x32xf32>, vector<256x32xf32> -> vector<256x32xf32>
    %cst_11 = arith.constant 0.000000e+00 : f32
    %14 = vector.broadcast %cst_11 : f32 to vector<256x32xf32>
    %15 = arith.maximumf %13, %14 : vector<256x32xf32>
    %16 = vector.extract_strided_slice %1 {offsets = [1, 0, 0], sizes = [1, 1, 32], strides = [1, 1, 1]} : vector<9x1x32xf32> to vector<1x1x32xf32>
    %17 = vector.shape_cast %16 : vector<1x1x32xf32> to vector<1x32xf32>
    %18 = vector.broadcast %17 : vector<1x32xf32> to vector<256x32xf32>
    %19 = arith.mulf %15, %18 : vector<256x32xf32>
    %20 = arith.addf %10, %19 : vector<256x32xf32>
    %c2 = arith.constant 2 : index
    %c0_12 = arith.constant 0 : index
    %c0_13 = arith.constant 0 : index
    %21 = vector.load %arg1[%c2, %c0_12, %c0_13] : memref<9x256x5xf32, #tpu.memory_space<vmem>>, vector<1x256x5xf32>
    %22 = vector.shape_cast %21 : vector<1x256x5xf32> to vector<256x5xf32>
    %cst_14 = arith.constant dense<0.000000e+00> : vector<256x32xf32>
    %23 = tpu.matmul %22, %0, %cst_14 {dimension_numbers = #tpu.dot_dimension_numbers<[1], [0], [0], [1], [0, 0, 1, 1], [], []>} : vector<256x5xf32>, vector<5x32xf32>, vector<256x32xf32> -> vector<256x32xf32>
    %cst_15 = arith.constant 0.000000e+00 : f32
    %24 = vector.broadcast %cst_15 : f32 to vector<256x32xf32>
    %25 = arith.maximumf %23, %24 : vector<256x32xf32>
    %26 = vector.extract_strided_slice %1 {offsets = [2, 0, 0], sizes = [1, 1, 32], strides = [1, 1, 1]} : vector<9x1x32xf32> to vector<1x1x32xf32>
    %27 = vector.shape_cast %26 : vector<1x1x32xf32> to vector<1x32xf32>
    %28 = vector.broadcast %27 : vector<1x32xf32> to vector<256x32xf32>
    %29 = arith.mulf %25, %28 : vector<256x32xf32>
    %30 = arith.addf %20, %29 : vector<256x32xf32>
    %c3 = arith.constant 3 : index
    %c0_16 = arith.constant 0 : index
    %c0_17 = arith.constant 0 : index
    %31 = vector.load %arg1[%c3, %c0_16, %c0_17] : memref<9x256x5xf32, #tpu.memory_space<vmem>>, vector<1x256x5xf32>
    %32 = vector.shape_cast %31 : vector<1x256x5xf32> to vector<256x5xf32>
    %cst_18 = arith.constant dense<0.000000e+00> : vector<256x32xf32>
    %33 = tpu.matmul %32, %0, %cst_18 {dimension_numbers = #tpu.dot_dimension_numbers<[1], [0], [0], [1], [0, 0, 1, 1], [], []>} : vector<256x5xf32>, vector<5x32xf32>, vector<256x32xf32> -> vector<256x32xf32>
    %cst_19 = arith.constant 0.000000e+00 : f32
    %34 = vector.broadcast %cst_19 : f32 to vector<256x32xf32>
    %35 = arith.maximumf %33, %34 : vector<256x32xf32>
    %36 = vector.extract_strided_slice %1 {offsets = [3, 0, 0], sizes = [1, 1, 32], strides = [1, 1, 1]} : vector<9x1x32xf32> to vector<1x1x32xf32>
    %37 = vector.shape_cast %36 : vector<1x1x32xf32> to vector<1x32xf32>
    %38 = vector.broadcast %37 : vector<1x32xf32> to vector<256x32xf32>
    %39 = arith.mulf %35, %38 : vector<256x32xf32>
    %40 = arith.addf %30, %39 : vector<256x32xf32>
    %c4 = arith.constant 4 : index
    %c0_20 = arith.constant 0 : index
    %c0_21 = arith.constant 0 : index
    %41 = vector.load %arg1[%c4, %c0_20, %c0_21] : memref<9x256x5xf32, #tpu.memory_space<vmem>>, vector<1x256x5xf32>
    %42 = vector.shape_cast %41 : vector<1x256x5xf32> to vector<256x5xf32>
    %cst_22 = arith.constant dense<0.000000e+00> : vector<256x32xf32>
    %43 = tpu.matmul %42, %0, %cst_22 {dimension_numbers = #tpu.dot_dimension_numbers<[1], [0], [0], [1], [0, 0, 1, 1], [], []>} : vector<256x5xf32>, vector<5x32xf32>, vector<256x32xf32> -> vector<256x32xf32>
    %cst_23 = arith.constant 0.000000e+00 : f32
    %44 = vector.broadcast %cst_23 : f32 to vector<256x32xf32>
    %45 = arith.maximumf %43, %44 : vector<256x32xf32>
    %46 = vector.extract_strided_slice %1 {offsets = [4, 0, 0], sizes = [1, 1, 32], strides = [1, 1, 1]} : vector<9x1x32xf32> to vector<1x1x32xf32>
    %47 = vector.shape_cast %46 : vector<1x1x32xf32> to vector<1x32xf32>
    %48 = vector.broadcast %47 : vector<1x32xf32> to vector<256x32xf32>
    %49 = arith.mulf %45, %48 : vector<256x32xf32>
    %50 = arith.addf %40, %49 : vector<256x32xf32>
    %c5 = arith.constant 5 : index
    %c0_24 = arith.constant 0 : index
    %c0_25 = arith.constant 0 : index
    %51 = vector.load %arg1[%c5, %c0_24, %c0_25] : memref<9x256x5xf32, #tpu.memory_space<vmem>>, vector<1x256x5xf32>
    %52 = vector.shape_cast %51 : vector<1x256x5xf32> to vector<256x5xf32>
    %cst_26 = arith.constant dense<0.000000e+00> : vector<256x32xf32>
    %53 = tpu.matmul %52, %0, %cst_26 {dimension_numbers = #tpu.dot_dimension_numbers<[1], [0], [0], [1], [0, 0, 1, 1], [], []>} : vector<256x5xf32>, vector<5x32xf32>, vector<256x32xf32> -> vector<256x32xf32>
    %cst_27 = arith.constant 0.000000e+00 : f32
    %54 = vector.broadcast %cst_27 : f32 to vector<256x32xf32>
    %55 = arith.maximumf %53, %54 : vector<256x32xf32>
    %56 = vector.extract_strided_slice %1 {offsets = [5, 0, 0], sizes = [1, 1, 32], strides = [1, 1, 1]} : vector<9x1x32xf32> to vector<1x1x32xf32>
    %57 = vector.shape_cast %56 : vector<1x1x32xf32> to vector<1x32xf32>
    %58 = vector.broadcast %57 : vector<1x32xf32> to vector<256x32xf32>
    %59 = arith.mulf %55, %58 : vector<256x32xf32>
    %60 = arith.addf %50, %59 : vector<256x32xf32>
    %c6 = arith.constant 6 : index
    %c0_28 = arith.constant 0 : index
    %c0_29 = arith.constant 0 : index
    %61 = vector.load %arg1[%c6, %c0_28, %c0_29] : memref<9x256x5xf32, #tpu.memory_space<vmem>>, vector<1x256x5xf32>
    %62 = vector.shape_cast %61 : vector<1x256x5xf32> to vector<256x5xf32>
    %cst_30 = arith.constant dense<0.000000e+00> : vector<256x32xf32>
    %63 = tpu.matmul %62, %0, %cst_30 {dimension_numbers = #tpu.dot_dimension_numbers<[1], [0], [0], [1], [0, 0, 1, 1], [], []>} : vector<256x5xf32>, vector<5x32xf32>, vector<256x32xf32> -> vector<256x32xf32>
    %cst_31 = arith.constant 0.000000e+00 : f32
    %64 = vector.broadcast %cst_31 : f32 to vector<256x32xf32>
    %65 = arith.maximumf %63, %64 : vector<256x32xf32>
    %66 = vector.extract_strided_slice %1 {offsets = [6, 0, 0], sizes = [1, 1, 32], strides = [1, 1, 1]} : vector<9x1x32xf32> to vector<1x1x32xf32>
    %67 = vector.shape_cast %66 : vector<1x1x32xf32> to vector<1x32xf32>
    %68 = vector.broadcast %67 : vector<1x32xf32> to vector<256x32xf32>
    %69 = arith.mulf %65, %68 : vector<256x32xf32>
    %70 = arith.addf %60, %69 : vector<256x32xf32>
    %c7 = arith.constant 7 : index
    %c0_32 = arith.constant 0 : index
    %c0_33 = arith.constant 0 : index
    %71 = vector.load %arg1[%c7, %c0_32, %c0_33] : memref<9x256x5xf32, #tpu.memory_space<vmem>>, vector<1x256x5xf32>
    %72 = vector.shape_cast %71 : vector<1x256x5xf32> to vector<256x5xf32>
    %cst_34 = arith.constant dense<0.000000e+00> : vector<256x32xf32>
    %73 = tpu.matmul %72, %0, %cst_34 {dimension_numbers = #tpu.dot_dimension_numbers<[1], [0], [0], [1], [0, 0, 1, 1], [], []>} : vector<256x5xf32>, vector<5x32xf32>, vector<256x32xf32> -> vector<256x32xf32>
    %cst_35 = arith.constant 0.000000e+00 : f32
    %74 = vector.broadcast %cst_35 : f32 to vector<256x32xf32>
    %75 = arith.maximumf %73, %74 : vector<256x32xf32>
    %76 = vector.extract_strided_slice %1 {offsets = [7, 0, 0], sizes = [1, 1, 32], strides = [1, 1, 1]} : vector<9x1x32xf32> to vector<1x1x32xf32>
    %77 = vector.shape_cast %76 : vector<1x1x32xf32> to vector<1x32xf32>
    %78 = vector.broadcast %77 : vector<1x32xf32> to vector<256x32xf32>
    %79 = arith.mulf %75, %78 : vector<256x32xf32>
    %80 = arith.addf %70, %79 : vector<256x32xf32>
    %c8 = arith.constant 8 : index
    %c0_36 = arith.constant 0 : index
    %c0_37 = arith.constant 0 : index
    %81 = vector.load %arg1[%c8, %c0_36, %c0_37] : memref<9x256x5xf32, #tpu.memory_space<vmem>>, vector<1x256x5xf32>
    %82 = vector.shape_cast %81 : vector<1x256x5xf32> to vector<256x5xf32>
    %cst_38 = arith.constant dense<0.000000e+00> : vector<256x32xf32>
    %83 = tpu.matmul %82, %0, %cst_38 {dimension_numbers = #tpu.dot_dimension_numbers<[1], [0], [0], [1], [0, 0, 1, 1], [], []>} : vector<256x5xf32>, vector<5x32xf32>, vector<256x32xf32> -> vector<256x32xf32>
    %cst_39 = arith.constant 0.000000e+00 : f32
    %84 = vector.broadcast %cst_39 : f32 to vector<256x32xf32>
    %85 = arith.maximumf %83, %84 : vector<256x32xf32>
    %86 = vector.extract_strided_slice %1 {offsets = [8, 0, 0], sizes = [1, 1, 32], strides = [1, 1, 1]} : vector<9x1x32xf32> to vector<1x1x32xf32>
    %87 = vector.shape_cast %86 : vector<1x1x32xf32> to vector<1x32xf32>
    %88 = vector.broadcast %87 : vector<1x32xf32> to vector<256x32xf32>
    %89 = arith.mulf %85, %88 : vector<256x32xf32>
    %90 = arith.addf %80, %89 : vector<256x32xf32>
    %c0_40 = arith.constant 0 : index
    %c0_41 = arith.constant 0 : index
    %91 = vector.load %arg4[%c0_40, %c0_41] : memref<1x32xf32, #tpu.memory_space<vmem>>, vector<1x32xf32>
    %92 = vector.broadcast %91 : vector<1x32xf32> to vector<256x32xf32>
    %93 = arith.addf %90, %92 : vector<256x32xf32>
    %cst_42 = arith.constant 0.000000e+00 : f32
    %94 = vector.broadcast %cst_42 : f32 to vector<256x32xf32>
    %95 = arith.maximumf %93, %94 : vector<256x32xf32>
    %c0_43 = arith.constant 0 : index
    %c0_44 = arith.constant 0 : index
    %96 = vector.load %arg5[%c0_43, %c0_44] : memref<32x8xf32, #tpu.memory_space<vmem>>, vector<32x8xf32>
    %cst_45 = arith.constant dense<0.000000e+00> : vector<256x8xf32>
    %97 = tpu.matmul %95, %96, %cst_45 {dimension_numbers = #tpu.dot_dimension_numbers<[1], [0], [0], [1], [0, 0, 1, 1], [], []>} : vector<256x32xf32>, vector<32x8xf32>, vector<256x8xf32> -> vector<256x8xf32>
    %c0_46 = arith.constant 0 : index
    %c0_47 = arith.constant 0 : index
    %98 = vector.load %arg6[%c0_46, %c0_47] : memref<1x8xf32, #tpu.memory_space<vmem>>, vector<1x8xf32>
    %99 = vector.broadcast %98 : vector<1x8xf32> to vector<256x8xf32>
    %100 = arith.addf %97, %99 : vector<256x8xf32>
    %c256_i32 = arith.constant 256 : i32
    %101 = arith.muli %arg0, %c256_i32 : i32
    %102 = tpu.iota {dimensions = array<i32: 0>} : vector<256x1xi32>
    %103 = vector.broadcast %101 : i32 to vector<256x1xi32>
    %104 = arith.addi %103, %102 : vector<256x1xi32>
    %c128_i32 = arith.constant 128 : i32
    %105 = vector.broadcast %c128_i32 : i32 to vector<256x1xi32>
    %106 = arith.cmpi slt, %104, %105 : vector<256x1xi32>
    %cst_48 = arith.constant 0.000000e+00 : f32
    %107 = vector.shape_cast %106 : vector<256x1xi1> to vector<256x1xi1>
    %108 = vector.broadcast %107 : vector<256x1xi1> to vector<256x8xi1>
    %109 = vector.broadcast %cst_48 : f32 to vector<256x8xf32>
    %110 = arith.select %108, %100, %109 : vector<256x8xi1>, vector<256x8xf32>
    %c0_49 = arith.constant 0 : index
    %c0_50 = arith.constant 0 : index
    %111 = vector.load %arg7[%c0_49, %c0_50] : memref<256x8xf32, #tpu.memory_space<vmem>>, vector<256x8xf32>
    tpu.vector_store %arg7[%c0_49, %c0_50], %110 {strides = array<i32>} : memref<256x8xf32, #tpu.memory_space<vmem>>, vector<256x8xf32>,
    return
  }
  func.func @transform_0(%arg0: i32) -> (i32, i32, i32) {
    %c0_i32 = arith.constant 0 : i32
    %c0_i32_0 = arith.constant 0 : i32
    %c0_i32_1 = arith.constant 0 : i32
    return %c0_i32, %arg0, %c0_i32_0 : i32, i32, i32
  }
  func.func @transform_1(%arg0: i32) -> (i32, i32) {
    %c0_i32 = arith.constant 0 : i32
    %c0_i32_0 = arith.constant 0 : i32
    %c0_i32_1 = arith.constant 0 : i32
    return %c0_i32, %c0_i32_0 : i32, i32
  }
  func.func @transform_2(%arg0: i32) -> (i32, i32, i32) {
    %c0_i32 = arith.constant 0 : i32
    %c0_i32_0 = arith.constant 0 : i32
    %c0_i32_1 = arith.constant 0 : i32
    %c0_i32_2 = arith.constant 0 : i32
    return %c0_i32, %c0_i32_0, %c0_i32_1 : i32, i32, i32
  }
  func.func @transform_3(%arg0: i32) -> (i32, i32) {
    %c0_i32 = arith.constant 0 : i32
    %c0_i32_0 = arith.constant 0 : i32
    %c0_i32_1 = arith.constant 0 : i32
    return %c0_i32, %c0_i32_0 : i32, i32
  }
  func.func @transform_4(%arg0: i32) -> (i32, i32) {
    %c0_i32 = arith.constant 0 : i32
    %c0_i32_0 = arith.constant 0 : i32
    %c0_i32_1 = arith.constant 0 : i32
    return %c0_i32, %c0_i32_0 : i32, i32
  }
  func.func @transform_5(%arg0: i32) -> (i32, i32) {
    %c0_i32 = arith.constant 0 : i32
    %c0_i32_0 = arith.constant 0 : i32
    %c0_i32_1 = arith.constant 0 : i32
    return %c0_i32, %c0_i32_0 : i32, i32
  }
  func.func @transform_6(%arg0: i32) -> (i32, i32) {
    %c0_i32 = arith.constant 0 : i32
    %c0_i32_0 = arith.constant 0 : i32
    return %arg0, %c0_i32 : i32, i32
  }
}

module attributes {stable_mosaic.version = 11 : i64} {
  func.func @_bn_norm_kernel(%arg0: i32, %arg1: memref<256x8xf32, #tpu.memory_space<vmem>>, %arg2: memref<2x8xf32, #tpu.memory_space<vmem>>, %arg3: memref<1x8xf32, #tpu.memory_space<vmem>>, %arg4: memref<1x8xf32, #tpu.memory_space<vmem>>, %arg5: memref<256x8xf32, #tpu.memory_space<vmem>>) attributes {dimension_semantics = [#tpu.dimension_semantics<parallel>], iteration_bounds = array<i64: 1>, scalar_prefetch = 0 : i64, scratch_operands = 0 : i64, tpu.core_type = #tpu.core_type<tc>, window_params = [{transform_indices = @transform_0, window_bounds = array<i64: 256, 8>}, {pipeline_mode = #tpu.pipeline_mode<synchronous>, transform_indices = @transform_1, window_bounds = array<i64: 2, 8>}, {pipeline_mode = #tpu.pipeline_mode<synchronous>, transform_indices = @transform_2, window_bounds = array<i64: 1, 8>}, {pipeline_mode = #tpu.pipeline_mode<synchronous>, transform_indices = @transform_3, window_bounds = array<i64: 1, 8>}, {transform_indices = @transform_4, window_bounds = array<i64: 256, 8>}]} {
    %c0 = arith.constant 0 : index
    %c0_0 = arith.constant 0 : index
    %0 = vector.load %arg2[%c0, %c0_0] : memref<2x8xf32, #tpu.memory_space<vmem>>, vector<2x8xf32>
    %1 = vector.extract_strided_slice %0 {offsets = [0, 0], sizes = [1, 8], strides = [1, 1]} : vector<2x8xf32> to vector<1x8xf32>
    %cst = arith.constant 7.812500e-03 : f32
    %2 = vector.broadcast %cst : f32 to vector<1x8xf32>
    %3 = arith.mulf %1, %2 : vector<1x8xf32>
    %4 = vector.extract_strided_slice %0 {offsets = [1, 0], sizes = [1, 8], strides = [1, 1]} : vector<2x8xf32> to vector<1x8xf32>
    %cst_1 = arith.constant 7.812500e-03 : f32
    %5 = vector.broadcast %cst_1 : f32 to vector<1x8xf32>
    %6 = arith.mulf %4, %5 : vector<1x8xf32>
    %7 = arith.mulf %3, %3 : vector<1x8xf32>
    %8 = arith.subf %6, %7 : vector<1x8xf32>
    %cst_2 = arith.constant 9.99999974E-6 : f32
    %9 = vector.broadcast %cst_2 : f32 to vector<1x8xf32>
    %10 = arith.addf %8, %9 : vector<1x8xf32>
    %11 = math.rsqrt %10 : vector<1x8xf32>
    %c0_3 = arith.constant 0 : index
    %c0_4 = arith.constant 0 : index
    %12 = vector.load %arg3[%c0_3, %c0_4] : memref<1x8xf32, #tpu.memory_space<vmem>>, vector<1x8xf32>
    %13 = arith.mulf %12, %11 : vector<1x8xf32>
    %c0_5 = arith.constant 0 : index
    %c0_6 = arith.constant 0 : index
    %14 = vector.load %arg4[%c0_5, %c0_6] : memref<1x8xf32, #tpu.memory_space<vmem>>, vector<1x8xf32>
    %15 = arith.mulf %3, %13 : vector<1x8xf32>
    %16 = arith.subf %14, %15 : vector<1x8xf32>
    %c0_7 = arith.constant 0 : index
    %c0_8 = arith.constant 0 : index
    %17 = vector.load %arg1[%c0_7, %c0_8] : memref<256x8xf32, #tpu.memory_space<vmem>>, vector<256x8xf32>
    %18 = vector.broadcast %13 : vector<1x8xf32> to vector<256x8xf32>
    %19 = arith.mulf %17, %18 : vector<256x8xf32>
    %20 = vector.broadcast %16 : vector<1x8xf32> to vector<256x8xf32>
    %21 = arith.addf %19, %20 : vector<256x8xf32>
    %c0_9 = arith.constant 0 : index
    %c0_10 = arith.constant 0 : index
    %22 = vector.load %arg5[%c0_9, %c0_10] : memref<256x8xf32, #tpu.memory_space<vmem>>, vector<256x8xf32>
    tpu.vector_store %arg5[%c0_9, %c0_10], %21 {strides = array<i32>} : memref<256x8xf32, #tpu.memory_space<vmem>>, vector<256x8xf32>,
    return
  }
  func.func @transform_0(%arg0: i32) -> (i32, i32) {
    %c0_i32 = arith.constant 0 : i32
    %c0_i32_0 = arith.constant 0 : i32
    return %arg0, %c0_i32 : i32, i32
  }
  func.func @transform_1(%arg0: i32) -> (i32, i32) {
    %c0_i32 = arith.constant 0 : i32
    %c0_i32_0 = arith.constant 0 : i32
    %c0_i32_1 = arith.constant 0 : i32
    return %c0_i32, %c0_i32_0 : i32, i32
  }
  func.func @transform_2(%arg0: i32) -> (i32, i32) {
    %c0_i32 = arith.constant 0 : i32
    %c0_i32_0 = arith.constant 0 : i32
    %c0_i32_1 = arith.constant 0 : i32
    return %c0_i32, %c0_i32_0 : i32, i32
  }
  func.func @transform_3(%arg0: i32) -> (i32, i32) {
    %c0_i32 = arith.constant 0 : i32
    %c0_i32_0 = arith.constant 0 : i32
    %c0_i32_1 = arith.constant 0 : i32
    return %c0_i32, %c0_i32_0 : i32, i32
  }
  func.func @transform_4(%arg0: i32) -> (i32, i32) {
    %c0_i32 = arith.constant 0 : i32
    %c0_i32_0 = arith.constant 0 : i32
    return %arg0, %c0_i32 : i32, i32
  }
}

</mosaic_0001>

<bundles_post_ra>
// kernel: patch_merging_forward.4
= control target key start
LH: loop header
LB: loop body
LE: loop exit
PB: predicated region body
PF: predicated region fallthrough
CT: control target
= control target key end

     0   :  { %vm12_vm0 = vcmask 58368   ;;  %vm46_vm1 = vcmask 64512   ;;  %v228_v0 = vmov 0.0   ;;  %vm218_vm2 = vcmask 1040384   ;;  %s410_s0 = inlined_call_operand.vmem [shape: f32[256,8], index: 0, kind: input, shape index: {}]   ;;  %s411_s1 = inlined_call_operand.vmem [shape: f32[2,8], index: 1, kind: output, shape index: {}]  }
   0x1   :  { %13 = vst.msk [vmem:[%s411_s1] sm:$0x3] %vm12_vm0, %v228_v0  ;;  %v14_v1 = vld [vmem:[%s410_s0] sm:$0xff]  ;;  %v15_v2 = vld [vmem:[%s410_s0 + $0x8] sm:$0xff]  ;;  %v16_v3 = vld [vmem:[%s410_s0 + $0x10] sm:$0xff] }
   0x2   :  { %v47_v4 = vsel %vm46_vm1, %v14_v1, 0.0  ;;  %v48_v5 = vsel %vm46_vm1, %v15_v2, 0.0  ;;  %v50_v6 = vsel %vm46_vm1, %v16_v3, 0.0  ;;  %v17_v7 = vld [vmem:[%s410_s0 + $0x18] sm:$0xff]  ;;  %v18_v10 = vld [vmem:[%s410_s0 + $0x20] sm:$0xff]  ;;  %v19_v13 = vld [vmem:[%s410_s0 + $0x28] sm:$0xff]  ;;  %v116_v28 = vmul.f32 %v14_v1, %v14_v1 }
   0x3   :  { %v49_v8 = vadd.f32 %v48_v5, %v47_v4  ;;  %v52_v9 = vsel %vm46_vm1, %v17_v7, 0.0  ;;  %v54_v12 = vsel %vm46_vm1, %v18_v10, 0.0  ;;  %v56_v15 = vsel %vm46_vm1, %v19_v13, 0.0  ;;  %v20_v16 = vld [vmem:[%s410_s0 + $0x30] sm:$0xff]  ;;  %v21_v19 = vld [vmem:[%s410_s0 + $0x38] sm:$0xff]  ;;  %v22_v22 = vld [vmem:[%s410_s0 + $0x40] sm:$0xff] }
   0x4   :  { %v58_v18 = vsel %vm46_vm1, %v20_v16, 0.0  ;;  %v60_v21 = vsel %vm46_vm1, %v21_v19, 0.0  ;;  %v62_v24 = vsel %vm46_vm1, %v22_v22, 0.0  ;;  %v23_v25 = vld [vmem:[%s410_s0 + $0x48] sm:$0xff]  ;;  %v117_v29 = vmul.f32 %v15_v2, %v15_v2  ;;  %v24_v31 = vld [vmem:[%s410_s0 + $0x50] sm:$0xff]  ;;  %v25_v33 = vld [vmem:[%s410_s0 + $0x58] sm:$0xff] }
   0x5   :  { %v51_v11 = vadd.f32 %v50_v6, %v49_v8  ;;  %v64_v27 = vsel %vm46_vm1, %v23_v25, 0.0  ;;  %v118_v30 = vmul.f32 %v16_v3, %v16_v3  ;;  %v66_v34 = vsel %vm46_vm1, %v24_v31, 0.0  ;;  %v26_v42 = vld [vmem:[%s410_s0 + $0x60] sm:$0xff]  ;;  %v27_v48 = vld [vmem:[%s410_s0 + $0x68] sm:$0xff]  ;;  %v28_v54 = vld [vmem:[%s410_s0 + $0x70] sm:$0xff] }
   0x6   :  { %v119_v35 = vmul.f32 %v17_v7, %v17_v7  ;;  %v68_v37 = vsel %vm46_vm1, %v25_v33, 0.0  ;;  %v120_v38 = vmul.f32 %v18_v10, %v18_v10  ;;  %v148_v39 = vsel %vm46_vm1, %v116_v28, 0.0  ;;  %v29_v60 = vld [vmem:[%s410_s0 + $0x78] sm:$0xff]  ;;  %v30_v2 = vld [vmem:[%s410_s0 + $0x80] sm:$0xff]  ;;  %v31_v8 = vld [vmem:[%s410_s0 + $0x88] sm:$0xff] }
   0x7   :  { %v53_v14 = vadd.f32 %v52_v9, %v51_v11  ;;  %v149_v40 = vsel %vm46_vm1, %v117_v29, 0.0  ;;  %v151_v41 = vsel %vm46_vm1, %v118_v30, 0.0  ;;  %v70_v45 = vsel %vm46_vm1, %v26_v42, 0.0 }
   0x8   :  { %v150_v44 = vadd.f32 %v149_v40, %v148_v39  ;;  %v121_v46 = vmul.f32 %v19_v13, %v19_v13  ;;  %v153_v47 = vsel %vm46_vm1, %v119_v35, 0.0  ;;  %v72_v51 = vsel %vm46_vm1, %v27_v48, 0.0 }
   0x9   :  { %v55_v17 = vadd.f32 %v54_v12, %v53_v14  ;;  %v122_v52 = vmul.f32 %v20_v16, %v20_v16  ;;  %v155_v53 = vsel %vm46_vm1, %v120_v38, 0.0  ;;  %v74_v57 = vsel %vm46_vm1, %v28_v54, 0.0  ;;  %v32_v14 = vld [vmem:[%s410_s0 + $0x90] sm:$0xff] }
   0xa   :  { %v152_v50 = vadd.f32 %v151_v41, %v150_v44  ;;  %v123_v58 = vmul.f32 %v21_v19, %v21_v19  ;;  %v157_v59 = vsel %vm46_vm1, %v121_v46, 0.0  ;;  %v76_v63 = vsel %vm46_vm1, %v29_v60, 0.0  ;;  %v36_v38 = vld [vmem:[%s410_s0 + $0xb0] sm:$0xff]  ;;  %v37_v44 = vld [vmem:[%s410_s0 + $0xb8] sm:$0xff] }
   0xb   :  { %v57_v20 = vadd.f32 %v56_v15, %v55_v17  ;;  %v124_v0 = vmul.f32 %v22_v22, %v22_v22  ;;  %v159_v1 = vsel %vm46_vm1, %v122_v52, 0.0  ;;  %v78_v5 = vsel %vm46_vm1, %v30_v2, 0.0 }
   0xc   :  { %v154_v56 = vadd.f32 %v153_v47, %v152_v50  ;;  %v125_v6 = vmul.f32 %v23_v25, %v23_v25  ;;  %v161_v7 = vsel %vm46_vm1, %v123_v58, 0.0  ;;  %v80_v11 = vsel %vm46_vm1, %v31_v8, 0.0  ;;  %v38_v50 = vld [vmem:[%s410_s0 + $0xc0] sm:$0xff] }
   0xd   :  { %v59_v23 = vadd.f32 %v58_v18, %v57_v20  ;;  %v126_v12 = vmul.f32 %v24_v31, %v24_v31  ;;  %v163_v13 = vsel %vm46_vm1, %v124_v0, 0.0  ;;  %v82_v17 = vsel %vm46_vm1, %v32_v14, 0.0  ;;  %v33_v20 = vld [vmem:[%s410_s0 + $0x98] sm:$0xff] }
   0xe   :  { %v156_v62 = vadd.f32 %v155_v53, %v154_v56  ;;  %v127_v18 = vmul.f32 %v25_v33, %v25_v33  ;;  %v165_v19 = vsel %vm46_vm1, %v125_v6, 0.0  ;;  %v129_v30 = vmul.f32 %v27_v48, %v27_v48  ;;  %v39_v56 = vld [vmem:[%s410_s0 + $0xc8] sm:$0xff] }
   0xf   :  { %v61_v26 = vadd.f32 %v60_v21, %v59_v23  ;;  %v84_v23 = vsel %vm46_vm1, %v33_v20, 0.0  ;;  %v167_v25 = vsel %vm46_vm1, %v126_v12, 0.0  ;;  %v90_v41 = vsel %vm46_vm1, %v36_v38, 0.0 }
  0x10   :  { %v158_v4 = vadd.f32 %v157_v59, %v156_v62  ;;  %v169_v31 = vsel %vm46_vm1, %v127_v18, 0.0  ;;  %v92_v47 = vsel %vm46_vm1, %v37_v44, 0.0  ;;  %v132_v48 = vmul.f32 %v30_v2, %v30_v2  ;;  %v40_v62 = vld [vmem:[%s410_s0 + $0xd0] sm:$0xff] }
  0x11   :  { %v63_v32 = vadd.f32 %v62_v24, %v61_v26  ;;  %v128_v24 = vmul.f32 %v26_v42, %v26_v42  ;;  %v34_v26 = vld [vmem:[%s410_s0 + $0xa0] sm:$0xff]  ;;  %v131_v42 = vmul.f32 %v29_v60, %v29_v60  ;;  %v94_v53 = vsel %vm46_vm1, %v38_v50, 0.0 }
  0x12   :  { %v160_v10 = vadd.f32 %v159_v1, %v158_v4  ;;  %v86_v29 = vsel %vm46_vm1, %v34_v26, 0.0  ;;  %v96_v59 = vsel %vm46_vm1, %v39_v56, 0.0  ;;  %v134_v60 = vmul.f32 %v32_v14, %v32_v14  ;;  %v41_v4 = vld [vmem:[%s410_s0 + $0xd8] sm:$0xff] }
  0x13   :  { %v65_v36 = vadd.f32 %v64_v27, %v63_v32  ;;  %v35_v32 = vld [vmem:[%s410_s0 + $0xa8] sm:$0xff]  ;;  %v98_v1 = vsel %vm46_vm1, %v40_v62, 0.0  ;;  %v135_v2 = vmul.f32 %v33_v20, %v33_v20  ;;  %v138_v20 = vmul.f32 %v36_v38, %v36_v38 }
  0x14   :  { %v162_v16 = vadd.f32 %v161_v7, %v160_v10  ;;  %v88_v35 = vsel %vm46_vm1, %v35_v32, 0.0  ;;  %v100_v7 = vsel %vm46_vm1, %v41_v4, 0.0  ;;  %v42_v10 = vld [vmem:[%s410_s0 + $0xe0] sm:$0xff]  ;;  %v137_v14 = vmul.f32 %v35_v32, %v35_v32 }
  0x15   :  { %v67_v43 = vadd.f32 %v66_v34, %v65_v36  ;;  %v130_v36 = vmul.f32 %v28_v54, %v28_v54  ;;  %v133_v54 = vmul.f32 %v31_v8, %v31_v8  ;;  %v136_v8 = vmul.f32 %v34_v26, %v34_v26  ;;  %v44_v26 = vld [vmem:[%s410_s0 + $0xf0] sm:$0xff] }
  0x16   :  { %v164_v22 = vadd.f32 %v163_v13, %v162_v16  ;;  %v102_v13 = vsel %vm46_vm1, %v42_v10, 0.0  ;;  %v43_v16 = vld [vmem:[%s410_s0 + $0xe8] sm:$0xff] }
  0x17   :  { %v69_v49 = vadd.f32 %v68_v37, %v67_v43  ;;  %v171_v37 = vsel %vm46_vm1, %v128_v24, 0.0  ;;  %v173_v43 = vsel %vm46_vm1, %v129_v30, 0.0  ;;  %v139_v24 = vmul.f32 %v37_v44, %v37_v44 }
  0x18   :  { %v166_v28 = vadd.f32 %v165_v19, %v164_v22  ;;  %v104_v19 = vsel %vm46_vm1, %v43_v16, 0.0  ;;  %v140_v30 = vmul.f32 %v38_v50, %v38_v50 }
  0x19   :  { %v71_v55 = vadd.f32 %v70_v45, %v69_v49  ;;  %v175_v49 = vsel %vm46_vm1, %v130_v36, 0.0 }
  0x1a   :  { %v168_v34 = vadd.f32 %v167_v25, %v166_v28  ;;  %v189_v25 = vsel %vm46_vm1, %v137_v14, 0.0 }
  0x1b   :  { %v73_v61 = vadd.f32 %v72_v51, %v71_v55  ;;  %v177_v55 = vsel %vm46_vm1, %v131_v42, 0.0  ;;  %v143_v42 = vmul.f32 %v41_v4, %v41_v4 }
  0x1c   :  { %v170_v40 = vadd.f32 %v169_v31, %v168_v34  ;;  %v191_v31 = vsel %vm46_vm1, %v138_v20, 0.0  ;;  %v193_v34 = vsel %vm46_vm1, %v139_v24, 0.0 }
  0x1d   :  { %v75_v3 = vadd.f32 %v74_v57, %v73_v61  ;;  %v179_v61 = vsel %vm46_vm1, %v132_v48, 0.0  ;;  %v201_v50 = vsel %vm46_vm1, %v143_v42, 0.0 }
  0x1e   :  { %v172_v46 = vadd.f32 %v171_v37, %v170_v40  ;;  %v195_v40 = vsel %vm46_vm1, %v140_v30, 0.0 }
  0x1f   :  { %v77_v9 = vadd.f32 %v76_v63, %v75_v3  ;;  %v181_v3 = vsel %vm46_vm1, %v133_v54, 0.0 }
  0x20   :  { %v174_v52 = vadd.f32 %v173_v43, %v172_v46  ;;  %v144_v46 = vmul.f32 %v42_v10, %v42_v10 }
  0x21   :  { %v79_v15 = vadd.f32 %v78_v5, %v77_v9  ;;  %v183_v9 = vsel %vm46_vm1, %v134_v60, 0.0 }
  0x22   :  { %v176_v58 = vadd.f32 %v175_v49, %v174_v52  ;;  %v145_v49 = vmul.f32 %v43_v16, %v43_v16  ;;  %v203_v54 = vsel %vm46_vm1, %v144_v46, 0.0 }
  0x23   :  { %v81_v21 = vadd.f32 %v80_v11, %v79_v15  ;;  %v185_v15 = vsel %vm46_vm1, %v135_v2, 0.0 }
  0x24   :  { %v178_v0 = vadd.f32 %v177_v55, %v176_v58 }
  0x25   :  { %v83_v27 = vadd.f32 %v82_v17, %v81_v21  ;;  %v187_v21 = vsel %vm46_vm1, %v136_v8, 0.0 }
  0x26   :  { %v180_v6 = vadd.f32 %v179_v61, %v178_v0 }
  0x27   :  { %v85_v33 = vadd.f32 %v84_v23, %v83_v27 }
  0x28   :  { %v182_v12 = vadd.f32 %v181_v3, %v180_v6 }
  0x29   :  { %v87_v39 = vadd.f32 %v86_v29, %v85_v33  ;;  %v106_v29 = vsel %vm46_vm1, %v44_v26, 0.0  ;;  %v141_v33 = vmul.f32 %v39_v56, %v39_v56 }
  0x2a   :  { %v184_v18 = vadd.f32 %v183_v9, %v182_v12 }
  0x2b   :  { %v89_v45 = vadd.f32 %v88_v35, %v87_v39  ;;  %v45_v35 = vld [vmem:[%s410_s0 + $0xf8] sm:$0xff]  ;;  %v142_v39 = vmul.f32 %v40_v62, %v40_v62  ;;  %v197_v43 = vsel %vm46_vm1, %v141_v33, 0.0 }
  0x2c   :  { %v186_v23 = vadd.f32 %v185_v15, %v184_v18  ;;  %v108_v38 = vsel %vm46_vm1, %v45_v35, 0.0  ;;  %v147_v56 = vmul.f32 %v45_v35, %v45_v35 }
  0x2d   :  { %v91_v51 = vadd.f32 %v90_v41, %v89_v45 }
  0x2e   :  { %v188_v28 = vadd.f32 %v187_v21, %v186_v23  ;;  %v209_v62 = vsel %vm46_vm1, %v147_v56, 0.0 }
  0x2f   :  { %v93_v57 = vadd.f32 %v92_v47, %v91_v51  ;;  %v199_v47 = vsel %vm46_vm1, %v142_v39, 0.0 }
  0x30   :  { %v190_v32 = vadd.f32 %v189_v25, %v188_v28 }
  0x31   :  { %v95_v63 = vadd.f32 %v94_v53, %v93_v57  ;;  %v146_v53 = vmul.f32 %v44_v26, %v44_v26  ;;  %v205_v57 = vsel %vm46_vm1, %v145_v49, 0.0 }
  0x32   :  { %v192_v37 = vadd.f32 %v191_v31, %v190_v32 }
  0x33   :  { %v97_v5 = vadd.f32 %v96_v59, %v95_v63  ;;  %v207_v60 = vsel %vm46_vm1, %v146_v53, 0.0 }
  0x34   :  { %v194_v41 = vadd.f32 %v193_v34, %v192_v37 }
  0x35   :  { %v99_v11 = vadd.f32 %v98_v1, %v97_v5 }
  0x36   :  { %v196_v45 = vadd.f32 %v195_v40, %v194_v41 }
  0x37   :  { %v101_v17 = vadd.f32 %v100_v7, %v99_v11  ;;  %v217_v11 = vld [vmem:[%s411_s1] sm:$0x3] }
  0x38   :  { %v198_v48 = vadd.f32 %v197_v43, %v196_v45 }
  0x39   :  { %v103_v22 = vadd.f32 %v102_v13, %v101_v17 }
  0x3a   :  { %v200_v52 = vadd.f32 %v199_v47, %v198_v48 }
  0x3b   :  { %v105_v27 = vadd.f32 %v104_v19, %v103_v22 }
  0x3c   :  { %v202_v55 = vadd.f32 %v201_v50, %v200_v52 }
  0x3d   :  { %v107_v36 = vadd.f32 %v106_v29, %v105_v27 }
  0x3e   :  { %v204_v59 = vadd.f32 %v203_v54, %v202_v55 }
  0x3f   :  { %v109_v44 = vadd.f32 %v108_v38, %v107_v36 }
  0x40   :  { %v206_v61 = vadd.f32 %v205_v57, %v204_v59 }
  0x41   :  { %v110_v51 = vrot.slane %v109_v44, 4 }
  0x42   :  { %v208_v0 = vadd.f32 %v207_v60, %v206_v61 }
  0x43   :  { %v111_v58 = vadd.f32 %v110_v51, %v109_v44 }
  0x44   :  { %v210_v1 = vadd.f32 %v209_v62, %v208_v0 }
  0x45   :  { %v112_v63 = vrot.slane %v111_v58, 2 }
  0x46   :  { %v211_v3 = vrot.slane %v210_v1, 4 }
  0x47   :  { %v113_v2 = vadd.f32 %v112_v63, %v111_v58 }
  0x48   :  { %v212_v4 = vadd.f32 %v211_v3, %v210_v1 }
  0x49   :  { %v114_v5 = vrot.slane %v113_v2, 1 }
  0x4a   :  { %v213_v6 = vrot.slane %v212_v4, 2 }
  0x4b   :  { %v115_v8 = vadd.f32 %v114_v5, %v113_v2 }
  0x4c   :  { %v214_v7 = vadd.f32 %v213_v6, %v212_v4 }
  0x4e   :  { %v215_v9 = vrot.slane %v214_v7, 1 }
  0x50   :  { %v216_v10 = vadd.f32 %v215_v9, %v214_v7 }
  0x52   :  { %v219_v12 = vsel %vm218_vm2, %v115_v8, %v216_v10 }
  0x53   :  { %v220_v13 = vadd.f32 %v219_v12, %v217_v11 }
  0x55   :  { %222 = vst.msk [vmem:[%s411_s1] sm:$0x3] %vm12_vm0, %v220_v13 }

// kernel: patch_merging_forward.5
= control target key start
LH: loop header
LB: loop body
LE: loop exit
PB: predicated region body
PF: predicated region fallthrough
CT: control target
= control target key end

     0   :  { %v196_v6 = vmov 1966171168   ;;  %v31_v8 = vlaneseq  ;;  %vm156_vm0 = vcmask 64512   ;;  %s523_s1 = inlined_call_operand.vmem [shape: f32[2,8], index: 1, kind: input, shape index: {}]   ;;  %s524_s2 = inlined_call_operand.vmem [shape: f32[1,8], index: 2, kind: input, shape index: {}]   ;;  %s525_s0 = inlined_call_operand.vmem [shape: f32[256,8], index: 0, kind: input, shape index: {}, may-alias: {0,4}]   ;;  %s526_s3 = inlined_call_operand.vmem [shape: f32[1,8], index: 3, kind: input, shape index: {}]   ;;  %s527_s4 = inlined_call_operand.vmem [shape: f32[256,8], index: 4, kind: output, shape index: {}, may-alias: {0,4}]  }
   0x1   :  { %v17_v0 = vld [vmem:[%s523_s1] sm:$0x3]  ;;  %v29_v7 = vunpack.c.l.s4 %v196_v6  ;;  %v49_v21 = vld [vmem:[%s525_s0 + $0x8] sm:$0xff]  ;;  %v50_v22 = vld [vmem:[%s525_s0 + $0x10] sm:$0xff] }
   0x2   :  { %v18_v1 = vmul.f32 0.0078125, %v17_v0  ;;  %v32_v10 = vshrl.u32 %v31_v8, 7  ;;  %v26_v15 = vld [vmem:[%s524_s2] sm:$0x1]  ;;  %v51_v23 = vld [vmem:[%s525_s0 + $0x18] sm:$0xff]  ;;  %v53_v27 = vld [vmem:[%s525_s0 + $0x28] sm:$0xff] }
   0x3   :  { %v30_v9 = vunpack.c.0.s8 %v29_v7  ;;  %v45_v19 = vld [vmem:[%s526_s3] sm:$0x1]  ;;  %v54_v28 = vld [vmem:[%s525_s0 + $0x30] sm:$0xff]  ;;  %v55_v29 = vld [vmem:[%s525_s0 + $0x38] sm:$0xff] }
   0x4   :  { %v19_v2 = vmul.f32 %v18_v1, %v18_v1  ;;  %v83_v17 = vsub.s32 0, %v32_v10  ;;  %v48_v20 = vld [vmem:[%s525_s0] sm:$0xff]  ;;  %v57_v31 = vld [vmem:[%s525_s0 + $0x48] sm:$0xff]  ;;  %v58_v32 = vld [vmem:[%s525_s0 + $0x50] sm:$0xff] }
   0x5   :  { %v33_v11 = vsub.s32 %v30_v9, %v32_v10  ;;  %v52_v24 = vld [vmem:[%s525_s0 + $0x20] sm:$0xff]  ;;  %v59_v37 = vld [vmem:[%s525_s0 + $0x58] sm:$0xff]  ;;  %v61_v39 = vld [vmem:[%s525_s0 + $0x68] sm:$0xff] }
   0x6   :  { %v21_v3 = vrot.slane %v19_v2, 7  ;;  %v56_v30 = vld [vmem:[%s525_s0 + $0x40] sm:$0xff]  ;;  %v62_v56 = vld [vmem:[%s525_s0 + $0x70] sm:$0xff]  ;;  %v63_v57 = vld [vmem:[%s525_s0 + $0x78] sm:$0xff] }
   0x7   :  { %v60_v38 = vld [vmem:[%s525_s0 + $0x60] sm:$0xff]  ;;  %v65_v63 = vld [vmem:[%s525_s0 + $0x88] sm:$0xff]  ;;  %v66_v0 = vld [vmem:[%s525_s0 + $0x90] sm:$0xff] }
   0x8   :  { %v23_v4 = vsub.f32 %v18_v1, %v21_v3  ;;  %v64_v58 = vld [vmem:[%s525_s0 + $0x80] sm:$0xff] }
   0xa   :  { %v24_v5 = vadd.f32 1e-05, %v23_v4 }
   0xc   :  { %194 = vrsqrt.f32 %v24_v5 }
  0x16   :  { %v195_v12 = vpop.eup %194 }
  0x17   :  { %v34_v13 = vrot.slane %v195_v12, %v33_v11 }
  0x19   :  { %v35_v14 = vcombine.high %v34_v13, %v34_v13 }
  0x1b   :  { %v42_v16 = vrot.slane %v35_v14, %v33_v11 }
  0x1d   :  { %v44_v18 = vmul.f32 %v42_v16, %v26_v15 }
  0x1f   :  { %v46_v25 = vmul.f32 %v44_v18, %v18_v1  ;;  %v246_v26 = vrot.slane %v44_v18, %v83_v17  ;;  %v67_v1 = vld [vmem:[%s525_s0 + $0x98] sm:$0xff] }
  0x21   :  { %v47_v33 = vsub.f32 %v45_v19, %v46_v25  ;;  %v86_v34 = vmul.f32 %v246_v26, %v48_v20  ;;  %v87_v35 = vmul.f32 %v246_v26, %v49_v21  ;;  %v88_v36 = vmul.f32 %v246_v26, %v50_v22 }
  0x22   :  { %v89_v40 = vmul.f32 %v246_v26, %v51_v23  ;;  %v90_v41 = vmul.f32 %v246_v26, %v52_v24  ;;  %v91_v42 = vmul.f32 %v246_v26, %v53_v27  ;;  %v92_v43 = vmul.f32 %v246_v26, %v54_v28 }
  0x23   :  { %v282_v44 = vrot.slane %v47_v33, %v83_v17  ;;  %v93_v45 = vmul.f32 %v246_v26, %v55_v29  ;;  %v94_v46 = vmul.f32 %v246_v26, %v56_v30  ;;  %v95_v47 = vmul.f32 %v246_v26, %v57_v31 }
  0x24   :  { %v96_v48 = vmul.f32 %v246_v26, %v58_v32  ;;  %v97_v49 = vmul.f32 %v246_v26, %v59_v37  ;;  %v98_v50 = vmul.f32 %v246_v26, %v60_v38  ;;  %v99_v51 = vmul.f32 %v246_v26, %v61_v39 }
  0x25   :  { %v124_v52 = vadd.f32 %v282_v44, %v86_v34  ;;  %v125_v53 = vadd.f32 %v282_v44, %v87_v35  ;;  %v126_v54 = vadd.f32 %v282_v44, %v88_v36  ;;  %v127_v55 = vadd.f32 %v282_v44, %v89_v40 }
  0x26   :  { %v128_v59 = vadd.f32 %v282_v44, %v90_v41  ;;  %v129_v60 = vadd.f32 %v282_v44, %v91_v42  ;;  %v130_v61 = vadd.f32 %v282_v44, %v92_v43  ;;  %v131_v62 = vadd.f32 %v282_v44, %v93_v45 }
  0x27   :  { %157 = vst.msk [vmem:[%s527_s4] sm:$0xff] %vm156_vm0, %v124_v52  ;;  %158 = vst.msk [vmem:[%s527_s4 + $0x8] sm:$0xff] %vm156_vm0, %v125_v53  ;;  %v132_v2 = vadd.f32 %v282_v44, %v94_v46  ;;  %v133_v3 = vadd.f32 %v282_v44, %v95_v47  ;;  %v134_v4 = vadd.f32 %v282_v44, %v96_v48 }
  0x28   :  { %159 = vst.msk [vmem:[%s527_s4 + $0x10] sm:$0xff] %vm156_vm0, %v126_v54  ;;  %160 = vst.msk [vmem:[%s527_s4 + $0x18] sm:$0xff] %vm156_vm0, %v127_v55  ;;  %v135_v5 = vadd.f32 %v282_v44, %v97_v49  ;;  %v136_v8 = vadd.f32 %v282_v44, %v98_v50  ;;  %v137_v9 = vadd.f32 %v282_v44, %v99_v51 }
  0x29   :  { %v100_v10 = vmul.f32 %v246_v26, %v62_v56  ;;  %v101_v11 = vmul.f32 %v246_v26, %v63_v57  ;;  %v102_v12 = vmul.f32 %v246_v26, %v64_v58  ;;  %v103_v13 = vmul.f32 %v246_v26, %v65_v63 }
  0x2a   :  { %v104_v14 = vmul.f32 %v246_v26, %v66_v0  ;;  %v105_v15 = vmul.f32 %v246_v26, %v67_v1 }
  0x2b   :  { %v138_v19 = vadd.f32 %v282_v44, %v100_v10  ;;  %v139_v20 = vadd.f32 %v282_v44, %v101_v11  ;;  %v140_v27 = vadd.f32 %v282_v44, %v102_v12  ;;  %v141_v28 = vadd.f32 %v282_v44, %v103_v13 }
  0x2c   :  { %v142_v29 = vadd.f32 %v282_v44, %v104_v14  ;;  %v143_v30 = vadd.f32 %v282_v44, %v105_v15 }
  0x2f   :  { %v68_v6 = vld [vmem:[%s525_s0 + $0xa0] sm:$0xff]  ;;  %v69_v7 = vld [vmem:[%s525_s0 + $0xa8] sm:$0xff] }
  0x30   :  { %161 = vst.msk [vmem:[%s527_s4 + $0x20] sm:$0xff] %vm156_vm0, %v128_v59  ;;  %162 = vst.msk [vmem:[%s527_s4 + $0x28] sm:$0xff] %vm156_vm0, %v129_v60  ;;  %v106_v21 = vmul.f32 %v246_v26, %v68_v6  ;;  %v107_v22 = vmul.f32 %v246_v26, %v69_v7 }
  0x31   :  { %163 = vst.msk [vmem:[%s527_s4 + $0x30] sm:$0xff] %vm156_vm0, %v130_v61  ;;  %164 = vst.msk [vmem:[%s527_s4 + $0x38] sm:$0xff] %vm156_vm0, %v131_v62 }
  0x32   :  { %165 = vst.msk [vmem:[%s527_s4 + $0x40] sm:$0xff] %vm156_vm0, %v132_v2  ;;  %166 = vst.msk [vmem:[%s527_s4 + $0x48] sm:$0xff] %vm156_vm0, %v133_v3  ;;  %v144_v33 = vadd.f32 %v282_v44, %v106_v21  ;;  %v145_v34 = vadd.f32 %v282_v44, %v107_v22 }
  0x33   :  { %167 = vst.msk [vmem:[%s527_s4 + $0x50] sm:$0xff] %vm156_vm0, %v134_v4  ;;  %168 = vst.msk [vmem:[%s527_s4 + $0x58] sm:$0xff] %vm156_vm0, %v135_v5 }
  0x3a   :  { %v70_v16 = vld [vmem:[%s525_s0 + $0xb0] sm:$0xff]  ;;  %v71_v17 = vld [vmem:[%s525_s0 + $0xb8] sm:$0xff]  ;;  %v72_v18 = vld [vmem:[%s525_s0 + $0xc0] sm:$0xff] }
  0x3b   :  { %169 = vst.msk [vmem:[%s527_s4 + $0x60] sm:$0xff] %vm156_vm0, %v136_v8  ;;  %170 = vst.msk [vmem:[%s527_s4 + $0x68] sm:$0xff] %vm156_vm0, %v137_v9  ;;  %v108_v35 = vmul.f32 %v246_v26, %v70_v16  ;;  %v109_v36 = vmul.f32 %v246_v26, %v71_v17  ;;  %v110_v37 = vmul.f32 %v246_v26, %v72_v18 }
  0x3d   :  { %v146_v43 = vadd.f32 %v282_v44, %v108_v35  ;;  %v147_v45 = vadd.f32 %v282_v44, %v109_v36  ;;  %v148_v48 = vadd.f32 %v282_v44, %v110_v37 }
  0x42   :  { %v73_v23 = vld [vmem:[%s525_s0 + $0xc8] sm:$0xff]  ;;  %v74_v24 = vld [vmem:[%s525_s0 + $0xd0] sm:$0xff]  ;;  %v75_v25 = vld [vmem:[%s525_s0 + $0xd8] sm:$0xff] }
  0x43   :  { %v76_v31 = vld [vmem:[%s525_s0 + $0xe0] sm:$0xff]  ;;  %v77_v32 = vld [vmem:[%s525_s0 + $0xe8] sm:$0xff]  ;;  %v111_v38 = vmul.f32 %v246_v26, %v73_v23  ;;  %v112_v39 = vmul.f32 %v246_v26, %v74_v24  ;;  %v113_v40 = vmul.f32 %v246_v26, %v75_v25 }
  0x44   :  { %171 = vst.msk [vmem:[%s527_s4 + $0x70] sm:$0xff] %vm156_vm0, %v138_v19  ;;  %172 = vst.msk [vmem:[%s527_s4 + $0x78] sm:$0xff] %vm156_vm0, %v139_v20  ;;  %v114_v46 = vmul.f32 %v246_v26, %v76_v31  ;;  %v115_v47 = vmul.f32 %v246_v26, %v77_v32 }
  0x45   :  { %173 = vst.msk [vmem:[%s527_s4 + $0x80] sm:$0xff] %vm156_vm0, %v140_v27  ;;  %174 = vst.msk [vmem:[%s527_s4 + $0x88] sm:$0xff] %vm156_vm0, %v141_v28  ;;  %v149_v49 = vadd.f32 %v282_v44, %v111_v38  ;;  %v150_v50 = vadd.f32 %v282_v44, %v112_v39  ;;  %v151_v51 = vadd.f32 %v282_v44, %v113_v40 }
  0x46   :  { %175 = vst.msk [vmem:[%s527_s4 + $0x90] sm:$0xff] %vm156_vm0, %v142_v29  ;;  %176 = vst.msk [vmem:[%s527_s4 + $0x98] sm:$0xff] %vm156_vm0, %v143_v30  ;;  %v152_v52 = vadd.f32 %v282_v44, %v114_v46  ;;  %v153_v53 = vadd.f32 %v282_v44, %v115_v47 }
  0x4d   :  { %v78_v41 = vld [vmem:[%s525_s0 + $0xf0] sm:$0xff]  ;;  %v79_v42 = vld [vmem:[%s525_s0 + $0xf8] sm:$0xff] }
  0x4e   :  { %177 = vst.msk [vmem:[%s527_s4 + $0xa0] sm:$0xff] %vm156_vm0, %v144_v33  ;;  %178 = vst.msk [vmem:[%s527_s4 + $0xa8] sm:$0xff] %vm156_vm0, %v145_v34  ;;  %v116_v54 = vmul.f32 %v246_v26, %v78_v41  ;;  %v117_v55 = vmul.f32 %v246_v26, %v79_v42 }
  0x4f   :  { %179 = vst.msk [vmem:[%s527_s4 + $0xb0] sm:$0xff] %vm156_vm0, %v146_v43  ;;  %180 = vst.msk [vmem:[%s527_s4 + $0xb8] sm:$0xff] %vm156_vm0, %v147_v45 }
  0x50   :  { %181 = vst.msk [vmem:[%s527_s4 + $0xc0] sm:$0xff] %vm156_vm0, %v148_v48  ;;  %182 = vst.msk [vmem:[%s527_s4 + $0xc8] sm:$0xff] %vm156_vm0, %v149_v49  ;;  %v154_v26 = vadd.f32 %v282_v44, %v116_v54  ;;  %v155_v56 = vadd.f32 %v282_v44, %v117_v55 }
  0x51   :  { %183 = vst.msk [vmem:[%s527_s4 + $0xd0] sm:$0xff] %vm156_vm0, %v150_v50  ;;  %184 = vst.msk [vmem:[%s527_s4 + $0xd8] sm:$0xff] %vm156_vm0, %v151_v51 }
  0x52   :  { %185 = vst.msk [vmem:[%s527_s4 + $0xe0] sm:$0xff] %vm156_vm0, %v152_v52  ;;  %186 = vst.msk [vmem:[%s527_s4 + $0xe8] sm:$0xff] %vm156_vm0, %v153_v53 }
  0x53   :  { %187 = vst.msk [vmem:[%s527_s4 + $0xf0] sm:$0xff] %vm156_vm0, %v154_v26  ;;  %188 = vst.msk [vmem:[%s527_s4 + $0xf8] sm:$0xff] %vm156_vm0, %v155_v56 }

// kernel: patch_merging_forward.3
= control target key start
LH: loop header
LB: loop body
LE: loop exit
PB: predicated region body
PF: predicated region fallthrough
CT: control target
= control target key end

     0   :  { %vm162_vm0 = vcmask 1044480   ;;  %vm65_vm1 = vcmask 39936   ;;  %vm4191_vm2 = vcmask 261120   ;;  %vm4708_vm3 = vcmask 64512   ;;  %s8347_s1 = inlined_call_operand.vmem [shape: f32[5,32], index: 1, kind: input, shape index: {}]   ;;  %s8348_s0 = inlined_call_operand.vmem [shape: f32[9,256,5], index: 0, kind: input, shape index: {}]   ;;  %s8349_s2 = inlined_call_operand.vmem [shape: f32[9,1,32], index: 2, kind: input, shape index: {}]   ;;  %s8350_s4 = inlined_call_operand.vmem [shape: f32[32,8], index: 4, kind: input, shape index: {}]   ;;  %s8351_s3 = inlined_call_operand.vmem [shape: f32[1,32], index: 3, kind: input, shape index: {}]   ;;  %s8352_s6 = inlined_call_operand.vmem [shape: f32[256,8], index: 6, kind: output, shape index: {}]   ;;  %s8353_s5 = inlined_call_operand.vmem [shape: f32[1,8], index: 5, kind: input, shape index: {}]  }
   0x1   :  { %v6228_v0 = vld [vmem:[%s8347_s1] sm:$0x1f]  ;;  %v34_v3 = vld [vmem:[%s8348_s0 + $0x8] sm:$0xff]  ;;  %v35_v5 = vld [vmem:[%s8348_s0 + $0x10] sm:$0xff] }
   0x2   :  { %v33_v1 = vld [vmem:[%s8348_s0] sm:$0xff]  ;;  %5674 = vmatprep.subr.msk.mxu0 %vm162_vm0, %v6228_v0  ;;  %5724 = vmatprep.subr.msk.mxu1 %vm162_vm0, %v6228_v0  ;;  %v4780_v4 = vld [vmem:[%s8348_s0 + $0x108] sm:$0xff]  ;;  %v4781_v6 = vld [vmem:[%s8348_s0 + $0x110] sm:$0xff] }
   0x3   :  { %v4779_v2 = vld [vmem:[%s8348_s0 + $0x100] sm:$0xff]  ;;  %5675 = vmatpush3.msk.msra.mxu0 %vm162_vm0, %v6228_v0  ;;  %5676 = vmatprep.mubr.msk.f32.mxu0 %vm65_vm1, %v33_v1  ;;  %v36_v7 = vld [vmem:[%s8348_s0 + $0x18] sm:$0xff]  ;;  %v38_v11 = vld [vmem:[%s8348_s0 + $0x28] sm:$0xff] }
   0x4   :  { %5725 = vmatpush3.msk.msra.mxu1 %vm162_vm0, %v6228_v0  ;;  %5726 = vmatprep.mubr.msk.f32.mxu1 %vm65_vm1, %v4779_v2  ;;  %v4782_v8 = vld [vmem:[%s8348_s0 + $0x118] sm:$0xff]  ;;  %v37_v9 = vld [vmem:[%s8348_s0 + $0x20] sm:$0xff]  ;;  %v4784_v12 = vld [vmem:[%s8348_s0 + $0x128] sm:$0xff] }
   0x5   :  { %5677 = vmatmul.mubr.msk.f32.vlgmr.msra.gmra.mrb[0].mxu0 %vm65_vm1, %v34_v3  ;;  %5727 = vmatmul.mubr.msk.f32.vlgmr.msra.gmra.mrb[0].mxu1 %vm65_vm1, %v4780_v4  ;;  %v4783_v10 = vld [vmem:[%s8348_s0 + $0x120] sm:$0xff]  ;;  %v39_v13 = vld [vmem:[%s8348_s0 + $0x30] sm:$0xff]  ;;  %v40_v15 = vld [vmem:[%s8348_s0 + $0x38] sm:$0xff] }
   0x6   :  { %5774 = vmatprep.subr.msk.mxu0 %vm162_vm0, %v6228_v0  ;;  %5679 = vmatprep.mubr.msk.f32.mxu0 %vm65_vm1, %v35_v5  ;;  %v4785_v14 = vld [vmem:[%s8348_s0 + $0x130] sm:$0xff]  ;;  %v4786_v16 = vld [vmem:[%s8348_s0 + $0x138] sm:$0xff]  ;;  %v41_v17 = vld [vmem:[%s8348_s0 + $0x40] sm:$0xff] }
   0x7   :  { %5775 = vmatpush3.msk.msra.mxu0 %vm162_vm0, %v6228_v0  ;;  %5729 = vmatprep.mubr.msk.f32.mxu1 %vm65_vm1, %v4781_v6  ;;  %v4787_v18 = vld [vmem:[%s8348_s0 + $0x140] sm:$0xff]  ;;  %v42_v19 = vld [vmem:[%s8348_s0 + $0x48] sm:$0xff]  ;;  %v43_v21 = vld [vmem:[%s8348_s0 + $0x50] sm:$0xff] }
   0x8   :  { %5824 = vmatprep.subr.msk.mxu1 %vm162_vm0, %v6228_v0  ;;  %5874 = vmatprep.subr.msk.mxu0 %vm162_vm0, %v6228_v0  ;;  %v4788_v20 = vld [vmem:[%s8348_s0 + $0x148] sm:$0xff]  ;;  %v4789_v22 = vld [vmem:[%s8348_s0 + $0x150] sm:$0xff]  ;;  %v44_v23 = vld [vmem:[%s8348_s0 + $0x58] sm:$0xff] }
   0x9   :  { %5680 = vmatmul.mubr.msk.f32.gmra.mrb[2].mxu0 %vm65_vm1, %v36_v7  ;;  %5730 = vmatmul.mubr.msk.f32.gmra.mrb[2].mxu1 %vm65_vm1, %v4782_v8  ;;  %v4790_v24 = vld [vmem:[%s8348_s0 + $0x158] sm:$0xff]  ;;  %v45_v25 = vld [vmem:[%s8348_s0 + $0x60] sm:$0xff]  ;;  %v46_v27 = vld [vmem:[%s8348_s0 + $0x68] sm:$0xff] }
   0xa   :  { %5682 = vmatprep.mubr.msk.f32.mxu0 %vm65_vm1, %v37_v9  ;;  %5732 = vmatprep.mubr.msk.f32.mxu1 %vm65_vm1, %v4783_v10  ;;  %v4791_v26 = vld [vmem:[%s8348_s0 + $0x160] sm:$0xff]  ;;  %v4792_v28 = vld [vmem:[%s8348_s0 + $0x168] sm:$0xff]  ;;  %v47_v29 = vld [vmem:[%s8348_s0 + $0x70] sm:$0xff] }
   0xb   :  { %5825 = vmatpush3.msk.msra.mxu1 %vm162_vm0, %v6228_v0  ;;  %v4793_v30 = vld [vmem:[%s8348_s0 + $0x170] sm:$0xff]  ;;  %v48_v31 = vld [vmem:[%s8348_s0 + $0x78] sm:$0xff]  ;;  %v49_v33 = vld [vmem:[%s8348_s0 + $0x80] sm:$0xff] }
   0xc   :  { %5924 = vmatprep.subr.msk.mxu1 %vm162_vm0, %v6228_v0  ;;  %v4794_v32 = vld [vmem:[%s8348_s0 + $0x178] sm:$0xff]  ;;  %v4795_v34 = vld [vmem:[%s8348_s0 + $0x180] sm:$0xff]  ;;  %v50_v35 = vld [vmem:[%s8348_s0 + $0x88] sm:$0xff] }
   0xd   :  { %5683 = vmatmul.mubr.msk.f32.gmra.mrb[4].mxu0 %vm65_vm1, %v38_v11  ;;  %5733 = vmatmul.mubr.msk.f32.gmra.mrb[4].mxu1 %vm65_vm1, %v4784_v12  ;;  %v4796_v36 = vld [vmem:[%s8348_s0 + $0x188] sm:$0xff]  ;;  %v51_v37 = vld [vmem:[%s8348_s0 + $0x90] sm:$0xff]  ;;  %v52_v39 = vld [vmem:[%s8348_s0 + $0x98] sm:$0xff] }
   0xe   :  { %5685 = vmatprep.mubr.msk.f32.mxu0 %vm65_vm1, %v39_v13  ;;  %5735 = vmatprep.mubr.msk.f32.mxu1 %vm65_vm1, %v4785_v14  ;;  %v4797_v38 = vld [vmem:[%s8348_s0 + $0x190] sm:$0xff]  ;;  %v4798_v40 = vld [vmem:[%s8348_s0 + $0x198] sm:$0xff]  ;;  %v53_v41 = vld [vmem:[%s8348_s0 + $0xa0] sm:$0xff] }
   0xf   :  { %v4799_v42 = vld [vmem:[%s8348_s0 + $0x1a0] sm:$0xff]  ;;  %v54_v43 = vld [vmem:[%s8348_s0 + $0xa8] sm:$0xff]  ;;  %v55_v45 = vld [vmem:[%s8348_s0 + $0xb0] sm:$0xff] }
  0x10   :  { %v4800_v44 = vld [vmem:[%s8348_s0 + $0x1a8] sm:$0xff]  ;;  %v4801_v46 = vld [vmem:[%s8348_s0 + $0x1b0] sm:$0xff]  ;;  %v56_v47 = vld [vmem:[%s8348_s0 + $0xb8] sm:$0xff] }
  0x11   :  { %5686 = vmatmul.mubr.msk.f32.gmra.mrb[6].mxu0 %vm65_vm1, %v40_v15  ;;  %5736 = vmatmul.mubr.msk.f32.gmra.mrb[6].mxu1 %vm65_vm1, %v4786_v16  ;;  %v4802_v48 = vld [vmem:[%s8348_s0 + $0x1b8] sm:$0xff]  ;;  %v57_v49 = vld [vmem:[%s8348_s0 + $0xc0] sm:$0xff]  ;;  %v58_v51 = vld [vmem:[%s8348_s0 + $0xc8] sm:$0xff] }
  0x12   :  { %5688 = vmatprep.mubr.msk.f32.mxu0 %vm65_vm1, %v41_v17  ;;  %5738 = vmatprep.mubr.msk.f32.mxu1 %vm65_vm1, %v4787_v18  ;;  %v4803_v50 = vld [vmem:[%s8348_s0 + $0x1c0] sm:$0xff]  ;;  %v4804_v52 = vld [vmem:[%s8348_s0 + $0x1c8] sm:$0xff]  ;;  %v59_v53 = vld [vmem:[%s8348_s0 + $0xd0] sm:$0xff] }
  0x13   :  { %v4805_v54 = vld [vmem:[%s8348_s0 + $0x1d0] sm:$0xff]  ;;  %v60_v55 = vld [vmem:[%s8348_s0 + $0xd8] sm:$0xff]  ;;  %v61_v57 = vld [vmem:[%s8348_s0 + $0xe0] sm:$0xff] }
  0x14   :  { %v4806_v56 = vld [vmem:[%s8348_s0 + $0x1d8] sm:$0xff]  ;;  %v4807_v58 = vld [vmem:[%s8348_s0 + $0x1e0] sm:$0xff]  ;;  %v62_v59 = vld [vmem:[%s8348_s0 + $0xe8] sm:$0xff] }
  0x15   :  { %5689 = vmatmul.mubr.msk.f32.gmra.mrb[8].mxu0 %vm65_vm1, %v42_v19  ;;  %5739 = vmatmul.mubr.msk.f32.gmra.mrb[8].mxu1 %vm65_vm1, %v4788_v20  ;;  %v4808_v60 = vld [vmem:[%s8348_s0 + $0x1e8] sm:$0xff]  ;;  %v63_v61 = vld [vmem:[%s8348_s0 + $0xf0] sm:$0xff]  ;;  %v64_v63 = vld [vmem:[%s8348_s0 + $0xf8] sm:$0xff] }
  0x16   :  { %5691 = vmatprep.mubr.msk.f32.mxu0 %vm65_vm1, %v43_v21  ;;  %5741 = vmatprep.mubr.msk.f32.mxu1 %vm65_vm1, %v4789_v22  ;;  %v4809_v62 = vld [vmem:[%s8348_s0 + $0x1f0] sm:$0xff]  ;;  %v4810_v1 = vld [vmem:[%s8348_s0 + $0x1f8] sm:$0xff]  ;;  %v4845_v2 = vld [vmem:[%s8348_s0 + $0x200] sm:$0xff] }
  0x17   :  { %v4911_v3 = vld [vmem:[%s8348_s0 + $0x300] sm:$0xff]  ;;  %v4846_v4 = vld [vmem:[%s8348_s0 + $0x208] sm:$0xff]  ;;  %v4847_v6 = vld [vmem:[%s8348_s0 + $0x210] sm:$0xff] }
  0x18   :  { %v4912_v5 = vld [vmem:[%s8348_s0 + $0x308] sm:$0xff]  ;;  %v4913_v7 = vld [vmem:[%s8348_s0 + $0x310] sm:$0xff]  ;;  %v4848_v8 = vld [vmem:[%s8348_s0 + $0x218] sm:$0xff] }
  0x19   :  { %5692 = vmatmul.mubr.msk.f32.gmra.mrb[10].mxu0 %vm65_vm1, %v44_v23  ;;  %5742 = vmatmul.mubr.msk.f32.gmra.mrb[10].mxu1 %vm65_vm1, %v4790_v24  ;;  %v4914_v9 = vld [vmem:[%s8348_s0 + $0x318] sm:$0xff]  ;;  %v4849_v10 = vld [vmem:[%s8348_s0 + $0x220] sm:$0xff]  ;;  %v4850_v12 = vld [vmem:[%s8348_s0 + $0x228] sm:$0xff] }
  0x1a   :  { %5694 = vmatprep.mubr.msk.f32.mxu0 %vm65_vm1, %v45_v25  ;;  %5744 = vmatprep.mubr.msk.f32.mxu1 %vm65_vm1, %v4791_v26  ;;  %v4915_v11 = vld [vmem:[%s8348_s0 + $0x320] sm:$0xff]  ;;  %v4916_v13 = vld [vmem:[%s8348_s0 + $0x328] sm:$0xff]  ;;  %v4851_v14 = vld [vmem:[%s8348_s0 + $0x230] sm:$0xff] }
  0x1b   :  { %v4917_v15 = vld [vmem:[%s8348_s0 + $0x330] sm:$0xff]  ;;  %v4852_v16 = vld [vmem:[%s8348_s0 + $0x238] sm:$0xff]  ;;  %v4853_v18 = vld [vmem:[%s8348_s0 + $0x240] sm:$0xff] }
  0x1c   :  { %v4918_v17 = vld [vmem:[%s8348_s0 + $0x338] sm:$0xff]  ;;  %v4919_v19 = vld [vmem:[%s8348_s0 + $0x340] sm:$0xff]  ;;  %v4854_v20 = vld [vmem:[%s8348_s0 + $0x248] sm:$0xff] }
  0x1d   :  { %5695 = vmatmul.mubr.msk.f32.gmra.mrb[12].mxu0 %vm65_vm1, %v46_v27  ;;  %5745 = vmatmul.mubr.msk.f32.gmra.mrb[12].mxu1 %vm65_vm1, %v4792_v28  ;;  %v4920_v21 = vld [vmem:[%s8348_s0 + $0x348] sm:$0xff]  ;;  %v4855_v22 = vld [vmem:[%s8348_s0 + $0x250] sm:$0xff]  ;;  %v4856_v24 = vld [vmem:[%s8348_s0 + $0x258] sm:$0xff] }
  0x1e   :  { %5697 = vmatprep.mubr.msk.f32.mxu0 %vm65_vm1, %v47_v29  ;;  %5747 = vmatprep.mubr.msk.f32.mxu1 %vm65_vm1, %v4793_v30  ;;  %v4921_v23 = vld [vmem:[%s8348_s0 + $0x350] sm:$0xff]  ;;  %v4922_v25 = vld [vmem:[%s8348_s0 + $0x358] sm:$0xff]  ;;  %v4857_v26 = vld [vmem:[%s8348_s0 + $0x260] sm:$0xff] }
  0x1f   :  { %v4923_v27 = vld [vmem:[%s8348_s0 + $0x360] sm:$0xff]  ;;  %v4858_v28 = vld [vmem:[%s8348_s0 + $0x268] sm:$0xff]  ;;  %v4859_v30 = vld [vmem:[%s8348_s0 + $0x270] sm:$0xff] }
  0x20   :  { %v4924_v29 = vld [vmem:[%s8348_s0 + $0x368] sm:$0xff] }
  0x21   :  { %5698 = vmatmul.mubr.msk.f32.gmra.mrb[14].mxu0 %vm65_vm1, %v48_v31  ;;  %5748 = vmatmul.mubr.msk.f32.gmra.mrb[14].mxu1 %vm65_vm1, %v4794_v32  ;;  %v4925_v31 = vld [vmem:[%s8348_s0 + $0x370] sm:$0xff]  ;;  %v4860_v32 = vld [vmem:[%s8348_s0 + $0x278] sm:$0xff] }
  0x22   :  { %5700 = vmatprep.mubr.msk.f32.mxu0 %vm65_vm1, %v49_v33  ;;  %5750 = vmatprep.mubr.msk.f32.mxu1 %vm65_vm1, %v4795_v34  ;;  %v4926_v33 = vld [vmem:[%s8348_s0 + $0x378] sm:$0xff]  ;;  %v4861_v34 = vld [vmem:[%s8348_s0 + $0x280] sm:$0xff] }
  0x25   :  { %5701 = vmatmul.mubr.msk.f32.gmra.mrb[16].mxu0 %vm65_vm1, %v50_v35  ;;  %5751 = vmatmul.mubr.msk.f32.gmra.mrb[16].mxu1 %vm65_vm1, %v4796_v36  ;;  %v4927_v35 = vld [vmem:[%s8348_s0 + $0x380] sm:$0xff]  ;;  %v4862_v36 = vld [vmem:[%s8348_s0 + $0x288] sm:$0xff] }
  0x26   :  { %5703 = vmatprep.mubr.msk.f32.mxu0 %vm65_vm1, %v51_v37  ;;  %5753 = vmatprep.mubr.msk.f32.mxu1 %vm65_vm1, %v4797_v38  ;;  %v4928_v37 = vld [vmem:[%s8348_s0 + $0x388] sm:$0xff]  ;;  %v4863_v38 = vld [vmem:[%s8348_s0 + $0x290] sm:$0xff] }
  0x29   :  { %5704 = vmatmul.mubr.msk.f32.gmra.mrb[18].mxu0 %vm65_vm1, %v52_v39  ;;  %5754 = vmatmul.mubr.msk.f32.gmra.mrb[18].mxu1 %vm65_vm1, %v4798_v40  ;;  %v4929_v39 = vld [vmem:[%s8348_s0 + $0x390] sm:$0xff]  ;;  %v4864_v40 = vld [vmem:[%s8348_s0 + $0x298] sm:$0xff] }
  0x2a   :  { %5706 = vmatprep.mubr.msk.f32.mxu0 %vm65_vm1, %v53_v41  ;;  %5756 = vmatprep.mubr.msk.f32.mxu1 %vm65_vm1, %v4799_v42  ;;  %v4930_v41 = vld [vmem:[%s8348_s0 + $0x398] sm:$0xff]  ;;  %v4865_v42 = vld [vmem:[%s8348_s0 + $0x2a0] sm:$0xff] }
  0x2d   :  { %5707 = vmatmul.mubr.msk.f32.gmra.mrb[20].mxu0 %vm65_vm1, %v54_v43  ;;  %5757 = vmatmul.mubr.msk.f32.gmra.mrb[20].mxu1 %vm65_vm1, %v4800_v44  ;;  %v4931_v43 = vld [vmem:[%s8348_s0 + $0x3a0] sm:$0xff]  ;;  %v4866_v44 = vld [vmem:[%s8348_s0 + $0x2a8] sm:$0xff] }
  0x2e   :  { %5709 = vmatprep.mubr.msk.f32.mxu0 %vm65_vm1, %v55_v45  ;;  %5759 = vmatprep.mubr.msk.f32.mxu1 %vm65_vm1, %v4801_v46  ;;  %v4932_v45 = vld [vmem:[%s8348_s0 + $0x3a8] sm:$0xff]  ;;  %v4867_v46 = vld [vmem:[%s8348_s0 + $0x2b0] sm:$0xff] }
  0x31   :  { %5710 = vmatmul.mubr.msk.f32.gmra.mrb[22].mxu0 %vm65_vm1, %v56_v47  ;;  %5760 = vmatmul.mubr.msk.f32.gmra.mrb[22].mxu1 %vm65_vm1, %v4802_v48  ;;  %v4933_v47 = vld [vmem:[%s8348_s0 + $0x3b0] sm:$0xff]  ;;  %v4868_v48 = vld [vmem:[%s8348_s0 + $0x2b8] sm:$0xff] }
  0x32   :  { %5712 = vmatprep.mubr.msk.f32.mxu0 %vm65_vm1, %v57_v49  ;;  %5762 = vmatprep.mubr.msk.f32.mxu1 %vm65_vm1, %v4803_v50  ;;  %v4934_v49 = vld [vmem:[%s8348_s0 + $0x3b8] sm:$0xff]  ;;  %v4869_v50 = vld [vmem:[%s8348_s0 + $0x2c0] sm:$0xff] }
  0x35   :  { %5713 = vmatmul.mubr.msk.f32.gmra.mrb[24].mxu0 %vm65_vm1, %v58_v51  ;;  %5763 = vmatmul.mubr.msk.f32.gmra.mrb[24].mxu1 %vm65_vm1, %v4804_v52  ;;  %v4935_v51 = vld [vmem:[%s8348_s0 + $0x3c0] sm:$0xff]  ;;  %v4870_v52 = vld [vmem:[%s8348_s0 + $0x2c8] sm:$0xff] }
  0x36   :  { %5715 = vmatprep.mubr.msk.f32.mxu0 %vm65_vm1, %v59_v53  ;;  %5765 = vmatprep.mubr.msk.f32.mxu1 %vm65_vm1, %v4805_v54  ;;  %v4936_v53 = vld [vmem:[%s8348_s0 + $0x3c8] sm:$0xff]  ;;  %v4871_v54 = vld [vmem:[%s8348_s0 + $0x2d0] sm:$0xff] }
  0x39   :  { %5716 = vmatmul.mubr.msk.f32.gmra.mrb[26].mxu0 %vm65_vm1, %v60_v55  ;;  %5766 = vmatmul.mubr.msk.f32.gmra.mrb[26].mxu1 %vm65_vm1, %v4806_v56  ;;  %v4937_v55 = vld [vmem:[%s8348_s0 + $0x3d0] sm:$0xff]  ;;  %v4872_v56 = vld [vmem:[%s8348_s0 + $0x2d8] sm:$0xff] }
  0x3a   :  { %5718 = vmatprep.mubr.msk.f32.mxu0 %vm65_vm1, %v61_v57  ;;  %5768 = vmatprep.mubr.msk.f32.mxu1 %vm65_vm1, %v4807_v58  ;;  %v4938_v57 = vld [vmem:[%s8348_s0 + $0x3d8] sm:$0xff]  ;;  %v4873_v58 = vld [vmem:[%s8348_s0 + $0x2e0] sm:$0xff] }
  0x3d   :  { %5719 = vmatmul.mubr.msk.f32.gmra.mrb[28].mxu0 %vm65_vm1, %v62_v59  ;;  %5769 = vmatmul.mubr.msk.f32.gmra.mrb[28].mxu1 %vm65_vm1, %v4808_v60  ;;  %v4939_v59 = vld [vmem:[%s8348_s0 + $0x3e0] sm:$0xff]  ;;  %v4874_v60 = vld [vmem:[%s8348_s0 + $0x2e8] sm:$0xff] }
  0x3e   :  { %5721 = vmatprep.mubr.msk.f32.mxu0 %vm65_vm1, %v63_v61  ;;  %5771 = vmatprep.mubr.msk.f32.mxu1 %vm65_vm1, %v4809_v62  ;;  %v4940_v61 = vld [vmem:[%s8348_s0 + $0x3e8] sm:$0xff]  ;;  %v4875_v62 = vld [vmem:[%s8348_s0 + $0x2f0] sm:$0xff] }
  0x41   :  { %5722 = vmatmul.mubr.msk.f32.gmra.mrb[30].mxu0 %vm65_vm1, %v64_v63  ;;  %5772 = vmatmul.mubr.msk.f32.gmra.mrb[30].mxu1 %vm65_vm1, %v4810_v1  ;;  %v4941_v63 = vld [vmem:[%s8348_s0 + $0x3f0] sm:$0xff]  ;;  %v4876_v1 = vld [vmem:[%s8348_s0 + $0x2f8] sm:$0xff] }
  0x42   :  { %5776 = vmatprep.mubr.msk.f32.mxu0 %vm65_vm1, %v4845_v2  ;;  %5826 = vmatprep.mubr.msk.f32.mxu1 %vm65_vm1, %v4911_v3  ;;  %v4942_v2 = vld [vmem:[%s8348_s0 + $0x3f8] sm:$0xff]  ;;  %v4977_v3 = vld [vmem:[%s8348_s0 + $0x400] sm:$0xff] }
  0x45   :  { %5777 = vmatmul.mubr.msk.f32.vlgmr.msra.gmra.mrb[32].mxu0 %vm65_vm1, %v4846_v4  ;;  %5827 = vmatmul.mubr.msk.f32.vlgmr.msra.gmra.mrb[32].mxu1 %vm65_vm1, %v4912_v5  ;;  %v5043_v4 = vld [vmem:[%s8348_s0 + $0x500] sm:$0xff]  ;;  %v4978_v5 = vld [vmem:[%s8348_s0 + $0x408] sm:$0xff] }
  0x46   :  { %5875 = vmatpush3.msk.msra.mxu0 %vm162_vm0, %v6228_v0  ;;  %5779 = vmatprep.mubr.msk.f32.mxu0 %vm65_vm1, %v4847_v6  ;;  %v5044_v6 = vld [vmem:[%s8348_s0 + $0x508] sm:$0xff] }
  0x47   :  { %5829 = vmatprep.mubr.msk.f32.mxu1 %vm65_vm1, %v4913_v7  ;;  %5925 = vmatpush3.msk.msra.mxu1 %vm162_vm0, %v6228_v0  ;;  %v4979_v7 = vld [vmem:[%s8348_s0 + $0x410] sm:$0xff] }
  0x48   :  { %5974 = vmatprep.subr.msk.mxu0 %vm162_vm0, %v6228_v0  ;;  %6024 = vmatprep.subr.msk.mxu1 %vm162_vm0, %v6228_v0 }
  0x49   :  { %5780 = vmatmul.mubr.msk.f32.gmra.mrb[34].mxu0 %vm65_vm1, %v4848_v8  ;;  %5830 = vmatmul.mubr.msk.f32.gmra.mrb[34].mxu1 %vm65_vm1, %v4914_v9  ;;  %v5045_v8 = vld [vmem:[%s8348_s0 + $0x510] sm:$0xff]  ;;  %v4980_v9 = vld [vmem:[%s8348_s0 + $0x418] sm:$0xff] }
  0x4a   :  { %5782 = vmatprep.mubr.msk.f32.mxu0 %vm65_vm1, %v4849_v10  ;;  %5832 = vmatprep.mubr.msk.f32.mxu1 %vm65_vm1, %v4915_v11  ;;  %v5046_v10 = vld [vmem:[%s8348_s0 + $0x518] sm:$0xff]  ;;  %v4981_v11 = vld [vmem:[%s8348_s0 + $0x420] sm:$0xff] }
  0x4d   :  { %5783 = vmatmul.mubr.msk.f32.gmra.mrb[36].mxu0 %vm65_vm1, %v4850_v12  ;;  %5833 = vmatmul.mubr.msk.f32.gmra.mrb[36].mxu1 %vm65_vm1, %v4916_v13  ;;  %v5047_v12 = vld [vmem:[%s8348_s0 + $0x520] sm:$0xff]  ;;  %v4982_v13 = vld [vmem:[%s8348_s0 + $0x428] sm:$0xff] }
  0x4e   :  { %5785 = vmatprep.mubr.msk.f32.mxu0 %vm65_vm1, %v4851_v14  ;;  %5835 = vmatprep.mubr.msk.f32.mxu1 %vm65_vm1, %v4917_v15  ;;  %v5048_v14 = vld [vmem:[%s8348_s0 + $0x528] sm:$0xff]  ;;  %v4983_v15 = vld [vmem:[%s8348_s0 + $0x430] sm:$0xff] }
  0x51   :  { %5786 = vmatmul.mubr.msk.f32.gmra.mrb[38].mxu0 %vm65_vm1, %v4852_v16  ;;  %5836 = vmatmul.mubr.msk.f32.gmra.mrb[38].mxu1 %vm65_vm1, %v4918_v17  ;;  %v5049_v16 = vld [vmem:[%s8348_s0 + $0x530] sm:$0xff]  ;;  %v4984_v17 = vld [vmem:[%s8348_s0 + $0x438] sm:$0xff] }
  0x52   :  { %5788 = vmatprep.mubr.msk.f32.mxu0 %vm65_vm1, %v4853_v18  ;;  %5838 = vmatprep.mubr.msk.f32.mxu1 %vm65_vm1, %v4919_v19  ;;  %v5050_v18 = vld [vmem:[%s8348_s0 + $0x538] sm:$0xff]  ;;  %v4985_v19 = vld [vmem:[%s8348_s0 + $0x440] sm:$0xff] }
  0x55   :  { %5789 = vmatmul.mubr.msk.f32.gmra.mrb[40].mxu0 %vm65_vm1, %v4854_v20  ;;  %5839 = vmatmul.mubr.msk.f32.gmra.mrb[40].mxu1 %vm65_vm1, %v4920_v21  ;;  %v5051_v20 = vld [vmem:[%s8348_s0 + $0x540] sm:$0xff]  ;;  %v4986_v21 = vld [vmem:[%s8348_s0 + $0x448] sm:$0xff] }
  0x56   :  { %5791 = vmatprep.mubr.msk.f32.mxu0 %vm65_vm1, %v4855_v22  ;;  %5841 = vmatprep.mubr.msk.f32.mxu1 %vm65_vm1, %v4921_v23  ;;  %v5052_v22 = vld [vmem:[%s8348_s0 + $0x548] sm:$0xff]  ;;  %v4987_v23 = vld [vmem:[%s8348_s0 + $0x450] sm:$0xff] }
  0x59   :  { %5792 = vmatmul.mubr.msk.f32.gmra.mrb[42].mxu0 %vm65_vm1, %v4856_v24  ;;  %5842 = vmatmul.mubr.msk.f32.gmra.mrb[42].mxu1 %vm65_vm1, %v4922_v25  ;;  %v5053_v24 = vld [vmem:[%s8348_s0 + $0x550] sm:$0xff]  ;;  %v4988_v25 = vld [vmem:[%s8348_s0 + $0x458] sm:$0xff] }
  0x5a   :  { %5794 = vmatprep.mubr.msk.f32.mxu0 %vm65_vm1, %v4857_v26  ;;  %5844 = vmatprep.mubr.msk.f32.mxu1 %vm65_vm1, %v4923_v27  ;;  %v5054_v26 = vld [vmem:[%s8348_s0 + $0x558] sm:$0xff]  ;;  %v4989_v27 = vld [vmem:[%s8348_s0 + $0x460] sm:$0xff] }
  0x5d   :  { %5795 = vmatmul.mubr.msk.f32.gmra.mrb[44].mxu0 %vm65_vm1, %v4858_v28  ;;  %5845 = vmatmul.mubr.msk.f32.gmra.mrb[44].mxu1 %vm65_vm1, %v4924_v29  ;;  %v5055_v28 = vld [vmem:[%s8348_s0 + $0x560] sm:$0xff]  ;;  %v4990_v29 = vld [vmem:[%s8348_s0 + $0x468] sm:$0xff] }
  0x5e   :  { %5797 = vmatprep.mubr.msk.f32.mxu0 %vm65_vm1, %v4859_v30  ;;  %5847 = vmatprep.mubr.msk.f32.mxu1 %vm65_vm1, %v4925_v31  ;;  %v5056_v30 = vld [vmem:[%s8348_s0 + $0x568] sm:$0xff]  ;;  %v4991_v31 = vld [vmem:[%s8348_s0 + $0x470] sm:$0xff] }
  0x61   :  { %5798 = vmatmul.mubr.msk.f32.gmra.mrb[46].mxu0 %vm65_vm1, %v4860_v32  ;;  %5848 = vmatmul.mubr.msk.f32.gmra.mrb[46].mxu1 %vm65_vm1, %v4926_v33  ;;  %v5057_v32 = vld [vmem:[%s8348_s0 + $0x570] sm:$0xff]  ;;  %v4992_v33 = vld [vmem:[%s8348_s0 + $0x478] sm:$0xff] }
  0x62   :  { %5800 = vmatprep.mubr.msk.f32.mxu0 %vm65_vm1, %v4861_v34  ;;  %5850 = vmatprep.mubr.msk.f32.mxu1 %vm65_vm1, %v4927_v35  ;;  %v5058_v34 = vld [vmem:[%s8348_s0 + $0x578] sm:$0xff]  ;;  %v4993_v35 = vld [vmem:[%s8348_s0 + $0x480] sm:$0xff] }
  0x65   :  { %5801 = vmatmul.mubr.msk.f32.gmra.mrb[48].mxu0 %vm65_vm1, %v4862_v36  ;;  %5851 = vmatmul.mubr.msk.f32.gmra.mrb[48].mxu1 %vm65_vm1, %v4928_v37  ;;  %v5059_v36 = vld [vmem:[%s8348_s0 + $0x580] sm:$0xff]  ;;  %v4994_v37 = vld [vmem:[%s8348_s0 + $0x488] sm:$0xff] }
  0x66   :  { %5803 = vmatprep.mubr.msk.f32.mxu0 %vm65_vm1, %v4863_v38  ;;  %5853 = vmatprep.mubr.msk.f32.mxu1 %vm65_vm1, %v4929_v39  ;;  %v5060_v38 = vld [vmem:[%s8348_s0 + $0x588] sm:$0xff]  ;;  %v4995_v39 = vld [vmem:[%s8348_s0 + $0x490] sm:$0xff] }
  0x69   :  { %5804 = vmatmul.mubr.msk.f32.gmra.mrb[50].mxu0 %vm65_vm1, %v4864_v40  ;;  %5854 = vmatmul.mubr.msk.f32.gmra.mrb[50].mxu1 %vm65_vm1, %v4930_v41  ;;  %v5061_v40 = vld [vmem:[%s8348_s0 + $0x590] sm:$0xff]  ;;  %v4996_v41 = vld [vmem:[%s8348_s0 + $0x498] sm:$0xff] }
  0x6a   :  { %5806 = vmatprep.mubr.msk.f32.mxu0 %vm65_vm1, %v4865_v42  ;;  %5856 = vmatprep.mubr.msk.f32.mxu1 %vm65_vm1, %v4931_v43  ;;  %v5062_v42 = vld [vmem:[%s8348_s0 + $0x598] sm:$0xff]  ;;  %v4997_v43 = vld [vmem:[%s8348_s0 + $0x4a0] sm:$0xff] }
  0x6d   :  { %5807 = vmatmul.mubr.msk.f32.gmra.mrb[52].mxu0 %vm65_vm1, %v4866_v44  ;;  %5857 = vmatmul.mubr.msk.f32.gmra.mrb[52].mxu1 %vm65_vm1, %v4932_v45  ;;  %v5063_v44 = vld [vmem:[%s8348_s0 + $0x5a0] sm:$0xff]  ;;  %v4998_v45 = vld [vmem:[%s8348_s0 + $0x4a8] sm:$0xff] }
  0x6e   :  { %5809 = vmatprep.mubr.msk.f32.mxu0 %vm65_vm1, %v4867_v46  ;;  %5859 = vmatprep.mubr.msk.f32.mxu1 %vm65_vm1, %v4933_v47  ;;  %v5064_v46 = vld [vmem:[%s8348_s0 + $0x5a8] sm:$0xff]  ;;  %v4999_v47 = vld [vmem:[%s8348_s0 + $0x4b0] sm:$0xff] }
  0x71   :  { %5810 = vmatmul.mubr.msk.f32.gmra.mrb[54].mxu0 %vm65_vm1, %v4868_v48  ;;  %5860 = vmatmul.mubr.msk.f32.gmra.mrb[54].mxu1 %vm65_vm1, %v4934_v49  ;;  %v5065_v48 = vld [vmem:[%s8348_s0 + $0x5b0] sm:$0xff]  ;;  %v5000_v49 = vld [vmem:[%s8348_s0 + $0x4b8] sm:$0xff] }
  0x72   :  { %5812 = vmatprep.mubr.msk.f32.mxu0 %vm65_vm1, %v4869_v50  ;;  %5862 = vmatprep.mubr.msk.f32.mxu1 %vm65_vm1, %v4935_v51  ;;  %v5066_v50 = vld [vmem:[%s8348_s0 + $0x5b8] sm:$0xff]  ;;  %v5001_v51 = vld [vmem:[%s8348_s0 + $0x4c0] sm:$0xff] }
  0x75   :  { %5813 = vmatmul.mubr.msk.f32.gmra.mrb[56].mxu0 %vm65_vm1, %v4870_v52  ;;  %5863 = vmatmul.mubr.msk.f32.gmra.mrb[56].mxu1 %vm65_vm1, %v4936_v53  ;;  %v5067_v52 = vld [vmem:[%s8348_s0 + $0x5c0] sm:$0xff]  ;;  %v5002_v53 = vld [vmem:[%s8348_s0 + $0x4c8] sm:$0xff] }
  0x76   :  { %5815 = vmatprep.mubr.msk.f32.mxu0 %vm65_vm1, %v4871_v54  ;;  %5865 = vmatprep.mubr.msk.f32.mxu1 %vm65_vm1, %v4937_v55  ;;  %v5068_v54 = vld [vmem:[%s8348_s0 + $0x5c8] sm:$0xff]  ;;  %v5003_v55 = vld [vmem:[%s8348_s0 + $0x4d0] sm:$0xff] }
  0x79   :  { %5816 = vmatmul.mubr.msk.f32.gmra.mrb[58].mxu0 %vm65_vm1, %v4872_v56  ;;  %5866 = vmatmul.mubr.msk.f32.gmra.mrb[58].mxu1 %vm65_vm1, %v4938_v57  ;;  %v5069_v56 = vld [vmem:[%s8348_s0 + $0x5d0] sm:$0xff]  ;;  %v5004_v57 = vld [vmem:[%s8348_s0 + $0x4d8] sm:$0xff] }
  0x7a   :  { %5818 = vmatprep.mubr.msk.f32.mxu0 %vm65_vm1, %v4873_v58  ;;  %5868 = vmatprep.mubr.msk.f32.mxu1 %vm65_vm1, %v4939_v59  ;;  %v5070_v58 = vld [vmem:[%s8348_s0 + $0x5d8] sm:$0xff]  ;;  %v5005_v59 = vld [vmem:[%s8348_s0 + $0x4e0] sm:$0xff] }
  0x7d   :  { %5819 = vmatmul.mubr.msk.f32.gmra.mrb[60].mxu0 %vm65_vm1, %v4874_v60  ;;  %5869 = vmatmul.mubr.msk.f32.gmra.mrb[60].mxu1 %vm65_vm1, %v4940_v61  ;;  %v5071_v60 = vld [vmem:[%s8348_s0 + $0x5e0] sm:$0xff]  ;;  %v5006_v61 = vld [vmem:[%s8348_s0 + $0x4e8] sm:$0xff] }
  0x7e   :  { %5821 = vmatprep.mubr.msk.f32.mxu0 %vm65_vm1, %v4875_v62  ;;  %5871 = vmatprep.mubr.msk.f32.mxu1 %vm65_vm1, %v4941_v63  ;;  %v5072_v62 = vld [vmem:[%s8348_s0 + $0x5e8] sm:$0xff]  ;;  %v5007_v63 = vld [vmem:[%s8348_s0 + $0x4f0] sm:$0xff] }
  0x81   :  { %5822 = vmatmul.mubr.msk.f32.gmra.mrb[62].mxu0 %vm65_vm1, %v4876_v1  ;;  %5872 = vmatmul.mubr.msk.f32.gmra.mrb[62].mxu1 %vm65_vm1, %v4942_v2  ;;  %v5073_v1 = vld [vmem:[%s8348_s0 + $0x5f0] sm:$0xff]  ;;  %v5008_v2 = vld [vmem:[%s8348_s0 + $0x4f8] sm:$0xff] }
  0x82   :  { %5876 = vmatprep.mubr.msk.f32.mxu0 %vm65_vm1, %v4977_v3  ;;  %5926 = vmatprep.mubr.msk.f32.mxu1 %vm65_vm1, %v5043_v4  ;;  %v5074_v3 = vld [vmem:[%s8348_s0 + $0x5f8] sm:$0xff]  ;;  %v5109_v4 = vld [vmem:[%s8348_s0 + $0x600] sm:$0xff] }
  0x85   :  { %5877 = vmatmul.mubr.msk.f32.vlgmr.msra.gmra.mrb[64].mxu0 %vm65_vm1, %v4978_v5  ;;  %5927 = vmatmul.mubr.msk.f32.vlgmr.msra.gmra.mrb[64].mxu1 %vm65_vm1, %v5044_v6  ;;  %v5175_v5 = vld [vmem:[%s8348_s0 + $0x700] sm:$0xff]  ;;  %v5110_v6 = vld [vmem:[%s8348_s0 + $0x608] sm:$0xff] }
  0x86   :  { %5975 = vmatpush3.msk.msra.mxu0 %vm162_vm0, %v6228_v0  ;;  %5879 = vmatprep.mubr.msk.f32.mxu0 %vm65_vm1, %v4979_v7  ;;  %v5176_v7 = vld [vmem:[%s8348_s0 + $0x708] sm:$0xff] }
  0x87   :  { %5929 = vmatprep.mubr.msk.f32.mxu1 %vm65_vm1, %v5045_v8  ;;  %6025 = vmatpush3.msk.msra.mxu1 %vm162_vm0, %v6228_v0  ;;  %v5111_v8 = vld [vmem:[%s8348_s0 + $0x610] sm:$0xff] }
  0x88   :  { %6074 = vmatprep.subr.msk.mxu0 %vm162_vm0, %v6228_v0 }
  0x89   :  { %5880 = vmatmul.mubr.msk.f32.gmra.mrb[66].mxu0 %vm65_vm1, %v4980_v9  ;;  %5930 = vmatmul.mubr.msk.f32.gmra.mrb[66].mxu1 %vm65_vm1, %v5046_v10  ;;  %v5177_v9 = vld [vmem:[%s8348_s0 + $0x710] sm:$0xff]  ;;  %v5112_v10 = vld [vmem:[%s8348_s0 + $0x618] sm:$0xff] }
  0x8a   :  { %5882 = vmatprep.mubr.msk.f32.mxu0 %vm65_vm1, %v4981_v11  ;;  %5932 = vmatprep.mubr.msk.f32.mxu1 %vm65_vm1, %v5047_v12  ;;  %v5178_v11 = vld [vmem:[%s8348_s0 + $0x718] sm:$0xff]  ;;  %v5113_v12 = vld [vmem:[%s8348_s0 + $0x620] sm:$0xff] }
  0x8d   :  { %5883 = vmatmul.mubr.msk.f32.gmra.mrb[68].mxu0 %vm65_vm1, %v4982_v13  ;;  %5933 = vmatmul.mubr.msk.f32.gmra.mrb[68].mxu1 %vm65_vm1, %v5048_v14  ;;  %v5114_v13 = vld [vmem:[%s8348_s0 + $0x628] sm:$0xff] }
  0x8e   :  { %5885 = vmatprep.mubr.msk.f32.mxu0 %vm65_vm1, %v4983_v15  ;;  %5935 = vmatprep.mubr.msk.f32.mxu1 %vm65_vm1, %v5049_v16  ;;  %v5180_v14 = vld [vmem:[%s8348_s0 + $0x728] sm:$0xff]  ;;  %v5115_v15 = vld [vmem:[%s8348_s0 + $0x630] sm:$0xff] }
  0x8f   :  { %v5181_v16 = vld [vmem:[%s8348_s0 + $0x730] sm:$0xff] }
  0x91   :  { %5886 = vmatmul.mubr.msk.f32.gmra.mrb[70].mxu0 %vm65_vm1, %v4984_v17  ;;  %5936 = vmatmul.mubr.msk.f32.gmra.mrb[70].mxu1 %vm65_vm1, %v5050_v18  ;;  %v5116_v17 = vld [vmem:[%s8348_s0 + $0x638] sm:$0xff] }
  0x92   :  { %5888 = vmatprep.mubr.msk.f32.mxu0 %vm65_vm1, %v4985_v19  ;;  %5938 = vmatprep.mubr.msk.f32.mxu1 %vm65_vm1, %v5051_v20  ;;  %v5182_v18 = vld [vmem:[%s8348_s0 + $0x738] sm:$0xff]  ;;  %v5117_v19 = vld [vmem:[%s8348_s0 + $0x640] sm:$0xff] }
  0x93   :  { %v5183_v20 = vld [vmem:[%s8348_s0 + $0x740] sm:$0xff] }
  0x95   :  { %5889 = vmatmul.mubr.msk.f32.gmra.mrb[72].mxu0 %vm65_vm1, %v4986_v21  ;;  %5939 = vmatmul.mubr.msk.f32.gmra.mrb[72].mxu1 %vm65_vm1, %v5052_v22  ;;  %v5118_v21 = vld [vmem:[%s8348_s0 + $0x648] sm:$0xff] }
  0x96   :  { %5891 = vmatprep.mubr.msk.f32.mxu0 %vm65_vm1, %v4987_v23  ;;  %5941 = vmatprep.mubr.msk.f32.mxu1 %vm65_vm1, %v5053_v24  ;;  %v5184_v22 = vld [vmem:[%s8348_s0 + $0x748] sm:$0xff]  ;;  %v5119_v23 = vld [vmem:[%s8348_s0 + $0x650] sm:$0xff] }
  0x97   :  { %v5185_v24 = vld [vmem:[%s8348_s0 + $0x750] sm:$0xff] }
  0x99   :  { %5892 = vmatmul.mubr.msk.f32.gmra.mrb[74].mxu0 %vm65_vm1, %v4988_v25  ;;  %5942 = vmatmul.mubr.msk.f32.gmra.mrb[74].mxu1 %vm65_vm1, %v5054_v26  ;;  %v5120_v25 = vld [vmem:[%s8348_s0 + $0x658] sm:$0xff] }
  0x9a   :  { %5894 = vmatprep.mubr.msk.f32.mxu0 %vm65_vm1, %v4989_v27  ;;  %5944 = vmatprep.mubr.msk.f32.mxu1 %vm65_vm1, %v5055_v28  ;;  %v5186_v26 = vld [vmem:[%s8348_s0 + $0x758] sm:$0xff]  ;;  %v5121_v27 = vld [vmem:[%s8348_s0 + $0x660] sm:$0xff] }
  0x9b   :  { %v5187_v28 = vld [vmem:[%s8348_s0 + $0x760] sm:$0xff] }
  0x9d   :  { %5895 = vmatmul.mubr.msk.f32.gmra.mrb[76].mxu0 %vm65_vm1, %v4990_v29  ;;  %5945 = vmatmul.mubr.msk.f32.gmra.mrb[76].mxu1 %vm65_vm1, %v5056_v30  ;;  %v7137_v29 = vld [vmem:[%s8349_s2] ss:$0 sm:$0xff] }
  0x9e   :  { %5897 = vmatprep.mubr.msk.f32.mxu0 %vm65_vm1, %v4991_v31  ;;  %5947 = vmatprep.mubr.msk.f32.mxu1 %vm65_vm1, %v5057_v32  ;;  %v7142_v31 = vld [vmem:[%s8349_s2 + $0x1] ss:$0 sm:$0xff] }
  0xa1   :  { %5898 = vmatmul.mubr.msk.f32.gmra.mrb[78].mxu0 %vm65_vm1, %v4992_v33  ;;  %5948 = vmatmul.mubr.msk.f32.gmra.mrb[78].mxu1 %vm65_vm1, %v5058_v34 }
  0xa2   :  { %5900 = vmatprep.mubr.msk.f32.mxu0 %vm65_vm1, %v4993_v35  ;;  %5950 = vmatprep.mubr.msk.f32.mxu1 %vm65_vm1, %v5059_v36 }
  0xa5   :  { %5901 = vmatmul.mubr.msk.f32.gmra.mrb[80].mxu0 %vm65_vm1, %v4994_v37  ;;  %5951 = vmatmul.mubr.msk.f32.gmra.mrb[80].mxu1 %vm65_vm1, %v5060_v38 }
  0xa6   :  { %5903 = vmatprep.mubr.msk.f32.mxu0 %vm65_vm1, %v4995_v39  ;;  %5953 = vmatprep.mubr.msk.f32.mxu1 %vm65_vm1, %v5061_v40  ;;  %v5122_v39 = vld [vmem:[%s8348_s0 + $0x668] sm:$0xff] }
  0xa7   :  { %v5188_v40 = vld [vmem:[%s8348_s0 + $0x768] sm:$0xff] }
  0xa9   :  { %5904 = vmatmul.mubr.msk.f32.gmra.mrb[82].mxu0 %vm65_vm1, %v4996_v41  ;;  %5954 = vmatmul.mubr.msk.f32.gmra.mrb[82].mxu1 %vm65_vm1, %v5062_v42 }
  0xaa   :  { %5906 = vmatprep.mubr.msk.f32.mxu0 %vm65_vm1, %v4997_v43  ;;  %5956 = vmatprep.mubr.msk.f32.mxu1 %vm65_vm1, %v5063_v44  ;;  %v5123_v43 = vld [vmem:[%s8348_s0 + $0x670] sm:$0xff] }
  0xab   :  { %v5189_v44 = vld [vmem:[%s8348_s0 + $0x770] sm:$0xff] }
  0xad   :  { %5907 = vmatmul.mubr.msk.f32.gmra.mrb[84].mxu0 %vm65_vm1, %v4998_v45  ;;  %5957 = vmatmul.mubr.msk.f32.gmra.mrb[84].mxu1 %vm65_vm1, %v5064_v46 }
  0xae   :  { %5909 = vmatprep.mubr.msk.f32.mxu0 %vm65_vm1, %v4999_v47  ;;  %5959 = vmatprep.mubr.msk.f32.mxu1 %vm65_vm1, %v5065_v48 }
  0xb1   :  { %5910 = vmatmul.mubr.msk.f32.gmra.mrb[86].mxu0 %vm65_vm1, %v5000_v49  ;;  %5960 = vmatmul.mubr.msk.f32.gmra.mrb[86].mxu1 %vm65_vm1, %v5066_v50 }
  0xb2   :  { %5912 = vmatprep.mubr.msk.f32.mxu0 %vm65_vm1, %v5001_v51  ;;  %5962 = vmatprep.mubr.msk.f32.mxu1 %vm65_vm1, %v5067_v52 }
  0xb5   :  { %5913 = vmatmul.mubr.msk.f32.gmra.mrb[88].mxu0 %vm65_vm1, %v5002_v53  ;;  %5963 = vmatmul.mubr.msk.f32.gmra.mrb[88].mxu1 %vm65_vm1, %v5068_v54 }
  0xb6   :  { %5915 = vmatprep.mubr.msk.f32.mxu0 %vm65_vm1, %v5003_v55  ;;  %5965 = vmatprep.mubr.msk.f32.mxu1 %vm65_vm1, %v5069_v56 }
  0xb9   :  { %5916 = vmatmul.mubr.msk.f32.gmra.mrb[90].mxu0 %vm65_vm1, %v5004_v57  ;;  %5966 = vmatmul.mubr.msk.f32.gmra.mrb[90].mxu1 %vm65_vm1, %v5070_v58  ;;  %v5124_v57 = vld [vmem:[%s8348_s0 + $0x678] sm:$0xff] }
  0xba   :  { %5918 = vmatprep.mubr.msk.f32.mxu0 %vm65_vm1, %v5005_v59  ;;  %5968 = vmatprep.mubr.msk.f32.mxu1 %vm65_vm1, %v5071_v60  ;;  %v5190_v58 = vld [vmem:[%s8348_s0 + $0x778] sm:$0xff] }
  0xbd   :  { %5919 = vmatmul.mubr.msk.f32.gmra.mrb[92].mxu0 %vm65_vm1, %v5006_v61  ;;  %5969 = vmatmul.mubr.msk.f32.gmra.mrb[92].mxu1 %vm65_vm1, %v5072_v62  ;;  %v5125_v61 = vld [vmem:[%s8348_s0 + $0x680] sm:$0xff] }
  0xbe   :  { %5921 = vmatprep.mubr.msk.f32.mxu0 %vm65_vm1, %v5007_v63  ;;  %5971 = vmatprep.mubr.msk.f32.mxu1 %vm65_vm1, %v5073_v1  ;;  %v5191_v62 = vld [vmem:[%s8348_s0 + $0x780] sm:$0xff] }
  0xc1   :  { %5922 = vmatmul.mubr.msk.f32.gmra.mrb[94].mxu0 %vm65_vm1, %v5008_v2  ;;  %5972 = vmatmul.mubr.msk.f32.gmra.mrb[94].mxu1 %vm65_vm1, %v5074_v3 }
  0xc2   :  { %5976 = vmatprep.mubr.msk.f32.mxu0 %vm65_vm1, %v5109_v4  ;;  %6026 = vmatprep.mubr.msk.f32.mxu1 %vm65_vm1, %v5175_v5 }
  0xc5   :  { %5977 = vmatmul.mubr.msk.f32.vlgmr.msra.gmra.mrb[96].mxu0 %vm65_vm1, %v5110_v6  ;;  %6027 = vmatmul.mubr.msk.f32.vlgmr.msra.gmra.mrb[96].mxu1 %vm65_vm1, %v5176_v7 }
  0xc6   :  { %6075 = vmatpush3.msk.msra.mxu0 %vm162_vm0, %v6228_v0  ;;  %5979 = vmatprep.mubr.msk.f32.mxu0 %vm65_vm1, %v5111_v8  ;;  %v5179_v0 = vld [vmem:[%s8348_s0 + $0x720] sm:$0xff] }
  0xc7   :  { %6029 = vmatprep.mubr.msk.f32.mxu1 %vm65_vm1, %v5177_v9 }
  0xc9   :  { %5980 = vmatmul.mubr.msk.f32.gmra.mrb[98].mxu0 %vm65_vm1, %v5112_v10  ;;  %6030 = vmatmul.mubr.msk.f32.gmra.mrb[98].mxu1 %vm65_vm1, %v5178_v11 }
  0xca   :  { %5982 = vmatprep.mubr.msk.f32.mxu0 %vm65_vm1, %v5113_v12  ;;  %6032 = vmatprep.mubr.msk.f32.mxu1 %vm65_vm1, %v5179_v0  ;;  %v5126_v12 = vld [vmem:[%s8348_s0 + $0x688] sm:$0xff] }
  0xcb   :  { %v5192_v0 = vld [vmem:[%s8348_s0 + $0x788] sm:$0xff] }
  0xcd   :  { %5983 = vmatmul.mubr.msk.f32.gmra.mrb[100].mxu0 %vm65_vm1, %v5114_v13  ;;  %6033 = vmatmul.mubr.msk.f32.gmra.mrb[100].mxu1 %vm65_vm1, %v5180_v14 }
  0xce   :  { %5985 = vmatprep.mubr.msk.f32.mxu0 %vm65_vm1, %v5115_v15  ;;  %6035 = vmatprep.mubr.msk.f32.mxu1 %vm65_vm1, %v5181_v16  ;;  %v5127_v15 = vld [vmem:[%s8348_s0 + $0x690] sm:$0xff] }
  0xcf   :  { %v5193_v16 = vld [vmem:[%s8348_s0 + $0x790] sm:$0xff] }
  0xd1   :  { %5986 = vmatmul.mubr.msk.f32.gmra.mrb[102].mxu0 %vm65_vm1, %v5116_v17  ;;  %6036 = vmatmul.mubr.msk.f32.gmra.mrb[102].mxu1 %vm65_vm1, %v5182_v18 }
  0xd2   :  { %5988 = vmatprep.mubr.msk.f32.mxu0 %vm65_vm1, %v5117_v19  ;;  %6038 = vmatprep.mubr.msk.f32.mxu1 %vm65_vm1, %v5183_v20 }
  0xd5   :  { %5989 = vmatmul.mubr.msk.f32.gmra.mrb[104].mxu0 %vm65_vm1, %v5118_v21  ;;  %6039 = vmatmul.mubr.msk.f32.gmra.mrb[104].mxu1 %vm65_vm1, %v5184_v22 }
  0xd6   :  { %5991 = vmatprep.mubr.msk.f32.mxu0 %vm65_vm1, %v5119_v23  ;;  %6041 = vmatprep.mubr.msk.f32.mxu1 %vm65_vm1, %v5185_v24 }
  0xd8   :  { %v5678_v30 = vpop.f32.mrb[0].mxu0  ;;  %v5728_v32 = vpop.f32.mrb[0].mxu1 }
  0xd9   :  { %v392_v33 = vmax.f32 %v5678_v30, 0.0  ;;  %v816_v34 = vmax.f32 %v5728_v32, 0.0  ;;  %v232_v35 = vpop.f32.mrb[1].mxu0  ;;  %v656_v36 = vpop.f32.mrb[1].mxu1  ;;  %5992 = vmatmul.mubr.msk.f32.gmra.mrb[106].mxu0 %vm65_vm1, %v5120_v25  ;;  %6042 = vmatmul.mubr.msk.f32.gmra.mrb[106].mxu1 %vm65_vm1, %v5186_v26  ;;  %v5128_v30 = vld [vmem:[%s8348_s0 + $0x698] sm:$0xff] }
  0xda   :  { %v391_v37 = vmax.f32 %v232_v35, 0.0  ;;  %v815_v38 = vmax.f32 %v656_v36, 0.0  ;;  %5994 = vmatprep.mubr.msk.f32.mxu0 %vm65_vm1, %v5121_v27  ;;  %6044 = vmatprep.mubr.msk.f32.mxu1 %vm65_vm1, %v5187_v28  ;;  %v5194_v32 = vld [vmem:[%s8348_s0 + $0x798] sm:$0xff]  ;;  %v5129_v35 = vld [vmem:[%s8348_s0 + $0x6a0] sm:$0xff] }
  0xdb   :  { %v430_v41 = vmul.f32 %v7137_v29, %v392_v33  ;;  %v854_v42 = vmul.f32 %v7142_v31, %v816_v34  ;;  %v5195_v36 = vld [vmem:[%s8348_s0 + $0x7a0] sm:$0xff] }
  0xdc   :  { %v429_v45 = vmul.f32 %v7137_v29, %v391_v37  ;;  %v853_v46 = vmul.f32 %v7142_v31, %v815_v38  ;;  %v5681_v47 = vpop.f32.mrb[2].mxu0  ;;  %v5731_v48 = vpop.f32.mrb[2].mxu1 }
  0xdd   :  { %v7164_v49 = vadd.f32 %v854_v42, %v430_v41  ;;  %v394_v50 = vmax.f32 %v5681_v47, 0.0  ;;  %v818_v51 = vmax.f32 %v5731_v48, 0.0  ;;  %v242_v52 = vpop.f32.mrb[3].mxu0  ;;  %v666_v53 = vpop.f32.mrb[3].mxu1  ;;  %5995 = vmatmul.mubr.msk.f32.gmra.mrb[108].mxu0 %vm65_vm1, %v5122_v39  ;;  %6045 = vmatmul.mubr.msk.f32.gmra.mrb[108].mxu1 %vm65_vm1, %v5188_v40 }
  0xde   :  { %v7168_v54 = vadd.f32 %v853_v46, %v429_v45  ;;  %v393_v55 = vmax.f32 %v242_v52, 0.0  ;;  %v817_v56 = vmax.f32 %v666_v53, 0.0  ;;  %5997 = vmatprep.mubr.msk.f32.mxu0 %vm65_vm1, %v5123_v43  ;;  %6047 = vmatprep.mubr.msk.f32.mxu1 %vm65_vm1, %v5189_v44 }
  0xdf   :  { %v432_v59 = vmul.f32 %v7137_v29, %v394_v50  ;;  %v856_v60 = vmul.f32 %v7142_v31, %v818_v51  ;;  %v5130_v50 = vld [vmem:[%s8348_s0 + $0x6a8] sm:$0xff] }
  0xe0   :  { %v431_v63 = vmul.f32 %v7137_v29, %v393_v55  ;;  %v855_v1 = vmul.f32 %v7142_v31, %v817_v56  ;;  %v5684_v2 = vpop.f32.mrb[4].mxu0  ;;  %v5734_v3 = vpop.f32.mrb[4].mxu1  ;;  %v5196_v51 = vld [vmem:[%s8348_s0 + $0x7a8] sm:$0xff]  ;;  %v5131_v55 = vld [vmem:[%s8348_s0 + $0x6b0] sm:$0xff] }
  0xe1   :  { %v7188_v4 = vadd.f32 %v856_v60, %v432_v59  ;;  %v396_v5 = vmax.f32 %v5684_v2, 0.0  ;;  %v820_v6 = vmax.f32 %v5734_v3, 0.0  ;;  %v252_v7 = vpop.f32.mrb[5].mxu0  ;;  %v676_v8 = vpop.f32.mrb[5].mxu1  ;;  %5998 = vmatmul.mubr.msk.f32.gmra.mrb[110].mxu0 %vm65_vm1, %v5124_v57  ;;  %6048 = vmatmul.mubr.msk.f32.gmra.mrb[110].mxu1 %vm65_vm1, %v5190_v58  ;;  %v5197_v56 = vld [vmem:[%s8348_s0 + $0x7b0] sm:$0xff] }
  0xe2   :  { %v7192_v9 = vadd.f32 %v855_v1, %v431_v63  ;;  %v395_v10 = vmax.f32 %v252_v7, 0.0  ;;  %v819_v11 = vmax.f32 %v676_v8, 0.0  ;;  %6000 = vmatprep.mubr.msk.f32.mxu0 %vm65_vm1, %v5125_v61  ;;  %6050 = vmatprep.mubr.msk.f32.mxu1 %vm65_vm1, %v5191_v62  ;;  %v5132_v7 = vld [vmem:[%s8348_s0 + $0x6b8] sm:$0xff] }
  0xe3   :  { %v434_v13 = vmul.f32 %v7137_v29, %v396_v5  ;;  %v858_v14 = vmul.f32 %v7142_v31, %v820_v6  ;;  %v5198_v8 = vld [vmem:[%s8348_s0 + $0x7b8] sm:$0xff] }
  0xe4   :  { %v433_v17 = vmul.f32 %v7137_v29, %v395_v10  ;;  %v857_v18 = vmul.f32 %v7142_v31, %v819_v11  ;;  %v5687_v19 = vpop.f32.mrb[6].mxu0  ;;  %v5737_v20 = vpop.f32.mrb[6].mxu1 }
  0xe5   :  { %v7212_v21 = vadd.f32 %v858_v14, %v434_v13  ;;  %v398_v22 = vmax.f32 %v5687_v19, 0.0  ;;  %v822_v23 = vmax.f32 %v5737_v20, 0.0  ;;  %v262_v24 = vpop.f32.mrb[7].mxu0  ;;  %v686_v25 = vpop.f32.mrb[7].mxu1  ;;  %6001 = vmatmul.mubr.msk.f32.gmra.mrb[112].mxu0 %vm65_vm1, %v5126_v12  ;;  %6051 = vmatmul.mubr.msk.f32.gmra.mrb[112].mxu1 %vm65_vm1, %v5192_v0  ;;  %v5133_v12 = vld [vmem:[%s8348_s0 + $0x6c0] sm:$0xff] }
  0xe6   :  { %v7216_v26 = vadd.f32 %v857_v18, %v433_v17  ;;  %v397_v27 = vmax.f32 %v262_v24, 0.0  ;;  %v821_v28 = vmax.f32 %v686_v25, 0.0  ;;  %6003 = vmatprep.mubr.msk.f32.mxu0 %vm65_vm1, %v5127_v15  ;;  %6053 = vmatprep.mubr.msk.f32.mxu1 %vm65_vm1, %v5193_v16  ;;  %v5199_v0 = vld [vmem:[%s8348_s0 + $0x7c0] sm:$0xff] }
  0xe7   :  { %v436_v33 = vmul.f32 %v7137_v29, %v398_v22  ;;  %v860_v34 = vmul.f32 %v7142_v31, %v822_v23 }
  0xe8   :  { %v435_v37 = vmul.f32 %v7137_v29, %v397_v27  ;;  %v859_v38 = vmul.f32 %v7142_v31, %v821_v28  ;;  %v5690_v39 = vpop.f32.mrb[8].mxu0  ;;  %v5740_v40 = vpop.f32.mrb[8].mxu1  ;;  %v5134_v27 = vld [vmem:[%s8348_s0 + $0x6c8] sm:$0xff] }
  0xe9   :  { %v7236_v41 = vadd.f32 %v860_v34, %v436_v33  ;;  %v400_v42 = vmax.f32 %v5690_v39, 0.0  ;;  %v824_v43 = vmax.f32 %v5740_v40, 0.0  ;;  %v272_v44 = vpop.f32.mrb[9].mxu0  ;;  %v696_v45 = vpop.f32.mrb[9].mxu1  ;;  %6004 = vmatmul.mubr.msk.f32.gmra.mrb[114].mxu0 %vm65_vm1, %v5128_v30  ;;  %6054 = vmatmul.mubr.msk.f32.gmra.mrb[114].mxu1 %vm65_vm1, %v5194_v32  ;;  %v5200_v28 = vld [vmem:[%s8348_s0 + $0x7c8] sm:$0xff]  ;;  %v5135_v33 = vld [vmem:[%s8348_s0 + $0x6d0] sm:$0xff] }
  0xea   :  { %v7240_v46 = vadd.f32 %v859_v38, %v435_v37  ;;  %v399_v47 = vmax.f32 %v272_v44, 0.0  ;;  %v823_v48 = vmax.f32 %v696_v45, 0.0  ;;  %6006 = vmatprep.mubr.msk.f32.mxu0 %vm65_vm1, %v5129_v35  ;;  %6056 = vmatprep.mubr.msk.f32.mxu1 %vm65_vm1, %v5195_v36  ;;  %v5201_v34 = vld [vmem:[%s8348_s0 + $0x7d0] sm:$0xff] }
  0xeb   :  { %v438_v52 = vmul.f32 %v7137_v29, %v400_v42  ;;  %v862_v53 = vmul.f32 %v7142_v31, %v824_v43 }
  0xec   :  { %v437_v57 = vmul.f32 %v7137_v29, %v399_v47  ;;  %v861_v58 = vmul.f32 %v7142_v31, %v823_v48  ;;  %v5693_v59 = vpop.f32.mrb[10].mxu0  ;;  %v5743_v60 = vpop.f32.mrb[10].mxu1 }
  0xed   :  { %v7260_v61 = vadd.f32 %v862_v53, %v438_v52  ;;  %v402_v62 = vmax.f32 %v5693_v59, 0.0  ;;  %v826_v63 = vmax.f32 %v5743_v60, 0.0  ;;  %v282_v1 = vpop.f32.mrb[11].mxu0  ;;  %v706_v2 = vpop.f32.mrb[11].mxu1  ;;  %6007 = vmatmul.mubr.msk.f32.gmra.mrb[116].mxu0 %vm65_vm1, %v5130_v50  ;;  %6057 = vmatmul.mubr.msk.f32.gmra.mrb[116].mxu1 %vm65_vm1, %v5196_v51  ;;  %v5136_v50 = vld [vmem:[%s8348_s0 + $0x6d8] sm:$0xff] }
  0xee   :  { %v7264_v3 = vadd.f32 %v861_v58, %v437_v57  ;;  %v401_v5 = vmax.f32 %v282_v1, 0.0  ;;  %v825_v6 = vmax.f32 %v706_v2, 0.0  ;;  %6009 = vmatprep.mubr.msk.f32.mxu0 %vm65_vm1, %v5131_v55  ;;  %6059 = vmatprep.mubr.msk.f32.mxu1 %vm65_vm1, %v5197_v56  ;;  %v5202_v51 = vld [vmem:[%s8348_s0 + $0x7d8] sm:$0xff]  ;;  %v5137_v55 = vld [vmem:[%s8348_s0 + $0x6e0] sm:$0xff] }
  0xef   :  { %v440_v10 = vmul.f32 %v7137_v29, %v402_v62  ;;  %v864_v11 = vmul.f32 %v7142_v31, %v826_v63  ;;  %v5203_v56 = vld [vmem:[%s8348_s0 + $0x7e0] sm:$0xff] }
  0xf0   :  { %v439_v13 = vmul.f32 %v7137_v29, %v401_v5  ;;  %v863_v14 = vmul.f32 %v7142_v31, %v825_v6  ;;  %v5696_v15 = vpop.f32.mrb[12].mxu0  ;;  %v5746_v16 = vpop.f32.mrb[12].mxu1 }
  0xf1   :  { %v7284_v17 = vadd.f32 %v864_v11, %v440_v10  ;;  %v404_v18 = vmax.f32 %v5696_v15, 0.0  ;;  %v828_v19 = vmax.f32 %v5746_v16, 0.0  ;;  %v292_v20 = vpop.f32.mrb[13].mxu0  ;;  %v716_v22 = vpop.f32.mrb[13].mxu1  ;;  %6010 = vmatmul.mubr.msk.f32.gmra.mrb[118].mxu0 %vm65_vm1, %v5132_v7  ;;  %6060 = vmatmul.mubr.msk.f32.gmra.mrb[118].mxu1 %vm65_vm1, %v5198_v8  ;;  %v5138_v10 = vld [vmem:[%s8348_s0 + $0x6e8] sm:$0xff] }
  0xf2   :  { %v7288_v23 = vadd.f32 %v863_v14, %v439_v13  ;;  %v403_v24 = vmax.f32 %v292_v20, 0.0  ;;  %v827_v25 = vmax.f32 %v716_v22, 0.0  ;;  %6012 = vmatprep.mubr.msk.f32.mxu0 %vm65_vm1, %v5133_v12  ;;  %6062 = vmatprep.mubr.msk.f32.mxu1 %vm65_vm1, %v5199_v0  ;;  %v5204_v11 = vld [vmem:[%s8348_s0 + $0x7e8] sm:$0xff]  ;;  %v5139_v13 = vld [vmem:[%s8348_s0 + $0x6f0] sm:$0xff] }
  0xf3   :  { %v442_v30 = vmul.f32 %v7137_v29, %v404_v18  ;;  %v866_v32 = vmul.f32 %v7142_v31, %v828_v19  ;;  %v5205_v14 = vld [vmem:[%s8348_s0 + $0x7f0] sm:$0xff] }
  0xf4   :  { %v441_v35 = vmul.f32 %v7137_v29, %v403_v24  ;;  %v865_v36 = vmul.f32 %v7142_v31, %v827_v25  ;;  %v5699_v37 = vpop.f32.mrb[14].mxu0  ;;  %v5749_v38 = vpop.f32.mrb[14].mxu1 }
  0xf5   :  { %v7308_v39 = vadd.f32 %v866_v32, %v442_v30  ;;  %v406_v40 = vmax.f32 %v5699_v37, 0.0  ;;  %v830_v42 = vmax.f32 %v5749_v38, 0.0  ;;  %v302_v43 = vpop.f32.mrb[15].mxu0  ;;  %v726_v44 = vpop.f32.mrb[15].mxu1  ;;  %6013 = vmatmul.mubr.msk.f32.gmra.mrb[120].mxu0 %vm65_vm1, %v5134_v27  ;;  %6063 = vmatmul.mubr.msk.f32.gmra.mrb[120].mxu1 %vm65_vm1, %v5200_v28  ;;  %v5241_v37 = vld [vmem:[%s8348_s0 + $0x800] sm:$0xff] }
  0xf6   :  { %v7312_v45 = vadd.f32 %v865_v36, %v441_v35  ;;  %v405_v47 = vmax.f32 %v302_v43, 0.0  ;;  %v829_v48 = vmax.f32 %v726_v44, 0.0  ;;  %6015 = vmatprep.mubr.msk.f32.mxu0 %vm65_vm1, %v5135_v33  ;;  %6065 = vmatprep.mubr.msk.f32.mxu1 %vm65_vm1, %v5201_v34  ;;  %v5140_v33 = vld [vmem:[%s8348_s0 + $0x6f8] sm:$0xff] }
  0xf7   :  { %v444_v52 = vmul.f32 %v7137_v29, %v406_v40  ;;  %v868_v53 = vmul.f32 %v7142_v31, %v830_v42  ;;  %v5206_v34 = vld [vmem:[%s8348_s0 + $0x7f8] sm:$0xff] }
  0xf8   :  { %v443_v57 = vmul.f32 %v7137_v29, %v405_v47  ;;  %v867_v58 = vmul.f32 %v7142_v31, %v829_v48  ;;  %v5702_v59 = vpop.f32.mrb[16].mxu0  ;;  %v5752_v60 = vpop.f32.mrb[16].mxu1 }
  0xf9   :  { %v7332_v62 = vadd.f32 %v868_v53, %v444_v52  ;;  %v408_v63 = vmax.f32 %v5702_v59, 0.0  ;;  %v832_v1 = vmax.f32 %v5752_v60, 0.0  ;;  %v312_v2 = vpop.f32.mrb[17].mxu0  ;;  %v736_v5 = vpop.f32.mrb[17].mxu1  ;;  %6016 = vmatmul.mubr.msk.f32.gmra.mrb[122].mxu0 %vm65_vm1, %v5136_v50  ;;  %6066 = vmatmul.mubr.msk.f32.gmra.mrb[122].mxu1 %vm65_vm1, %v5202_v51  ;;  %v5243_v59 = vld [vmem:[%s8348_s0 + $0x810] sm:$0xff] }
  0xfa   :  { %v7336_v6 = vadd.f32 %v867_v58, %v443_v57  ;;  %v407_v7 = vmax.f32 %v312_v2, 0.0  ;;  %v831_v8 = vmax.f32 %v736_v5, 0.0  ;;  %6018 = vmatprep.mubr.msk.f32.mxu0 %vm65_vm1, %v5137_v55  ;;  %6068 = vmatprep.mubr.msk.f32.mxu1 %vm65_vm1, %v5203_v56  ;;  %v5242_v56 = vld [vmem:[%s8348_s0 + $0x808] sm:$0xff] }
  0xfb   :  { %v446_v12 = vmul.f32 %v7137_v29, %v408_v63  ;;  %v870_v0 = vmul.f32 %v7142_v31, %v832_v1 }
  0xfc   :  { %v445_v15 = vmul.f32 %v7137_v29, %v407_v7  ;;  %v869_v16 = vmul.f32 %v7142_v31, %v831_v8  ;;  %v5705_v18 = vpop.f32.mrb[18].mxu0  ;;  %v5755_v19 = vpop.f32.mrb[18].mxu1 }
  0xfd   :  { %v7356_v20 = vadd.f32 %v870_v0, %v446_v12  ;;  %v410_v22 = vmax.f32 %v5705_v18, 0.0  ;;  %v834_v24 = vmax.f32 %v5755_v19, 0.0  ;;  %v322_v25 = vpop.f32.mrb[19].mxu0  ;;  %v746_v27 = vpop.f32.mrb[19].mxu1  ;;  %6019 = vmatmul.mubr.msk.f32.gmra.mrb[124].mxu0 %vm65_vm1, %v5138_v10  ;;  %6069 = vmatmul.mubr.msk.f32.gmra.mrb[124].mxu1 %vm65_vm1, %v5204_v11  ;;  %v5245_v18 = vld [vmem:[%s8348_s0 + $0x820] sm:$0xff] }
  0xfe   :  { %v7360_v28 = vadd.f32 %v869_v16, %v445_v15  ;;  %v409_v30 = vmax.f32 %v322_v25, 0.0  ;;  %v833_v32 = vmax.f32 %v746_v27, 0.0  ;;  %6021 = vmatprep.mubr.msk.f32.mxu0 %vm65_vm1, %v5139_v13  ;;  %6071 = vmatprep.mubr.msk.f32.mxu1 %vm65_vm1, %v5205_v14  ;;  %v5244_v14 = vld [vmem:[%s8348_s0 + $0x818] sm:$0xff] }
  0xff   :  { %v448_v35 = vmul.f32 %v7137_v29, %v410_v22  ;;  %v872_v36 = vmul.f32 %v7142_v31, %v834_v24 }
 0x100   :  { %v447_v38 = vmul.f32 %v7137_v29, %v409_v30  ;;  %v871_v40 = vmul.f32 %v7142_v31, %v833_v32  ;;  %v5708_v42 = vpop.f32.mrb[20].mxu0  ;;  %v5758_v43 = vpop.f32.mrb[20].mxu1 }
 0x101   :  { %v7377_v44 = vadd.f32 %v872_v36, %v448_v35  ;;  %v412_v47 = vmax.f32 %v5708_v42, 0.0  ;;  %v836_v48 = vmax.f32 %v5758_v43, 0.0  ;;  %v332_v50 = vpop.f32.mrb[21].mxu0  ;;  %v756_v51 = vpop.f32.mrb[21].mxu1  ;;  %6022 = vmatmul.mubr.msk.f32.gmra.mrb[126].mxu0 %vm65_vm1, %v5140_v33  ;;  %6072 = vmatmul.mubr.msk.f32.gmra.mrb[126].mxu1 %vm65_vm1, %v5206_v34  ;;  %v5247_v43 = vld [vmem:[%s8348_s0 + $0x830] sm:$0xff] }
 0x102   :  { %v7381_v52 = vadd.f32 %v871_v40, %v447_v38  ;;  %v411_v53 = vmax.f32 %v332_v50, 0.0  ;;  %v835_v55 = vmax.f32 %v756_v51, 0.0  ;;  %6076 = vmatprep.mubr.msk.f32.mxu0 %vm65_vm1, %v5241_v37  ;;  %v5246_v38 = vld [vmem:[%s8348_s0 + $0x828] sm:$0xff] }
 0x103   :  { %v450_v57 = vmul.f32 %v7137_v29, %v412_v47  ;;  %v874_v58 = vmul.f32 %v7142_v31, %v836_v48 }
 0x104   :  { %v449_v60 = vmul.f32 %v7137_v29, %v411_v53  ;;  %v873_v63 = vmul.f32 %v7142_v31, %v835_v55  ;;  %v5711_v1 = vpop.f32.mrb[22].mxu0  ;;  %v5761_v2 = vpop.f32.mrb[22].mxu1 }
 0x105   :  { %v7394_v5 = vadd.f32 %v874_v58, %v450_v57  ;;  %v414_v7 = vmax.f32 %v5711_v1, 0.0  ;;  %v838_v8 = vmax.f32 %v5761_v2, 0.0  ;;  %v342_v10 = vpop.f32.mrb[23].mxu0  ;;  %v766_v11 = vpop.f32.mrb[23].mxu1  ;;  %6077 = vmatmul.mubr.msk.f32.vlgmr.msra.gmra.mrb[128].mxu0 %vm65_vm1, %v5242_v56  ;;  %v5248_v1 = vld [vmem:[%s8348_s0 + $0x838] sm:$0xff] }
 0x106   :  { %v7397_v12 = vadd.f32 %v873_v63, %v449_v60  ;;  %v413_v0 = vmax.f32 %v342_v10, 0.0  ;;  %v837_v13 = vmax.f32 %v766_v11, 0.0  ;;  %6079 = vmatprep.mubr.msk.f32.mxu0 %vm65_vm1, %v5243_v59 }
 0x107   :  { %v452_v15 = vmul.f32 %v7137_v29, %v414_v7  ;;  %v876_v16 = vmul.f32 %v7142_v31, %v838_v8  ;;  %v5249_v8 = vld [vmem:[%s8348_s0 + $0x840] sm:$0xff] }
 0x108   :  { %v451_v19 = vmul.f32 %v7137_v29, %v413_v0  ;;  %v875_v22 = vmul.f32 %v7142_v31, %v837_v13  ;;  %v5714_v24 = vpop.f32.mrb[24].mxu0  ;;  %v5764_v25 = vpop.f32.mrb[24].mxu1 }
 0x109   :  { %v7410_v27 = vadd.f32 %v876_v16, %v452_v15  ;;  %v416_v30 = vmax.f32 %v5714_v24, 0.0  ;;  %v840_v32 = vmax.f32 %v5764_v25, 0.0  ;;  %v352_v33 = vpop.f32.mrb[25].mxu0  ;;  %v776_v34 = vpop.f32.mrb[25].mxu1  ;;  %6080 = vmatmul.mubr.msk.f32.gmra.mrb[130].mxu0 %vm65_vm1, %v5244_v14 }
 0x10a   :  { %v7413_v35 = vadd.f32 %v875_v22, %v451_v19  ;;  %v415_v36 = vmax.f32 %v352_v33, 0.0  ;;  %v839_v37 = vmax.f32 %v776_v34, 0.0  ;;  %6082 = vmatprep.mubr.msk.f32.mxu0 %vm65_vm1, %v5245_v18  ;;  %v5251_v34 = vld [vmem:[%s8348_s0 + $0x850] sm:$0xff] }
 0x10b   :  { %v454_v40 = vmul.f32 %v7137_v29, %v416_v30  ;;  %v878_v42 = vmul.f32 %v7142_v31, %v840_v32  ;;  %v5250_v30 = vld [vmem:[%s8348_s0 + $0x848] sm:$0xff] }
 0x10c   :  { %v453_v47 = vmul.f32 %v7137_v29, %v415_v36  ;;  %v877_v48 = vmul.f32 %v7142_v31, %v839_v37  ;;  %v5717_v50 = vpop.f32.mrb[26].mxu0  ;;  %v5767_v51 = vpop.f32.mrb[26].mxu1 }
 0x10d   :  { %v7426_v53 = vadd.f32 %v878_v42, %v454_v40  ;;  %v418_v55 = vmax.f32 %v5717_v50, 0.0  ;;  %v842_v56 = vmax.f32 %v5767_v51, 0.0  ;;  %v362_v57 = vpop.f32.mrb[27].mxu0  ;;  %v786_v58 = vpop.f32.mrb[27].mxu1  ;;  %6083 = vmatmul.mubr.msk.f32.gmra.mrb[132].mxu0 %vm65_vm1, %v5246_v38 }
 0x10e   :  { %v7429_v59 = vadd.f32 %v877_v48, %v453_v47  ;;  %v417_v60 = vmax.f32 %v362_v57, 0.0  ;;  %v841_v63 = vmax.f32 %v786_v58, 0.0  ;;  %6085 = vmatprep.mubr.msk.f32.mxu0 %vm65_vm1, %v5247_v43  ;;  %v5252_v57 = vld [vmem:[%s8348_s0 + $0x858] sm:$0xff] }
 0x10f   :  { %v456_v2 = vmul.f32 %v7137_v29, %v418_v55  ;;  %v880_v7 = vmul.f32 %v7142_v31, %v842_v56 }
 0x110   :  { %v455_v10 = vmul.f32 %v7137_v29, %v417_v60  ;;  %v879_v11 = vmul.f32 %v7142_v31, %v841_v63  ;;  %v5720_v0 = vpop.f32.mrb[28].mxu0  ;;  %v5770_v13 = vpop.f32.mrb[28].mxu1  ;;  %v5253_v63 = vld [vmem:[%s8348_s0 + $0x860] sm:$0xff] }
 0x111   :  { %v7442_v14 = vadd.f32 %v880_v7, %v456_v2  ;;  %v420_v15 = vmax.f32 %v5720_v0, 0.0  ;;  %v844_v16 = vmax.f32 %v5770_v13, 0.0  ;;  %v372_v18 = vpop.f32.mrb[29].mxu0  ;;  %v796_v19 = vpop.f32.mrb[29].mxu1  ;;  %6086 = vmatmul.mubr.msk.f32.gmra.mrb[134].mxu0 %vm65_vm1, %v5248_v1  ;;  %v7477_v7 = vld [vmem:[%s8349_s2 + $0x2] ss:$0 sm:$0xff] }
 0x112   :  { %v7445_v22 = vadd.f32 %v879_v11, %v455_v10  ;;  %v419_v24 = vmax.f32 %v372_v18, 0.0  ;;  %v843_v25 = vmax.f32 %v796_v19, 0.0  ;;  %6088 = vmatprep.mubr.msk.f32.mxu0 %vm65_vm1, %v5249_v8  ;;  %v7482_v10 = vld [vmem:[%s8349_s2 + $0x3] ss:$0 sm:$0xff] }
 0x113   :  { %v458_v32 = vmul.f32 %v7137_v29, %v420_v15  ;;  %v882_v33 = vmul.f32 %v7142_v31, %v844_v16 }
 0x114   :  { %v457_v36 = vmul.f32 %v7137_v29, %v419_v24  ;;  %v881_v37 = vmul.f32 %v7142_v31, %v843_v25  ;;  %v5723_v38 = vpop.f32.mrb[30].mxu0  ;;  %v5773_v40 = vpop.f32.mrb[30].mxu1  ;;  %v5254_v24 = vld [vmem:[%s8348_s0 + $0x868] sm:$0xff] }
 0x115   :  { %v7458_v42 = vadd.f32 %v882_v33, %v458_v32  ;;  %v422_v43 = vmax.f32 %v5723_v38, 0.0  ;;  %v846_v47 = vmax.f32 %v5773_v40, 0.0  ;;  %v382_v48 = vpop.f32.mrb[31].mxu0  ;;  %v806_v50 = vpop.f32.mrb[31].mxu1  ;;  %6089 = vmatmul.mubr.msk.f32.gmra.mrb[136].mxu0 %vm65_vm1, %v5250_v30  ;;  %v5255_v32 = vld [vmem:[%s8348_s0 + $0x870] sm:$0xff] }
 0x116   :  { %v7461_v51 = vadd.f32 %v881_v37, %v457_v36  ;;  %v421_v55 = vmax.f32 %v382_v48, 0.0  ;;  %v845_v56 = vmax.f32 %v806_v50, 0.0  ;;  %6091 = vmatprep.mubr.msk.f32.mxu0 %vm65_vm1, %v5251_v34 }
 0x117   :  { %v460_v58 = vmul.f32 %v7137_v29, %v422_v43  ;;  %v884_v60 = vmul.f32 %v7142_v31, %v846_v47 }
 0x118   :  { %v459_v1 = vmul.f32 %v7137_v29, %v421_v55  ;;  %v883_v2 = vmul.f32 %v7142_v31, %v845_v56  ;;  %v5778_v8 = vpop.f32.mrb[32].mxu0  ;;  %v5828_v11 = vpop.f32.mrb[32].mxu1 }
 0x119   :  { %v7484_v0 = vadd.f32 %v884_v60, %v460_v58  ;;  %v1272_v13 = vmax.f32 %v5778_v8, 0.0  ;;  %v1112_v15 = vpop.f32.mrb[33].mxu0  ;;  %6092 = vmatmul.mubr.msk.f32.gmra.mrb[138].mxu0 %vm65_vm1, %v5252_v57  ;;  %v1728_v29 = vmax.f32 %v5828_v11, 0.0  ;;  %v1568_v31 = vpop.f32.mrb[33].mxu1  ;;  %v5256_v57 = vld [vmem:[%s8348_s0 + $0x878] sm:$0xff] }
 0x11a   :  { %v7487_v16 = vadd.f32 %v883_v2, %v459_v1  ;;  %v1271_v18 = vmax.f32 %v1112_v15, 0.0  ;;  %v1727_v19 = vmax.f32 %v1568_v31, 0.0  ;;  %6094 = vmatprep.mubr.msk.f32.mxu0 %vm65_vm1, %v5253_v63  ;;  %v5257_v63 = vld [vmem:[%s8348_s0 + $0x880] sm:$0xff] }
 0x11b   :  { %v1310_v25 = vmul.f32 %v7477_v7, %v1272_v13  ;;  %v1766_v30 = vmul.f32 %v7482_v10, %v1728_v29 }
 0x11c   :  { %v1309_v33 = vmul.f32 %v7477_v7, %v1271_v18  ;;  %v1765_v34 = vmul.f32 %v7482_v10, %v1727_v19  ;;  %v5781_v36 = vpop.f32.mrb[34].mxu0  ;;  %v5831_v37 = vpop.f32.mrb[34].mxu1 }
 0x11d   :  { %v1342_v38 = vadd.f32 %v1310_v25, %v7164_v49  ;;  %v1274_v40 = vmax.f32 %v5781_v36, 0.0  ;;  %v1122_v43 = vpop.f32.mrb[35].mxu0  ;;  %6095 = vmatmul.mubr.msk.f32.gmra.mrb[140].mxu0 %vm65_vm1, %v5254_v24  ;;  %v1730_v47 = vmax.f32 %v5831_v37, 0.0  ;;  %v1578_v48 = vpop.f32.mrb[35].mxu1 }
 0x11e   :  { %v1341_v50 = vadd.f32 %v1309_v33, %v7168_v54  ;;  %v1273_v55 = vmax.f32 %v1122_v43, 0.0  ;;  %v1729_v56 = vmax.f32 %v1578_v48, 0.0  ;;  %6097 = vmatprep.mubr.msk.f32.mxu0 %vm65_vm1, %v5255_v32 }
 0x11f   :  { %v7507_v58 = vadd.f32 %v1766_v30, %v1342_v38  ;;  %v1312_v49 = vmul.f32 %v7477_v7, %v1274_v40  ;;  %v1768_v60 = vmul.f32 %v7482_v10, %v1730_v47  ;;  %v5258_v30 = vld [vmem:[%s8348_s0 + $0x888] sm:$0xff] }
 0x120   :  { %v7514_v1 = vadd.f32 %v1765_v34, %v1341_v50  ;;  %v1311_v54 = vmul.f32 %v7477_v7, %v1273_v55  ;;  %v1767_v2 = vmul.f32 %v7482_v10, %v1729_v56  ;;  %v5784_v8 = vpop.f32.mrb[36].mxu0  ;;  %v5834_v11 = vpop.f32.mrb[36].mxu1  ;;  %v5259_v34 = vld [vmem:[%s8348_s0 + $0x890] sm:$0xff] }
 0x121   :  { %v1344_v13 = vadd.f32 %v1312_v49, %v7188_v4  ;;  %v1276_v15 = vmax.f32 %v5784_v8, 0.0  ;;  %v1132_v29 = vpop.f32.mrb[37].mxu0  ;;  %6098 = vmatmul.mubr.msk.f32.gmra.mrb[142].mxu0 %vm65_vm1, %v5256_v57  ;;  %v1732_v31 = vmax.f32 %v5834_v11, 0.0  ;;  %v1588_v18 = vpop.f32.mrb[37].mxu1 }
 0x122   :  { %v1343_v19 = vadd.f32 %v1311_v54, %v7192_v9  ;;  %v1275_v24 = vmax.f32 %v1132_v29, 0.0  ;;  %v1731_v25 = vmax.f32 %v1588_v18, 0.0  ;;  %6100 = vmatprep.mubr.msk.f32.mxu0 %vm65_vm1, %v5257_v63 }
 0x123   :  { %v7525_v32 = vadd.f32 %v1768_v60, %v1344_v13  ;;  %v1314_v4 = vmul.f32 %v7477_v7, %v1276_v15  ;;  %v1770_v33 = vmul.f32 %v7482_v10, %v1732_v31  ;;  %v5260_v60 = vld [vmem:[%s8348_s0 + $0x898] sm:$0xff] }
 0x124   :  { %v7532_v36 = vadd.f32 %v1767_v2, %v1343_v19  ;;  %v1313_v9 = vmul.f32 %v7477_v7, %v1275_v24  ;;  %v1769_v37 = vmul.f32 %v7482_v10, %v1731_v25  ;;  %v5787_v38 = vpop.f32.mrb[38].mxu0  ;;  %v5837_v40 = vpop.f32.mrb[38].mxu1  ;;  %v5261_v2 = vld [vmem:[%s8348_s0 + $0x8a0] sm:$0xff] }
 0x125   :  { %v1346_v43 = vadd.f32 %v1314_v4, %v7212_v21  ;;  %v1278_v47 = vmax.f32 %v5787_v38, 0.0  ;;  %v1142_v48 = vpop.f32.mrb[39].mxu0  ;;  %6101 = vmatmul.mubr.msk.f32.gmra.mrb[144].mxu0 %vm65_vm1, %v5258_v30  ;;  %v1734_v50 = vmax.f32 %v5837_v40, 0.0  ;;  %v1598_v55 = vpop.f32.mrb[39].mxu1  ;;  %v4181_v38 = vld [vmem:[%s8350_s4 + $0x8] sm:$0xff] }
 0x126   :  { %v1345_v56 = vadd.f32 %v1313_v9, %v7216_v26  ;;  %v1277_v57 = vmax.f32 %v1142_v48, 0.0  ;;  %v1733_v49 = vmax.f32 %v1598_v55, 0.0  ;;  %6103 = vmatprep.mubr.msk.f32.mxu0 %vm65_vm1, %v5259_v34 }
 0x127   :  { %v7543_v63 = vadd.f32 %v1770_v33, %v1346_v43  ;;  %v1316_v21 = vmul.f32 %v7477_v7, %v1278_v47  ;;  %v1772_v54 = vmul.f32 %v7482_v10, %v1734_v50  ;;  %v5262_v33 = vld [vmem:[%s8348_s0 + $0x8a8] sm:$0xff] }
 0x128   :  { %v7550_v8 = vadd.f32 %v1769_v37, %v1345_v56  ;;  %v1315_v26 = vmul.f32 %v7477_v7, %v1277_v57  ;;  %v1771_v11 = vmul.f32 %v7482_v10, %v1733_v49  ;;  %v5790_v13 = vpop.f32.mrb[40].mxu0  ;;  %v5840_v15 = vpop.f32.mrb[40].mxu1  ;;  %v5263_v37 = vld [vmem:[%s8348_s0 + $0x8b0] sm:$0xff] }
 0x129   :  { %v1348_v29 = vadd.f32 %v1316_v21, %v7236_v41  ;;  %v1280_v31 = vmax.f32 %v5790_v13, 0.0  ;;  %v1152_v18 = vpop.f32.mrb[41].mxu0  ;;  %6104 = vmatmul.mubr.msk.f32.gmra.mrb[146].mxu0 %vm65_vm1, %v5260_v60  ;;  %v1736_v19 = vmax.f32 %v5840_v15, 0.0  ;;  %v1608_v24 = vpop.f32.mrb[41].mxu1 }
 0x12a   :  { %v1347_v25 = vadd.f32 %v1315_v26, %v7240_v46  ;;  %v1279_v30 = vmax.f32 %v1152_v18, 0.0  ;;  %v1735_v4 = vmax.f32 %v1608_v24, 0.0  ;;  %6106 = vmatprep.mubr.msk.f32.mxu0 %vm65_vm1, %v5261_v2  ;;  %v4180_v46 = vld [vmem:[%s8350_s4] sm:$0xff] }
 0x12b   :  { %v7561_v34 = vadd.f32 %v1772_v54, %v1348_v29  ;;  %v1318_v41 = vmul.f32 %v7477_v7, %v1280_v31  ;;  %v1774_v9 = vmul.f32 %v7482_v10, %v1736_v19  ;;  %v6180_v55 = vpack.c.bf16 %v4181_v38, %v4180_v46  ;;  %v5265_v29 = vld [vmem:[%s8348_s0 + $0x8c0] sm:$0xff]  ;;  %v5266_v38 = vld [vmem:[%s8348_s0 + $0x8c8] sm:$0xff] }
 0x12c   :  { %v7574_v40 = vadd.f32 %v1771_v11, %v1347_v25  ;;  %v1317_v43 = vmul.f32 %v7477_v7, %v1279_v30  ;;  %v1773_v47 = vmul.f32 %v7482_v10, %v1735_v4  ;;  %v5793_v48 = vpop.f32.mrb[42].mxu0  ;;  %v5843_v50 = vpop.f32.mrb[42].mxu1  ;;  %v5264_v11 = vld [vmem:[%s8348_s0 + $0x8b8] sm:$0xff] }
 0x12d   :  { %v1350_v56 = vadd.f32 %v1318_v41, %v7260_v61  ;;  %v1282_v57 = vmax.f32 %v5793_v48, 0.0  ;;  %v1162_v49 = vpop.f32.mrb[43].mxu0  ;;  %6107 = vmatmul.mubr.msk.f32.gmra.mrb[148].mxu0 %vm65_vm1, %v5262_v33  ;;  %v1738_v60 = vmax.f32 %v5843_v50, 0.0  ;;  %v1618_v21 = vpop.f32.mrb[43].mxu1  ;;  %6181 = vmatprep.subr.bf16.mxu1 %v6180_v55  ;;  %v5267_v48 = vld [vmem:[%s8348_s0 + $0x8d0] sm:$0xff] }
 0x12e   :  { %v1349_v54 = vadd.f32 %v1317_v43, %v7264_v3  ;;  %v1281_v2 = vmax.f32 %v1162_v49, 0.0  ;;  %v1737_v26 = vmax.f32 %v1618_v21, 0.0  ;;  %6109 = vmatprep.mubr.msk.f32.mxu0 %vm65_vm1, %v5263_v37  ;;  %6183 = vmatpush3.bf16.msra.mxu1 %v6180_v55 }
 0x12f   :  { %v7585_v13 = vadd.f32 %v1774_v9, %v1350_v56  ;;  %v1320_v61 = vmul.f32 %v7477_v7, %v1282_v57  ;;  %v1776_v15 = vmul.f32 %v7482_v10, %v1738_v60 }
 0x130   :  { %v7592_v3 = vadd.f32 %v1773_v47, %v1349_v54  ;;  %v1319_v31 = vmul.f32 %v7477_v7, %v1281_v2  ;;  %v1775_v18 = vmul.f32 %v7482_v10, %v1737_v26  ;;  %v5796_v19 = vpop.f32.mrb[44].mxu0  ;;  %v5846_v24 = vpop.f32.mrb[44].mxu1 }
 0x131   :  { %v1352_v25 = vadd.f32 %v1320_v61, %v7284_v17  ;;  %v1284_v30 = vmax.f32 %v5796_v19, 0.0  ;;  %v1172_v4 = vpop.f32.mrb[45].mxu0  ;;  %6110 = vmatmul.mubr.msk.f32.gmra.mrb[150].mxu0 %vm65_vm1, %v5264_v11  ;;  %v1740_v33 = vmax.f32 %v5846_v24, 0.0  ;;  %v1628_v41 = vpop.f32.mrb[45].mxu1 }
 0x132   :  { %v1351_v9 = vadd.f32 %v1319_v31, %v7288_v23  ;;  %v1283_v37 = vmax.f32 %v1172_v4, 0.0  ;;  %v1739_v46 = vmax.f32 %v1628_v41, 0.0  ;;  %6112 = vmatprep.mubr.msk.f32.mxu0 %vm65_vm1, %v5265_v29 }
 0x133   :  { %v7603_v43 = vadd.f32 %v1776_v15, %v1352_v25  ;;  %v1322_v17 = vmul.f32 %v7477_v7, %v1284_v30  ;;  %v1778_v47 = vmul.f32 %v7482_v10, %v1740_v33  ;;  %v5268_v15 = vld [vmem:[%s8348_s0 + $0x8d8] sm:$0xff] }
 0x134   :  { %v7610_v50 = vadd.f32 %v1775_v18, %v1351_v9  ;;  %v1321_v23 = vmul.f32 %v7477_v7, %v1283_v37  ;;  %v1777_v55 = vmul.f32 %v7482_v10, %v1739_v46  ;;  %v5799_v56 = vpop.f32.mrb[46].mxu0  ;;  %v5849_v57 = vpop.f32.mrb[46].mxu1  ;;  %v5269_v18 = vld [vmem:[%s8348_s0 + $0x8e0] sm:$0xff] }
 0x135   :  { %v1354_v49 = vadd.f32 %v1322_v17, %v7308_v39  ;;  %v1286_v60 = vmax.f32 %v5799_v56, 0.0  ;;  %v1182_v21 = vpop.f32.mrb[47].mxu0  ;;  %6113 = vmatmul.mubr.msk.f32.gmra.mrb[152].mxu0 %vm65_vm1, %v5266_v38  ;;  %v1742_v54 = vmax.f32 %v5849_v57, 0.0  ;;  %v1638_v2 = vpop.f32.mrb[47].mxu1 }
 0x136   :  { %v1353_v26 = vadd.f32 %v1321_v23, %v7312_v45  ;;  %v1285_v11 = vmax.f32 %v1182_v21, 0.0  ;;  %v1741_v61 = vmax.f32 %v1638_v2, 0.0  ;;  %6115 = vmatprep.mubr.msk.f32.mxu0 %vm65_vm1, %v5267_v48 }
 0x137   :  { %v7621_v29 = vadd.f32 %v1778_v47, %v1354_v49  ;;  %v1324_v39 = vmul.f32 %v7477_v7, %v1286_v60  ;;  %v1780_v31 = vmul.f32 %v7482_v10, %v1742_v54  ;;  %v5270_v47 = vld [vmem:[%s8348_s0 + $0x8e8] sm:$0xff] }
 0x138   :  { %v7628_v19 = vadd.f32 %v1777_v55, %v1353_v26  ;;  %v1323_v45 = vmul.f32 %v7477_v7, %v1285_v11  ;;  %v1779_v24 = vmul.f32 %v7482_v10, %v1741_v61  ;;  %v5802_v25 = vpop.f32.mrb[48].mxu0  ;;  %v5852_v30 = vpop.f32.mrb[48].mxu1  ;;  %v5271_v55 = vld [vmem:[%s8348_s0 + $0x8f0] sm:$0xff] }
 0x139   :  { %v1356_v4 = vadd.f32 %v1324_v39, %v7332_v62  ;;  %v1288_v33 = vmax.f32 %v5802_v25, 0.0  ;;  %v1192_v41 = vpop.f32.mrb[49].mxu0  ;;  %6116 = vmatmul.mubr.msk.f32.gmra.mrb[154].mxu0 %vm65_vm1, %v5268_v15  ;;  %v1744_v9 = vmax.f32 %v5852_v30, 0.0  ;;  %v1648_v37 = vpop.f32.mrb[49].mxu1 }
 0x13a   :  { %v1355_v46 = vadd.f32 %v1323_v45, %v7336_v6  ;;  %v1287_v38 = vmax.f32 %v1192_v41, 0.0  ;;  %v1743_v17 = vmax.f32 %v1648_v37, 0.0  ;;  %6118 = vmatprep.mubr.msk.f32.mxu0 %vm65_vm1, %v5269_v18 }
 0x13b   :  { %v7639_v48 = vadd.f32 %v1780_v31, %v1356_v4  ;;  %v1326_v62 = vmul.f32 %v7477_v7, %v1288_v33  ;;  %v1782_v23 = vmul.f32 %v7482_v10, %v1744_v9  ;;  %v5272_v31 = vld [vmem:[%s8348_s0 + $0x8f8] sm:$0xff] }
 0x13c   :  { %v7646_v56 = vadd.f32 %v1779_v24, %v1355_v46  ;;  %v1325_v6 = vmul.f32 %v7477_v7, %v1287_v38  ;;  %v1781_v57 = vmul.f32 %v7482_v10, %v1743_v17  ;;  %v5805_v49 = vpop.f32.mrb[50].mxu0  ;;  %v5855_v60 = vpop.f32.mrb[50].mxu1 }
 0x13d   :  { %v1358_v21 = vadd.f32 %v1326_v62, %v7356_v20  ;;  %v1290_v54 = vmax.f32 %v5805_v49, 0.0  ;;  %v1202_v2 = vpop.f32.mrb[51].mxu0  ;;  %6119 = vmatmul.mubr.msk.f32.gmra.mrb[156].mxu0 %vm65_vm1, %v5270_v47  ;;  %v1746_v26 = vmax.f32 %v5855_v60, 0.0  ;;  %v1658_v11 = vpop.f32.mrb[51].mxu1 }
 0x13e   :  { %v1357_v61 = vadd.f32 %v1325_v6, %v7360_v28  ;;  %v1289_v15 = vmax.f32 %v1202_v2, 0.0  ;;  %v1745_v39 = vmax.f32 %v1658_v11, 0.0  ;;  %6121 = vmatprep.mubr.msk.f32.mxu0 %vm65_vm1, %v5271_v55 }
 0x13f   :  { %v7657_v18 = vadd.f32 %v1782_v23, %v1358_v21  ;;  %v1328_v20 = vmul.f32 %v7477_v7, %v1290_v54  ;;  %v1784_v45 = vmul.f32 %v7482_v10, %v1746_v26 }
 0x140   :  { %v7661_v24 = vadd.f32 %v1781_v57, %v1357_v61  ;;  %v1327_v25 = vmul.f32 %v7477_v7, %v1289_v15  ;;  %v1783_v28 = vmul.f32 %v7482_v10, %v1745_v39  ;;  %v5808_v30 = vpop.f32.mrb[52].mxu0  ;;  %v5858_v4 = vpop.f32.mrb[52].mxu1 }
 0x141   :  { %v1360_v33 = vadd.f32 %v1328_v20, %v7377_v44  ;;  %v1292_v41 = vmax.f32 %v5808_v30, 0.0  ;;  %v1212_v9 = vpop.f32.mrb[53].mxu0  ;;  %6122 = vmatmul.mubr.msk.f32.gmra.mrb[158].mxu0 %vm65_vm1, %v5272_v31  ;;  %v1748_v37 = vmax.f32 %v5858_v4, 0.0  ;;  %v1668_v46 = vpop.f32.mrb[53].mxu1 }
 0x142   :  { %v1359_v38 = vadd.f32 %v1327_v25, %v7381_v52  ;;  %v1291_v17 = vmax.f32 %v1212_v9, 0.0  ;;  %v1747_v47 = vmax.f32 %v1668_v46, 0.0 }
 0x143   :  { %v7668_v62 = vadd.f32 %v1784_v45, %v1360_v33  ;;  %v1330_v23 = vmul.f32 %v7477_v7, %v1292_v41  ;;  %v1786_v55 = vmul.f32 %v7482_v10, %v1748_v37 }
 0x144   :  { %v7672_v6 = vadd.f32 %v1783_v28, %v1359_v38  ;;  %v1329_v44 = vmul.f32 %v7477_v7, %v1291_v17  ;;  %v1785_v57 = vmul.f32 %v7482_v10, %v1747_v47  ;;  %v5811_v49 = vpop.f32.mrb[54].mxu0  ;;  %v5861_v60 = vpop.f32.mrb[54].mxu1  ;;  %v4182_v17 = vld [vmem:[%s8350_s4 + $0x10] sm:$0xff]  ;;  %v4183_v47 = vld [vmem:[%s8350_s4 + $0x18] sm:$0xff] }
 0x145   :  { %v1362_v21 = vadd.f32 %v1330_v23, %v7394_v5  ;;  %v1294_v54 = vmax.f32 %v5811_v49, 0.0  ;;  %v1222_v52 = vpop.f32.mrb[55].mxu0  ;;  %v1750_v2 = vmax.f32 %v5861_v60, 0.0  ;;  %v1678_v26 = vpop.f32.mrb[55].mxu1 }
 0x146   :  { %v1361_v11 = vadd.f32 %v1329_v44, %v7397_v12  ;;  %v1293_v61 = vmax.f32 %v1222_v52, 0.0  ;;  %v1749_v15 = vmax.f32 %v1678_v26, 0.0  ;;  %v6184_v44 = vpack.c.bf16 %v4183_v47, %v4182_v17 }
 0x147   :  { %v7678_v39 = vadd.f32 %v1786_v55, %v1362_v21  ;;  %v1332_v31 = vmul.f32 %v7477_v7, %v1294_v54  ;;  %v1788_v20 = vmul.f32 %v7482_v10, %v1750_v2 }
 0x148   :  { %v7682_v45 = vadd.f32 %v1785_v57, %v1361_v11  ;;  %v1331_v25 = vmul.f32 %v7477_v7, %v1293_v61  ;;  %v1787_v5 = vmul.f32 %v7482_v10, %v1749_v15  ;;  %v5814_v28 = vpop.f32.mrb[56].mxu0  ;;  %v5864_v30 = vpop.f32.mrb[56].mxu1  ;;  %6185 = vmatprep.subr.bf16.mxu1 %v6184_v44 }
 0x149   :  { %v1364_v4 = vadd.f32 %v1332_v31, %v7410_v27  ;;  %v1296_v33 = vmax.f32 %v5814_v28, 0.0  ;;  %v1232_v12 = vpop.f32.mrb[57].mxu0  ;;  %v1752_v41 = vmax.f32 %v5864_v30, 0.0  ;;  %v1688_v9 = vpop.f32.mrb[57].mxu1  ;;  %6187 = vmatpush3.bf16.msra.mxu1 %v6184_v44 }
 0x14a   :  { %v1363_v37 = vadd.f32 %v1331_v25, %v7413_v35  ;;  %v1295_v46 = vmax.f32 %v1232_v12, 0.0  ;;  %v1751_v38 = vmax.f32 %v1688_v9, 0.0 }
 0x14b   :  { %v7694_v23 = vadd.f32 %v1788_v20, %v1364_v4  ;;  %v1334_v27 = vmul.f32 %v7477_v7, %v1296_v33  ;;  %v1790_v55 = vmul.f32 %v7482_v10, %v1752_v41 }
 0x14c   :  { %v7698_v57 = vadd.f32 %v1787_v5, %v1363_v37  ;;  %v1333_v35 = vmul.f32 %v7477_v7, %v1295_v46  ;;  %v1789_v49 = vmul.f32 %v7482_v10, %v1751_v38  ;;  %v5817_v60 = vpop.f32.mrb[58].mxu0  ;;  %v5867_v21 = vpop.f32.mrb[58].mxu1 }
 0x14d   :  { %v1366_v54 = vadd.f32 %v1334_v27, %v7426_v53  ;;  %v1298_v52 = vmax.f32 %v5817_v60, 0.0  ;;  %v1242_v2 = vpop.f32.mrb[59].mxu0  ;;  %v1754_v26 = vmax.f32 %v5867_v21, 0.0  ;;  %v1698_v11 = vpop.f32.mrb[59].mxu1 }
 0x14e   :  { %v1365_v61 = vadd.f32 %v1333_v35, %v7429_v59  ;;  %v1297_v15 = vmax.f32 %v1242_v2, 0.0  ;;  %v1753_v31 = vmax.f32 %v1698_v11, 0.0 }
 0x14f   :  { %v7704_v20 = vadd.f32 %v1790_v55, %v1366_v54  ;;  %v1336_v25 = vmul.f32 %v7477_v7, %v1298_v52  ;;  %v1792_v5 = vmul.f32 %v7482_v10, %v1754_v26 }
 0x150   :  { %v7708_v28 = vadd.f32 %v1789_v49, %v1365_v61  ;;  %v1335_v53 = vmul.f32 %v7477_v7, %v1297_v15  ;;  %v1791_v30 = vmul.f32 %v7482_v10, %v1753_v31  ;;  %v5820_v4 = vpop.f32.mrb[60].mxu0  ;;  %v5870_v33 = vpop.f32.mrb[60].mxu1 }
 0x151   :  { %v1368_v12 = vadd.f32 %v1336_v25, %v7442_v14  ;;  %v1300_v59 = vmax.f32 %v5820_v4, 0.0  ;;  %v1252_v41 = vpop.f32.mrb[61].mxu0  ;;  %v1756_v9 = vmax.f32 %v5870_v33, 0.0  ;;  %v1708_v37 = vpop.f32.mrb[61].mxu1  ;;  %v7740_v4 = vld [vmem:[%s8349_s2 + $0x5] ss:$0 sm:$0xff] }
 0x152   :  { %v1367_v46 = vadd.f32 %v1335_v53, %v7445_v22  ;;  %v1299_v38 = vmax.f32 %v1252_v41, 0.0  ;;  %v1755_v17 = vmax.f32 %v1708_v37, 0.0 }
 0x153   :  { %v7714_v47 = vadd.f32 %v1792_v5, %v1368_v12  ;;  %v1338_v27 = vmul.f32 %v7477_v7, %v1300_v59  ;;  %v1794_v55 = vmul.f32 %v7482_v10, %v1756_v9 }
 0x154   :  { %v7718_v44 = vadd.f32 %v1791_v30, %v1367_v46  ;;  %v1337_v35 = vmul.f32 %v7477_v7, %v1299_v38  ;;  %v1793_v14 = vmul.f32 %v7482_v10, %v1755_v17  ;;  %v5823_v49 = vpop.f32.mrb[62].mxu0  ;;  %v5873_v60 = vpop.f32.mrb[62].mxu1  ;;  %v7735_v30 = vld [vmem:[%s8349_s2 + $0x4] ss:$0 sm:$0xff] }
 0x155   :  { %v1370_v21 = vadd.f32 %v1338_v27, %v7458_v42  ;;  %v1302_v54 = vmax.f32 %v5823_v49, 0.0  ;;  %v1262_v22 = vpop.f32.mrb[63].mxu0  ;;  %v1758_v52 = vmax.f32 %v5873_v60, 0.0  ;;  %v1718_v2 = vpop.f32.mrb[63].mxu1 }
 0x156   :  { %v1369_v26 = vadd.f32 %v1337_v35, %v7461_v51  ;;  %v1301_v11 = vmax.f32 %v1262_v22, 0.0  ;;  %v1757_v61 = vmax.f32 %v1718_v2, 0.0 }
 0x157   :  { %v7724_v15 = vadd.f32 %v1794_v55, %v1370_v21  ;;  %v1340_v31 = vmul.f32 %v7477_v7, %v1302_v54  ;;  %v1796_v25 = vmul.f32 %v7482_v10, %v1758_v52 }
 0x158   :  { %v7728_v5 = vadd.f32 %v1793_v14, %v1369_v26  ;;  %v1339_v53 = vmul.f32 %v7477_v7, %v1301_v11  ;;  %v1795_v42 = vmul.f32 %v7482_v10, %v1757_v61  ;;  %v5878_v51 = vpop.f32.mrb[64].mxu0  ;;  %v5928_v33 = vpop.f32.mrb[64].mxu1 }
 0x159   :  { %v1372_v12 = vadd.f32 %v1340_v31, %v7484_v0  ;;  %v2184_v59 = vmax.f32 %v5878_v51, 0.0  ;;  %v2024_v41 = vpop.f32.mrb[65].mxu0  ;;  %v2640_v9 = vmax.f32 %v5928_v33, 0.0  ;;  %v2480_v7 = vpop.f32.mrb[65].mxu1 }
 0x15a   :  { %v1371_v10 = vadd.f32 %v1339_v53, %v7487_v16  ;;  %v2183_v37 = vmax.f32 %v2024_v41, 0.0  ;;  %v2639_v46 = vmax.f32 %v2480_v7, 0.0 }
 0x15b   :  { %v7744_v38 = vadd.f32 %v1796_v25, %v1372_v12  ;;  %v2222_v17 = vmul.f32 %v7735_v30, %v2184_v59  ;;  %v2678_v27 = vmul.f32 %v7740_v4, %v2640_v9 }
 0x15c   :  { %v7748_v55 = vadd.f32 %v1795_v42, %v1371_v10  ;;  %v2221_v35 = vmul.f32 %v7735_v30, %v2183_v37  ;;  %v2677_v0 = vmul.f32 %v7740_v4, %v2639_v46  ;;  %v5881_v14 = vpop.f32.mrb[66].mxu0  ;;  %v5931_v49 = vpop.f32.mrb[66].mxu1 }
 0x15d   :  { %v2254_v60 = vadd.f32 %v2222_v17, %v7507_v58  ;;  %v2186_v21 = vmax.f32 %v5881_v14, 0.0  ;;  %v2034_v16 = vpop.f32.mrb[67].mxu0  ;;  %v2642_v54 = vmax.f32 %v5931_v49, 0.0  ;;  %v2490_v22 = vpop.f32.mrb[67].mxu1 }
 0x15e   :  { %v2253_v52 = vadd.f32 %v2221_v35, %v7514_v1  ;;  %v2185_v2 = vmax.f32 %v2034_v16, 0.0  ;;  %v2641_v26 = vmax.f32 %v2490_v22, 0.0 }
 0x15f   :  { %v7754_v11 = vadd.f32 %v2678_v27, %v2254_v60  ;;  %v2224_v61 = vmul.f32 %v7735_v30, %v2186_v21  ;;  %v2680_v31 = vmul.f32 %v7740_v4, %v2642_v54 }
 0x160   :  { %v7758_v25 = vadd.f32 %v2677_v0, %v2253_v52  ;;  %v2223_v53 = vmul.f32 %v7735_v30, %v2185_v2  ;;  %v2679_v58 = vmul.f32 %v7740_v4, %v2641_v26  ;;  %v5884_v42 = vpop.f32.mrb[68].mxu0  ;;  %v5934_v51 = vpop.f32.mrb[68].mxu1 }
 0x161   :  { %v2256_v33 = vadd.f32 %v2224_v61, %v7525_v32  ;;  %v2188_v12 = vmax.f32 %v5884_v42, 0.0  ;;  %v2044_v1 = vpop.f32.mrb[69].mxu0  ;;  %v2644_v59 = vmax.f32 %v5934_v51, 0.0  ;;  %v2500_v41 = vpop.f32.mrb[69].mxu1 }
 0x162   :  { %v2255_v9 = vadd.f32 %v2223_v53, %v7532_v36  ;;  %v2187_v7 = vmax.f32 %v2044_v1, 0.0  ;;  %v2643_v10 = vmax.f32 %v2500_v41, 0.0 }
 0x163   :  { %v7764_v37 = vadd.f32 %v2680_v31, %v2256_v33  ;;  %v2226_v46 = vmul.f32 %v7735_v30, %v2188_v12  ;;  %v2682_v17 = vmul.f32 %v7740_v4, %v2644_v59 }
 0x164   :  { %v7768_v27 = vadd.f32 %v2679_v58, %v2255_v9  ;;  %v2225_v35 = vmul.f32 %v7735_v30, %v2187_v7  ;;  %v2681_v32 = vmul.f32 %v7740_v4, %v2643_v10  ;;  %v5887_v0 = vpop.f32.mrb[70].mxu0  ;;  %v5937_v14 = vpop.f32.mrb[70].mxu1 }
 0x165   :  { %v2258_v49 = vadd.f32 %v2226_v46, %v7543_v63  ;;  %v2190_v60 = vmax.f32 %v5887_v0, 0.0  ;;  %v2054_v36 = vpop.f32.mrb[71].mxu0  ;;  %v2646_v21 = vmax.f32 %v5937_v14, 0.0  ;;  %v2510_v16 = vpop.f32.mrb[71].mxu1 }
 0x166   :  { %v2257_v54 = vadd.f32 %v2225_v35, %v7550_v8  ;;  %v2189_v22 = vmax.f32 %v2054_v36, 0.0  ;;  %v2645_v52 = vmax.f32 %v2510_v16, 0.0 }
 0x167   :  { %v7774_v2 = vadd.f32 %v2682_v17, %v2258_v49  ;;  %v2228_v26 = vmul.f32 %v7735_v30, %v2190_v60  ;;  %v2684_v61 = vmul.f32 %v7740_v4, %v2646_v21 }
 0x168   :  { %v7778_v31 = vadd.f32 %v2681_v32, %v2257_v54  ;;  %v2227_v53 = vmul.f32 %v7735_v30, %v2189_v22  ;;  %v2683_v63 = vmul.f32 %v7740_v4, %v2645_v52  ;;  %v5890_v58 = vpop.f32.mrb[72].mxu0  ;;  %v5940_v42 = vpop.f32.mrb[72].mxu1 }
 0x169   :  { %v2260_v51 = vadd.f32 %v2228_v26, %v7561_v34  ;;  %v2192_v33 = vmax.f32 %v5890_v58, 0.0  ;;  %v2064_v8 = vpop.f32.mrb[73].mxu0  ;;  %v2648_v12 = vmax.f32 %v5940_v42, 0.0  ;;  %v2520_v1 = vpop.f32.mrb[73].mxu1 }
 0x16a   :  { %v2259_v59 = vadd.f32 %v2227_v53, %v7574_v40  ;;  %v2191_v41 = vmax.f32 %v2064_v8, 0.0  ;;  %v2647_v9 = vmax.f32 %v2520_v1, 0.0 }
 0x16b   :  { %v7784_v7 = vadd.f32 %v2684_v61, %v2260_v51  ;;  %v2230_v10 = vmul.f32 %v7735_v30, %v2192_v33  ;;  %v2686_v46 = vmul.f32 %v7740_v4, %v2648_v12 }
 0x16c   :  { %v7788_v17 = vadd.f32 %v2683_v63, %v2259_v59  ;;  %v2229_v35 = vmul.f32 %v7735_v30, %v2191_v41  ;;  %v2685_v34 = vmul.f32 %v7740_v4, %v2647_v9  ;;  %v5893_v32 = vpop.f32.mrb[74].mxu0  ;;  %v5943_v0 = vpop.f32.mrb[74].mxu1 }
 0x16d   :  { %v2262_v14 = vadd.f32 %v2230_v10, %v7585_v13  ;;  %v2194_v49 = vmax.f32 %v5893_v32, 0.0  ;;  %v2074_v40 = vpop.f32.mrb[75].mxu0  ;;  %v2650_v60 = vmax.f32 %v5943_v0, 0.0  ;;  %v2530_v36 = vpop.f32.mrb[75].mxu1 }
 0x16e   :  { %v2261_v21 = vadd.f32 %v2229_v35, %v7592_v3  ;;  %v2193_v16 = vmax.f32 %v2074_v40, 0.0  ;;  %v2649_v54 = vmax.f32 %v2530_v36, 0.0 }
 0x16f   :  { %v7794_v22 = vadd.f32 %v2686_v46, %v2262_v14  ;;  %v2232_v52 = vmul.f32 %v7735_v30, %v2194_v49  ;;  %v2688_v26 = vmul.f32 %v7740_v4, %v2650_v60 }
 0x170   :  { %v7798_v61 = vadd.f32 %v2685_v34, %v2261_v21  ;;  %v2231_v53 = vmul.f32 %v7735_v30, %v2193_v16  ;;  %v2687_v13 = vmul.f32 %v7740_v4, %v2649_v54  ;;  %v5896_v63 = vpop.f32.mrb[76].mxu0  ;;  %v5946_v58 = vpop.f32.mrb[76].mxu1 }
 0x171   :  { %v2264_v42 = vadd.f32 %v2232_v52, %v7603_v43  ;;  %v2196_v51 = vmax.f32 %v5896_v63, 0.0  ;;  %v2084_v3 = vpop.f32.mrb[77].mxu0  ;;  %v2652_v33 = vmax.f32 %v5946_v58, 0.0  ;;  %v2540_v8 = vpop.f32.mrb[77].mxu1 }
 0x172   :  { %v2263_v12 = vadd.f32 %v2231_v53, %v7610_v50  ;;  %v2195_v1 = vmax.f32 %v2084_v3, 0.0  ;;  %v2651_v59 = vmax.f32 %v2540_v8, 0.0 }
 0x173   :  { %v7804_v41 = vadd.f32 %v2688_v26, %v2264_v42  ;;  %v2234_v9 = vmul.f32 %v7735_v30, %v2196_v51  ;;  %v2690_v10 = vmul.f32 %v7740_v4, %v2652_v33 }
 0x174   :  { %v7808_v46 = vadd.f32 %v2687_v13, %v2263_v12  ;;  %v2233_v35 = vmul.f32 %v7735_v30, %v2195_v1  ;;  %v2689_v43 = vmul.f32 %v7740_v4, %v2651_v59  ;;  %v5899_v34 = vpop.f32.mrb[78].mxu0  ;;  %v5949_v32 = vpop.f32.mrb[78].mxu1 }
 0x175   :  { %v2266_v0 = vadd.f32 %v2234_v9, %v7621_v29  ;;  %v2198_v14 = vmax.f32 %v5899_v34, 0.0  ;;  %v2094_v50 = vpop.f32.mrb[79].mxu0  ;;  %v2654_v49 = vmax.f32 %v5949_v32, 0.0  ;;  %v2550_v40 = vpop.f32.mrb[79].mxu1 }
 0x176   :  { %v2265_v60 = vadd.f32 %v2233_v35, %v7628_v19  ;;  %v2197_v36 = vmax.f32 %v2094_v50, 0.0  ;;  %v2653_v21 = vmax.f32 %v2550_v40, 0.0 }
 0x177   :  { %v7814_v16 = vadd.f32 %v2690_v10, %v2266_v0  ;;  %v2236_v54 = vmul.f32 %v7735_v30, %v2198_v14  ;;  %v2692_v52 = vmul.f32 %v7740_v4, %v2654_v49 }
 0x178   :  { %v7818_v26 = vadd.f32 %v2689_v43, %v2265_v60  ;;  %v2235_v53 = vmul.f32 %v7735_v30, %v2197_v36  ;;  %v2691_v29 = vmul.f32 %v7740_v4, %v2653_v21  ;;  %v5902_v13 = vpop.f32.mrb[80].mxu0  ;;  %v5952_v63 = vpop.f32.mrb[80].mxu1 }
 0x179   :  { %v2268_v58 = vadd.f32 %v2236_v54, %v7639_v48  ;;  %v2200_v42 = vmax.f32 %v5902_v13, 0.0  ;;  %v2104_v19 = vpop.f32.mrb[81].mxu0  ;;  %v2656_v51 = vmax.f32 %v5952_v63, 0.0  ;;  %v2560_v3 = vpop.f32.mrb[81].mxu1 }
 0x17a   :  { %v2267_v33 = vadd.f32 %v2235_v53, %v7646_v56  ;;  %v2199_v8 = vmax.f32 %v2104_v19, 0.0  ;;  %v2655_v12 = vmax.f32 %v2560_v3, 0.0 }
 0x17b   :  { %v7824_v1 = vadd.f32 %v2692_v52, %v2268_v58  ;;  %v2238_v59 = vmul.f32 %v7735_v30, %v2200_v42  ;;  %v2694_v9 = vmul.f32 %v7740_v4, %v2656_v51 }
 0x17c   :  { %v7828_v10 = vadd.f32 %v2691_v29, %v2267_v33  ;;  %v2237_v35 = vmul.f32 %v7735_v30, %v2199_v8  ;;  %v2693_v48 = vmul.f32 %v7740_v4, %v2655_v12  ;;  %v5905_v43 = vpop.f32.mrb[82].mxu0  ;;  %v5955_v34 = vpop.f32.mrb[82].mxu1 }
 0x17d   :  { %v2270_v32 = vadd.f32 %v2238_v59, %v7657_v18  ;;  %v2202_v0 = vmax.f32 %v5905_v43, 0.0  ;;  %v2114_v56 = vpop.f32.mrb[83].mxu0  ;;  %v2658_v14 = vmax.f32 %v5955_v34, 0.0  ;;  %v2570_v50 = vpop.f32.mrb[83].mxu1 }
 0x17e   :  { %v2269_v49 = vadd.f32 %v2237_v35, %v7661_v24  ;;  %v2201_v40 = vmax.f32 %v2114_v56, 0.0  ;;  %v2657_v60 = vmax.f32 %v2570_v50, 0.0 }
 0x17f   :  { %v7834_v36 = vadd.f32 %v2694_v9, %v2270_v32  ;;  %v2240_v21 = vmul.f32 %v7735_v30, %v2202_v0  ;;  %v2696_v54 = vmul.f32 %v7740_v4, %v2658_v14 }
 0x180   :  { %v7838_v52 = vadd.f32 %v2693_v48, %v2269_v49  ;;  %v2239_v53 = vmul.f32 %v7735_v30, %v2201_v40  ;;  %v2695_v18 = vmul.f32 %v7740_v4, %v2657_v60  ;;  %v5908_v29 = vpop.f32.mrb[84].mxu0  ;;  %v5958_v13 = vpop.f32.mrb[84].mxu1 }
 0x181   :  { %v2272_v63 = vadd.f32 %v2240_v21, %v7668_v62  ;;  %v2204_v58 = vmax.f32 %v5908_v29, 0.0  ;;  %v2124_v24 = vpop.f32.mrb[85].mxu0  ;;  %v2660_v42 = vmax.f32 %v5958_v13, 0.0  ;;  %v2580_v19 = vpop.f32.mrb[85].mxu1 }
 0x182   :  { %v2271_v51 = vadd.f32 %v2239_v53, %v7672_v6  ;;  %v2203_v3 = vmax.f32 %v2124_v24, 0.0  ;;  %v2659_v33 = vmax.f32 %v2580_v19, 0.0 }
 0x183   :  { %v7844_v8 = vadd.f32 %v2696_v54, %v2272_v63  ;;  %v2242_v12 = vmul.f32 %v7735_v30, %v2204_v58  ;;  %v2698_v59 = vmul.f32 %v7740_v4, %v2660_v42 }
 0x184   :  { %v7848_v9 = vadd.f32 %v2695_v18, %v2271_v51  ;;  %v2241_v35 = vmul.f32 %v7735_v30, %v2203_v3  ;;  %v2697_v62 = vmul.f32 %v7740_v4, %v2659_v33  ;;  %v5911_v48 = vpop.f32.mrb[86].mxu0  ;;  %v5961_v43 = vpop.f32.mrb[86].mxu1 }
 0x185   :  { %v2274_v34 = vadd.f32 %v2242_v12, %v7678_v39  ;;  %v2206_v32 = vmax.f32 %v5911_v48, 0.0  ;;  %v2134_v6 = vpop.f32.mrb[87].mxu0  ;;  %v2662_v0 = vmax.f32 %v5961_v43, 0.0  ;;  %v2590_v56 = vpop.f32.mrb[87].mxu1 }
 0x186   :  { %v2273_v14 = vadd.f32 %v2241_v35, %v7682_v45  ;;  %v2205_v50 = vmax.f32 %v2134_v6, 0.0  ;;  %v2661_v49 = vmax.f32 %v2590_v56, 0.0 }
 0x187   :  { %v7854_v40 = vadd.f32 %v2698_v59, %v2274_v34  ;;  %v2244_v60 = vmul.f32 %v7735_v30, %v2206_v32  ;;  %v2700_v21 = vmul.f32 %v7740_v4, %v2662_v0 }
 0x188   :  { %v7858_v54 = vadd.f32 %v2697_v62, %v2273_v14  ;;  %v2243_v53 = vmul.f32 %v7735_v30, %v2205_v50  ;;  %v2699_v39 = vmul.f32 %v7740_v4, %v2661_v49  ;;  %v5914_v18 = vpop.f32.mrb[88].mxu0  ;;  %v5964_v29 = vpop.f32.mrb[88].mxu1 }
 0x189   :  { %v2276_v13 = vadd.f32 %v2244_v60, %v7694_v23  ;;  %v2208_v63 = vmax.f32 %v5914_v18, 0.0  ;;  %v2144_v45 = vpop.f32.mrb[89].mxu0  ;;  %v2664_v58 = vmax.f32 %v5964_v29, 0.0  ;;  %v2600_v24 = vpop.f32.mrb[89].mxu1 }
 0x18a   :  { %v2275_v42 = vadd.f32 %v2243_v53, %v7698_v57  ;;  %v2207_v19 = vmax.f32 %v2144_v45, 0.0  ;;  %v2663_v51 = vmax.f32 %v2600_v24, 0.0 }
 0x18b   :  { %v7864_v3 = vadd.f32 %v2700_v21, %v2276_v13  ;;  %v2246_v33 = vmul.f32 %v7735_v30, %v2208_v63  ;;  %v2702_v12 = vmul.f32 %v7740_v4, %v2664_v58 }
 0x18c   :  { %v7868_v59 = vadd.f32 %v2699_v39, %v2275_v42  ;;  %v2245_v35 = vmul.f32 %v7735_v30, %v2207_v19  ;;  %v2701_v23 = vmul.f32 %v7740_v4, %v2663_v51  ;;  %v5917_v62 = vpop.f32.mrb[90].mxu0  ;;  %v5967_v48 = vpop.f32.mrb[90].mxu1 }
 0x18d   :  { %v2278_v43 = vadd.f32 %v2246_v33, %v7704_v20  ;;  %v2210_v34 = vmax.f32 %v5917_v62, 0.0  ;;  %v2154_v57 = vpop.f32.mrb[91].mxu0  ;;  %v2666_v32 = vmax.f32 %v5967_v48, 0.0  ;;  %v2610_v6 = vpop.f32.mrb[91].mxu1 }
 0x18e   :  { %v2277_v0 = vadd.f32 %v2245_v35, %v7708_v28  ;;  %v2209_v56 = vmax.f32 %v2154_v57, 0.0  ;;  %v2665_v14 = vmax.f32 %v2610_v6, 0.0 }
 0x18f   :  { %v7874_v50 = vadd.f32 %v2702_v12, %v2278_v43  ;;  %v2248_v49 = vmul.f32 %v7735_v30, %v2210_v34  ;;  %v2704_v60 = vmul.f32 %v7740_v4, %v2666_v32 }
 0x190   :  { %v7878_v21 = vadd.f32 %v2701_v23, %v2277_v0  ;;  %v2247_v53 = vmul.f32 %v7735_v30, %v2209_v56  ;;  %v2703_v20 = vmul.f32 %v7740_v4, %v2665_v14  ;;  %v5920_v39 = vpop.f32.mrb[92].mxu0  ;;  %v5970_v18 = vpop.f32.mrb[92].mxu1 }
 0x191   :  { %v2280_v29 = vadd.f32 %v2248_v49, %v7714_v47  ;;  %v2212_v13 = vmax.f32 %v5920_v39, 0.0  ;;  %v2164_v28 = vpop.f32.mrb[93].mxu0  ;;  %v2668_v63 = vmax.f32 %v5970_v18, 0.0  ;;  %v2620_v45 = vpop.f32.mrb[93].mxu1  ;;  %v7910_v39 = vld [vmem:[%s8349_s2 + $0x7] ss:$0 sm:$0xff] }
 0x192   :  { %v2279_v58 = vadd.f32 %v2247_v53, %v7718_v44  ;;  %v2211_v24 = vmax.f32 %v2164_v28, 0.0  ;;  %v2667_v42 = vmax.f32 %v2620_v45, 0.0 }
 0x193   :  { %v7884_v19 = vadd.f32 %v2704_v60, %v2280_v29  ;;  %v2250_v51 = vmul.f32 %v7735_v30, %v2212_v13  ;;  %v2706_v33 = vmul.f32 %v7740_v4, %v2668_v63 }
 0x194   :  { %v7888_v12 = vadd.f32 %v2703_v20, %v2279_v58  ;;  %v2249_v35 = vmul.f32 %v7735_v30, %v2211_v24  ;;  %v2705_v47 = vmul.f32 %v7740_v4, %v2667_v42  ;;  %v5923_v23 = vpop.f32.mrb[94].mxu0  ;;  %v5973_v62 = vpop.f32.mrb[94].mxu1  ;;  %v7905_v20 = vld [vmem:[%s8349_s2 + $0x6] ss:$0 sm:$0xff] }
 0x195   :  { %v2282_v48 = vadd.f32 %v2250_v51, %v7724_v15  ;;  %v2214_v43 = vmax.f32 %v5923_v23, 0.0  ;;  %v2174_v44 = vpop.f32.mrb[95].mxu0  ;;  %v2670_v34 = vmax.f32 %v5973_v62, 0.0  ;;  %v2630_v57 = vpop.f32.mrb[95].mxu1 }
 0x196   :  { %v2281_v32 = vadd.f32 %v2249_v35, %v7728_v5  ;;  %v2213_v6 = vmax.f32 %v2174_v44, 0.0  ;;  %v2669_v0 = vmax.f32 %v2630_v57, 0.0 }
 0x197   :  { %v7894_v56 = vadd.f32 %v2706_v33, %v2282_v48  ;;  %v2252_v14 = vmul.f32 %v7735_v30, %v2214_v43  ;;  %v2708_v49 = vmul.f32 %v7740_v4, %v2670_v34 }
 0x198   :  { %v7898_v60 = vadd.f32 %v2705_v47, %v2281_v32  ;;  %v2251_v53 = vmul.f32 %v7735_v30, %v2213_v6  ;;  %v2707_v15 = vmul.f32 %v7740_v4, %v2669_v0  ;;  %v5978_v5 = vpop.f32.mrb[96].mxu0  ;;  %v6028_v18 = vpop.f32.mrb[96].mxu1 }
 0x199   :  { %v2284_v29 = vadd.f32 %v2252_v14, %v7744_v38  ;;  %v3096_v13 = vmax.f32 %v5978_v5, 0.0  ;;  %v2936_v28 = vpop.f32.mrb[97].mxu0  ;;  %v3552_v63 = vmax.f32 %v6028_v18, 0.0  ;;  %v3392_v30 = vpop.f32.mrb[97].mxu1 }
 0x19a   :  { %v2283_v4 = vadd.f32 %v2251_v53, %v7748_v55  ;;  %v3095_v45 = vmax.f32 %v2936_v28, 0.0  ;;  %v3551_v58 = vmax.f32 %v3392_v30, 0.0 }
 0x19b   :  { %v7914_v24 = vadd.f32 %v2708_v49, %v2284_v29  ;;  %v3134_v42 = vmul.f32 %v7905_v20, %v3096_v13  ;;  %v3590_v51 = vmul.f32 %v7910_v39, %v3552_v63 }
 0x19c   :  { %v7918_v33 = vadd.f32 %v2707_v15, %v2283_v4  ;;  %v3133_v35 = vmul.f32 %v7905_v20, %v3095_v45  ;;  %v3589_v38 = vmul.f32 %v7910_v39, %v3551_v58  ;;  %v5981_v47 = vpop.f32.mrb[98].mxu0  ;;  %v6031_v23 = vpop.f32.mrb[98].mxu1 }
 0x19d   :  { %v3166_v62 = vadd.f32 %v3134_v42, %v7754_v11  ;;  %v3098_v48 = vmax.f32 %v5981_v47, 0.0  ;;  %v2946_v55 = vpop.f32.mrb[99].mxu0  ;;  %v3554_v43 = vmax.f32 %v6031_v23, 0.0  ;;  %v3402_v44 = vpop.f32.mrb[99].mxu1 }
 0x19e   :  { %v3165_v34 = vadd.f32 %v3133_v35, %v7758_v25  ;;  %v3097_v57 = vmax.f32 %v2946_v55, 0.0  ;;  %v3553_v32 = vmax.f32 %v3402_v44, 0.0 }
 0x19f   :  { %v7924_v6 = vadd.f32 %v3590_v51, %v3166_v62  ;;  %v3136_v0 = vmul.f32 %v7905_v20, %v3098_v48  ;;  %v3592_v14 = vmul.f32 %v7910_v39, %v3554_v43 }
 0x1a0   :  { %v7928_v49 = vadd.f32 %v3589_v38, %v3165_v34  ;;  %v3135_v53 = vmul.f32 %v7905_v20, %v3097_v57  ;;  %v3591_v11 = vmul.f32 %v7910_v39, %v3553_v32  ;;  %v5984_v15 = vpop.f32.mrb[100].mxu0  ;;  %v6034_v5 = vpop.f32.mrb[100].mxu1 }
 0x1a1   :  { %v3168_v18 = vadd.f32 %v3136_v0, %v7764_v37  ;;  %v3100_v29 = vmax.f32 %v5984_v15, 0.0  ;;  %v2956_v25 = vpop.f32.mrb[101].mxu0  ;;  %v3556_v13 = vmax.f32 %v6034_v5, 0.0  ;;  %v3412_v28 = vpop.f32.mrb[101].mxu1 }
 0x1a2   :  { %v3167_v63 = vadd.f32 %v3135_v53, %v7768_v27  ;;  %v3099_v30 = vmax.f32 %v2956_v25, 0.0  ;;  %v3555_v4 = vmax.f32 %v3412_v28, 0.0 }
 0x1a3   :  { %v7934_v45 = vadd.f32 %v3592_v14, %v3168_v18  ;;  %v3138_v58 = vmul.f32 %v7905_v20, %v3100_v29  ;;  %v3594_v42 = vmul.f32 %v7910_v39, %v3556_v13 }
 0x1a4   :  { %v7938_v51 = vadd.f32 %v3591_v11, %v3167_v63  ;;  %v3137_v35 = vmul.f32 %v7905_v20, %v3099_v30  ;;  %v3593_v37 = vmul.f32 %v7910_v39, %v3555_v4  ;;  %v5987_v38 = vpop.f32.mrb[102].mxu0  ;;  %v6037_v47 = vpop.f32.mrb[102].mxu1 }
 0x1a5   :  { %v3170_v23 = vadd.f32 %v3138_v58, %v7774_v2  ;;  %v3102_v62 = vmax.f32 %v5987_v38, 0.0  ;;  %v2966_v27 = vpop.f32.mrb[103].mxu0  ;;  %v3558_v48 = vmax.f32 %v6037_v47, 0.0  ;;  %v3422_v55 = vpop.f32.mrb[103].mxu1 }
 0x1a6   :  { %v3169_v43 = vadd.f32 %v3137_v35, %v7778_v31  ;;  %v3101_v44 = vmax.f32 %v2966_v27, 0.0  ;;  %v3557_v34 = vmax.f32 %v3422_v55, 0.0 }
 0x1a7   :  { %v7944_v57 = vadd.f32 %v3594_v42, %v3170_v23  ;;  %v3140_v32 = vmul.f32 %v7905_v20, %v3102_v62  ;;  %v3596_v0 = vmul.f32 %v7910_v39, %v3558_v48 }
 0x1a8   :  { %v7948_v14 = vadd.f32 %v3593_v37, %v3169_v43  ;;  %v3139_v53 = vmul.f32 %v7905_v20, %v3101_v44  ;;  %v3595_v2 = vmul.f32 %v7910_v39, %v3557_v34  ;;  %v5990_v11 = vpop.f32.mrb[104].mxu0  ;;  %v6040_v15 = vpop.f32.mrb[104].mxu1 }
 0x1a9   :  { %v3172_v5 = vadd.f32 %v3140_v32, %v7784_v7  ;;  %v3104_v18 = vmax.f32 %v5990_v11, 0.0  ;;  %v2976_v31 = vpop.f32.mrb[105].mxu0  ;;  %v3560_v29 = vmax.f32 %v6040_v15, 0.0  ;;  %v3432_v25 = vpop.f32.mrb[105].mxu1 }
 0x1aa   :  { %v3171_v13 = vadd.f32 %v3139_v53, %v7788_v17  ;;  %v3103_v28 = vmax.f32 %v2976_v31, 0.0  ;;  %v3559_v63 = vmax.f32 %v3432_v25, 0.0 }
 0x1ab   :  { %v7954_v30 = vadd.f32 %v3596_v0, %v3172_v5  ;;  %v3142_v4 = vmul.f32 %v7905_v20, %v3104_v18  ;;  %v3598_v58 = vmul.f32 %v7910_v39, %v3560_v29 }
 0x1ac   :  { %v7958_v42 = vadd.f32 %v3595_v2, %v3171_v13  ;;  %v3141_v35 = vmul.f32 %v7905_v20, %v3103_v28  ;;  %v3597_v7 = vmul.f32 %v7910_v39, %v3559_v63  ;;  %v5993_v37 = vpop.f32.mrb[106].mxu0  ;;  %v6043_v38 = vpop.f32.mrb[106].mxu1 }
 0x1ad   :  { %v3174_v47 = vadd.f32 %v3142_v4, %v7794_v22  ;;  %v3106_v23 = vmax.f32 %v5993_v37, 0.0  ;;  %v2986_v17 = vpop.f32.mrb[107].mxu0  ;;  %v3562_v62 = vmax.f32 %v6043_v38, 0.0  ;;  %v3442_v27 = vpop.f32.mrb[107].mxu1 }
 0x1ae   :  { %v3173_v48 = vadd.f32 %v3141_v35, %v7798_v61  ;;  %v3105_v55 = vmax.f32 %v2986_v17, 0.0  ;;  %v3561_v43 = vmax.f32 %v3442_v27, 0.0 }
 0x1af   :  { %v7964_v44 = vadd.f32 %v3598_v58, %v3174_v47  ;;  %v3144_v34 = vmul.f32 %v7905_v20, %v3106_v23  ;;  %v3600_v32 = vmul.f32 %v7910_v39, %v3562_v62 }
 0x1b0   :  { %v7968_v0 = vadd.f32 %v3597_v7, %v3173_v48  ;;  %v3143_v53 = vmul.f32 %v7905_v20, %v3105_v55  ;;  %v3599_v22 = vmul.f32 %v7910_v39, %v3561_v43  ;;  %v5996_v2 = vpop.f32.mrb[108].mxu0  ;;  %v6046_v11 = vpop.f32.mrb[108].mxu1 }
 0x1b1   :  { %v3176_v15 = vadd.f32 %v3144_v34, %v7804_v41  ;;  %v3108_v5 = vmax.f32 %v5996_v2, 0.0  ;;  %v2996_v61 = vpop.f32.mrb[109].mxu0  ;;  %v3564_v18 = vmax.f32 %v6046_v11, 0.0  ;;  %v3452_v31 = vpop.f32.mrb[109].mxu1 }
 0x1b2   :  { %v3175_v29 = vadd.f32 %v3143_v53, %v7808_v46  ;;  %v3107_v25 = vmax.f32 %v2996_v61, 0.0  ;;  %v3563_v13 = vmax.f32 %v3452_v31, 0.0 }
 0x1b3   :  { %v7974_v28 = vadd.f32 %v3600_v32, %v3176_v15  ;;  %v3146_v63 = vmul.f32 %v7905_v20, %v3108_v5  ;;  %v3602_v4 = vmul.f32 %v7910_v39, %v3564_v18 }
 0x1b4   :  { %v7978_v58 = vadd.f32 %v3599_v22, %v3175_v29  ;;  %v3145_v35 = vmul.f32 %v7905_v20, %v3107_v25  ;;  %v3601_v41 = vmul.f32 %v7910_v39, %v3563_v13  ;;  %v5999_v7 = vpop.f32.mrb[110].mxu0  ;;  %v6049_v37 = vpop.f32.mrb[110].mxu1 }
 0x1b5   :  { %v3178_v38 = vadd.f32 %v3146_v63, %v7814_v16  ;;  %v3110_v47 = vmax.f32 %v5999_v7, 0.0  ;;  %v3006_v46 = vpop.f32.mrb[111].mxu0  ;;  %v3566_v23 = vmax.f32 %v6049_v37, 0.0  ;;  %v3462_v17 = vpop.f32.mrb[111].mxu1 }
 0x1b6   :  { %v3177_v62 = vadd.f32 %v3145_v35, %v7818_v26  ;;  %v3109_v27 = vmax.f32 %v3006_v46, 0.0  ;;  %v3565_v48 = vmax.f32 %v3462_v17, 0.0 }
 0x1b7   :  { %v7984_v55 = vadd.f32 %v3602_v4, %v3178_v38  ;;  %v3148_v43 = vmul.f32 %v7905_v20, %v3110_v47  ;;  %v3604_v34 = vmul.f32 %v7910_v39, %v3566_v23 }
 0x1b8   :  { %v7988_v32 = vadd.f32 %v3601_v41, %v3177_v62  ;;  %v3147_v53 = vmul.f32 %v7905_v20, %v3109_v27  ;;  %v3603_v16 = vmul.f32 %v7910_v39, %v3565_v48  ;;  %v6002_v22 = vpop.f32.mrb[112].mxu0  ;;  %v6052_v2 = vpop.f32.mrb[112].mxu1 }
 0x1b9   :  { %v3180_v11 = vadd.f32 %v3148_v43, %v7824_v1  ;;  %v3112_v15 = vmax.f32 %v6002_v22, 0.0  ;;  %v3016_v26 = vpop.f32.mrb[113].mxu0  ;;  %v3568_v5 = vmax.f32 %v6052_v2, 0.0  ;;  %v3472_v61 = vpop.f32.mrb[113].mxu1 }
 0x1ba   :  { %v3179_v18 = vadd.f32 %v3147_v53, %v7828_v10  ;;  %v3111_v31 = vmax.f32 %v3016_v26, 0.0  ;;  %v3567_v29 = vmax.f32 %v3472_v61, 0.0 }
 0x1bb   :  { %v7994_v25 = vadd.f32 %v3604_v34, %v3180_v11  ;;  %v3150_v13 = vmul.f32 %v7905_v20, %v3112_v15  ;;  %v3606_v63 = vmul.f32 %v7910_v39, %v3568_v5 }
 0x1bc   :  { %v7998_v4 = vadd.f32 %v3603_v16, %v3179_v18  ;;  %v3149_v35 = vmul.f32 %v7905_v20, %v3111_v31  ;;  %v3605_v1 = vmul.f32 %v7910_v39, %v3567_v29  ;;  %v6005_v41 = vpop.f32.mrb[114].mxu0  ;;  %v6055_v7 = vpop.f32.mrb[114].mxu1 }
 0x1bd   :  { %v3182_v37 = vadd.f32 %v3150_v13, %v7834_v36  ;;  %v3114_v38 = vmax.f32 %v6005_v41, 0.0  ;;  %v3026_v10 = vpop.f32.mrb[115].mxu0  ;;  %v3570_v47 = vmax.f32 %v6055_v7, 0.0  ;;  %v3482_v46 = vpop.f32.mrb[115].mxu1 }
 0x1be   :  { %v3181_v23 = vadd.f32 %v3149_v35, %v7838_v52  ;;  %v3113_v17 = vmax.f32 %v3026_v10, 0.0  ;;  %v3569_v62 = vmax.f32 %v3482_v46, 0.0 }
 0x1bf   :  { %v8004_v27 = vadd.f32 %v3606_v63, %v3182_v37  ;;  %v3152_v48 = vmul.f32 %v7905_v20, %v3114_v38  ;;  %v3608_v43 = vmul.f32 %v7910_v39, %v3570_v47 }
 0x1c0   :  { %v8008_v34 = vadd.f32 %v3605_v1, %v3181_v23  ;;  %v3151_v53 = vmul.f32 %v7905_v20, %v3113_v17  ;;  %v3607_v36 = vmul.f32 %v7910_v39, %v3569_v62  ;;  %v6008_v16 = vpop.f32.mrb[116].mxu0  ;;  %v6058_v22 = vpop.f32.mrb[116].mxu1 }
 0x1c1   :  { %v3184_v2 = vadd.f32 %v3152_v48, %v7844_v8  ;;  %v3116_v11 = vmax.f32 %v6008_v16, 0.0  ;;  %v3036_v52 = vpop.f32.mrb[117].mxu0  ;;  %v3572_v15 = vmax.f32 %v6058_v22, 0.0  ;;  %v3492_v26 = vpop.f32.mrb[117].mxu1 }
 0x1c2   :  { %v3183_v5 = vadd.f32 %v3151_v53, %v7848_v9  ;;  %v3115_v61 = vmax.f32 %v3036_v52, 0.0  ;;  %v3571_v18 = vmax.f32 %v3492_v26, 0.0 }
 0x1c3   :  { %v8014_v31 = vadd.f32 %v3608_v43, %v3184_v2  ;;  %v3154_v29 = vmul.f32 %v7905_v20, %v3116_v11  ;;  %v3610_v13 = vmul.f32 %v7910_v39, %v3572_v15 }
 0x1c4   :  { %v8018_v63 = vadd.f32 %v3607_v36, %v3183_v5  ;;  %v3153_v35 = vmul.f32 %v7905_v20, %v3115_v61  ;;  %v3609_v8 = vmul.f32 %v7910_v39, %v3571_v18  ;;  %v6011_v1 = vpop.f32.mrb[118].mxu0  ;;  %v6061_v41 = vpop.f32.mrb[118].mxu1 }
 0x1c5   :  { %v3186_v7 = vadd.f32 %v3154_v29, %v7854_v40  ;;  %v3118_v37 = vmax.f32 %v6011_v1, 0.0  ;;  %v3046_v9 = vpop.f32.mrb[119].mxu0  ;;  %v3574_v38 = vmax.f32 %v6061_v41, 0.0  ;;  %v3502_v10 = vpop.f32.mrb[119].mxu1 }
 0x1c6   :  { %v3185_v47 = vadd.f32 %v3153_v35, %v7858_v54  ;;  %v3117_v46 = vmax.f32 %v3046_v9, 0.0  ;;  %v3573_v23 = vmax.f32 %v3502_v10, 0.0 }
 0x1c7   :  { %v8024_v17 = vadd.f32 %v3610_v13, %v3186_v7  ;;  %v3156_v62 = vmul.f32 %v7905_v20, %v3118_v37  ;;  %v3612_v48 = vmul.f32 %v7910_v39, %v3574_v38 }
 0x1c8   :  { %v8028_v43 = vadd.f32 %v3609_v8, %v3185_v47  ;;  %v3155_v53 = vmul.f32 %v7905_v20, %v3117_v46  ;;  %v3611_v40 = vmul.f32 %v7910_v39, %v3573_v23  ;;  %v6014_v36 = vpop.f32.mrb[120].mxu0  ;;  %v6064_v16 = vpop.f32.mrb[120].mxu1 }
 0x1c9   :  { %v3188_v22 = vadd.f32 %v3156_v62, %v7864_v3  ;;  %v3120_v2 = vmax.f32 %v6014_v36, 0.0  ;;  %v3056_v54 = vpop.f32.mrb[121].mxu0  ;;  %v3576_v11 = vmax.f32 %v6064_v16, 0.0  ;;  %v3512_v52 = vpop.f32.mrb[121].mxu1 }
 0x1ca   :  { %v3187_v15 = vadd.f32 %v3155_v53, %v7868_v59  ;;  %v3119_v26 = vmax.f32 %v3056_v54, 0.0  ;;  %v3575_v5 = vmax.f32 %v3512_v52, 0.0 }
 0x1cb   :  { %v8034_v61 = vadd.f32 %v3612_v48, %v3188_v22  ;;  %v3158_v18 = vmul.f32 %v7905_v20, %v3120_v2  ;;  %v3614_v29 = vmul.f32 %v7910_v39, %v3576_v11 }
 0x1cc   :  { %v8038_v13 = vadd.f32 %v3611_v40, %v3187_v15  ;;  %v3157_v35 = vmul.f32 %v7905_v20, %v3119_v26  ;;  %v3613_v3 = vmul.f32 %v7910_v39, %v3575_v5  ;;  %v6017_v8 = vpop.f32.mrb[122].mxu0  ;;  %v6067_v1 = vpop.f32.mrb[122].mxu1 }
 0x1cd   :  { %v3190_v41 = vadd.f32 %v3158_v18, %v7874_v50  ;;  %v3122_v7 = vmax.f32 %v6017_v8, 0.0  ;;  %v3066_v59 = vpop.f32.mrb[123].mxu0  ;;  %v3578_v37 = vmax.f32 %v6067_v1, 0.0  ;;  %v3522_v9 = vpop.f32.mrb[123].mxu1 }
 0x1ce   :  { %v3189_v38 = vadd.f32 %v3157_v35, %v7878_v21  ;;  %v3121_v10 = vmax.f32 %v3066_v59, 0.0  ;;  %v3577_v47 = vmax.f32 %v3522_v9, 0.0 }
 0x1cf   :  { %v8044_v46 = vadd.f32 %v3614_v29, %v3190_v41  ;;  %v3160_v23 = vmul.f32 %v7905_v20, %v3122_v7  ;;  %v3616_v62 = vmul.f32 %v7910_v39, %v3578_v37 }
 0x1d0   :  { %v8048_v48 = vadd.f32 %v3613_v3, %v3189_v38  ;;  %v3159_v53 = vmul.f32 %v7905_v20, %v3121_v10  ;;  %v3615_v50 = vmul.f32 %v7910_v39, %v3577_v47  ;;  %v6020_v40 = vpop.f32.mrb[124].mxu0  ;;  %v6070_v36 = vpop.f32.mrb[124].mxu1 }
 0x1d1   :  { %v3192_v16 = vadd.f32 %v3160_v23, %v7884_v19  ;;  %v3124_v22 = vmax.f32 %v6020_v40, 0.0  ;;  %v3076_v21 = vpop.f32.mrb[125].mxu0  ;;  %v3580_v2 = vmax.f32 %v6070_v36, 0.0  ;;  %v3532_v54 = vpop.f32.mrb[125].mxu1 }
 0x1d2   :  { %v3191_v11 = vadd.f32 %v3159_v53, %v7888_v12  ;;  %v3123_v52 = vmax.f32 %v3076_v21, 0.0  ;;  %v3579_v15 = vmax.f32 %v3532_v54, 0.0 }
 0x1d3   :  { %v8054_v26 = vadd.f32 %v3616_v62, %v3192_v16  ;;  %v3162_v5 = vmul.f32 %v7905_v20, %v3124_v22  ;;  %v3618_v18 = vmul.f32 %v7910_v39, %v3580_v2 }
 0x1d4   :  { %v8058_v29 = vadd.f32 %v3615_v50, %v3191_v11  ;;  %v3161_v35 = vmul.f32 %v7905_v20, %v3123_v52  ;;  %v3617_v19 = vmul.f32 %v7910_v39, %v3579_v15  ;;  %v6023_v3 = vpop.f32.mrb[126].mxu0  ;;  %v6073_v8 = vpop.f32.mrb[126].mxu1  ;;  %v8075_v50 = vld [vmem:[%s8349_s2 + $0x8] ss:$0 sm:$0xff] }
 0x1d5   :  { %v3194_v1 = vadd.f32 %v3162_v5, %v7894_v56  ;;  %v3126_v41 = vmax.f32 %v6023_v3, 0.0  ;;  %v3086_v12 = vpop.f32.mrb[127].mxu0  ;;  %v3582_v7 = vmax.f32 %v6073_v8, 0.0  ;;  %v3542_v59 = vpop.f32.mrb[127].mxu1 }
 0x1d6   :  { %v3193_v37 = vadd.f32 %v3161_v35, %v7898_v60  ;;  %v3125_v9 = vmax.f32 %v3086_v12, 0.0  ;;  %v3581_v38 = vmax.f32 %v3542_v59, 0.0 }
 0x1d7   :  { %v8064_v10 = vadd.f32 %v3618_v18, %v3194_v1  ;;  %v3164_v47 = vmul.f32 %v7905_v20, %v3126_v41  ;;  %v3620_v23 = vmul.f32 %v7910_v39, %v3582_v7 }
 0x1d8   :  { %v8068_v62 = vadd.f32 %v3617_v19, %v3193_v37  ;;  %v3163_v53 = vmul.f32 %v7905_v20, %v3125_v9  ;;  %v3619_v56 = vmul.f32 %v7910_v39, %v3581_v38  ;;  %v6078_v60 = vpop.f32.mrb[128].mxu0  ;;  %v8087_v39 = vld [vmem:[%s8351_s3] ss:$0 sm:$0xff] }
 0x1d9   :  { %v3196_v40 = vadd.f32 %v3164_v47, %v7914_v24  ;;  %v4008_v36 = vmax.f32 %v6078_v60, 0.0  ;;  %v3848_v16 = vpop.f32.mrb[129].mxu0 }
 0x1da   :  { %v3195_v22 = vadd.f32 %v3163_v53, %v7918_v33  ;;  %v4007_v21 = vmax.f32 %v3848_v16, 0.0 }
 0x1db   :  { %v8079_v2 = vadd.f32 %v3620_v23, %v3196_v40  ;;  %v4046_v54 = vmul.f32 %v8075_v50, %v4008_v36 }
 0x1dc   :  { %v8082_v20 = vadd.f32 %v3619_v56, %v3195_v22  ;;  %v4045_v11 = vmul.f32 %v8075_v50, %v4007_v21  ;;  %v6081_v52 = vpop.f32.mrb[130].mxu0 }
 0x1dd   :  { %v4078_v24 = vadd.f32 %v4046_v54, %v7924_v6  ;;  %v4010_v15 = vmax.f32 %v6081_v52, 0.0  ;;  %v3858_v5 = vpop.f32.mrb[131].mxu0 }
 0x1de   :  { %v4077_v33 = vadd.f32 %v4045_v11, %v7928_v49  ;;  %v4009_v18 = vmax.f32 %v3858_v5, 0.0 }
 0x1df   :  { %v4117_v35 = vadd.f32 %v8087_v39, %v4078_v24  ;;  %v4048_v19 = vmul.f32 %v8075_v50, %v4010_v15 }
 0x1e0   :  { %v4116_v3 = vadd.f32 %v8087_v39, %v4077_v33  ;;  %v4047_v8 = vmul.f32 %v8075_v50, %v4009_v18  ;;  %v6084_v1 = vpop.f32.mrb[132].mxu0 }
 0x1e1   :  { %v4080_v41 = vadd.f32 %v4048_v19, %v7934_v45  ;;  %v4012_v12 = vmax.f32 %v6084_v1, 0.0  ;;  %v3868_v7 = vpop.f32.mrb[133].mxu0  ;;  %v4149_v49 = vmax.f32 %v4117_v35, 0.0 }
 0x1e2   :  { %v4148_v6 = vmax.f32 %v4116_v3, 0.0  ;;  %v4079_v59 = vadd.f32 %v4047_v8, %v7938_v51  ;;  %v4011_v37 = vmax.f32 %v3868_v7, 0.0 }
 0x1e3   :  { %v4119_v9 = vadd.f32 %v8087_v39, %v4080_v41  ;;  %v4050_v38 = vmul.f32 %v8075_v50, %v4012_v12 }
 0x1e4   :  { %v4118_v47 = vadd.f32 %v8087_v39, %v4079_v59  ;;  %v4049_v23 = vmul.f32 %v8075_v50, %v4011_v37  ;;  %v6087_v53 = vpop.f32.mrb[134].mxu0  ;;  %6132 = vmatprep.mubr.msk.f32.mxu1 %vm4191_vm2, %v4148_v6 }
 0x1e5   :  { %v4082_v45 = vadd.f32 %v4050_v38, %v7944_v57  ;;  %v4014_v56 = vmax.f32 %v6087_v53, 0.0  ;;  %v3878_v60 = vpop.f32.mrb[135].mxu0  ;;  %6133 = vmatmul.mubr.msk.f32.vlgmr.msra.gmra.mrb[128].mxu1 %vm4191_vm2, %v4149_v49  ;;  %v4151_v16 = vmax.f32 %v4119_v9, 0.0 }
 0x1e6   :  { %v4150_v51 = vmax.f32 %v4118_v47, 0.0  ;;  %v4081_v40 = vadd.f32 %v4049_v23, %v7948_v14  ;;  %v4013_v36 = vmax.f32 %v3878_v60, 0.0 }
 0x1e7   :  { %v4121_v22 = vadd.f32 %v8087_v39, %v4082_v45  ;;  %v4052_v21 = vmul.f32 %v8075_v50, %v4014_v56 }
 0x1e8   :  { %v4120_v54 = vadd.f32 %v8087_v39, %v4081_v40  ;;  %v4051_v11 = vmul.f32 %v8075_v50, %v4013_v36  ;;  %v6090_v52 = vpop.f32.mrb[136].mxu0  ;;  %6135 = vmatprep.mubr.msk.f32.mxu1 %vm4191_vm2, %v4150_v51 }
 0x1e9   :  { %v4084_v57 = vadd.f32 %v4052_v21, %v7954_v30  ;;  %v4016_v24 = vmax.f32 %v6090_v52, 0.0  ;;  %v3888_v15 = vpop.f32.mrb[137].mxu0  ;;  %6136 = vmatmul.mubr.msk.f32.gmra.mrb[130].mxu1 %vm4191_vm2, %v4151_v16  ;;  %v4153_v18 = vmax.f32 %v4121_v22, 0.0 }
 0x1ea   :  { %v4152_v14 = vmax.f32 %v4120_v54, 0.0  ;;  %v4083_v5 = vadd.f32 %v4051_v11, %v7958_v42  ;;  %v4015_v33 = vmax.f32 %v3888_v15, 0.0 }
 0x1eb   :  { %v4123_v35 = vadd.f32 %v8087_v39, %v4084_v57  ;;  %v4054_v19 = vmul.f32 %v8075_v50, %v4016_v24 }
 0x1ec   :  { %v4122_v3 = vadd.f32 %v8087_v39, %v4083_v5  ;;  %v4053_v8 = vmul.f32 %v8075_v50, %v4015_v33  ;;  %v6093_v1 = vpop.f32.mrb[138].mxu0  ;;  %6138 = vmatprep.mubr.msk.f32.mxu1 %vm4191_vm2, %v4152_v14 }
 0x1ed   :  { %v4086_v30 = vadd.f32 %v4054_v19, %v7964_v44  ;;  %v4018_v41 = vmax.f32 %v6093_v1, 0.0  ;;  %v3898_v12 = vpop.f32.mrb[139].mxu0  ;;  %6139 = vmatmul.mubr.msk.f32.gmra.mrb[132].mxu1 %vm4191_vm2, %v4153_v18  ;;  %v4155_v59 = vmax.f32 %v4123_v35, 0.0 }
 0x1ee   :  { %v4154_v42 = vmax.f32 %v4122_v3, 0.0  ;;  %v4085_v7 = vadd.f32 %v4053_v8, %v7968_v0  ;;  %v4017_v6 = vmax.f32 %v3898_v12, 0.0 }
 0x1ef   :  { %v4125_v37 = vadd.f32 %v8087_v39, %v4086_v30  ;;  %v4056_v49 = vmul.f32 %v8075_v50, %v4018_v41 }
 0x1f0   :  { %v4124_v9 = vadd.f32 %v8087_v39, %v4085_v7  ;;  %v4055_v38 = vmul.f32 %v8075_v50, %v4017_v6  ;;  %v6096_v47 = vpop.f32.mrb[140].mxu0  ;;  %6141 = vmatprep.mubr.msk.f32.mxu1 %vm4191_vm2, %v4154_v42 }
 0x1f1   :  { %v4088_v44 = vadd.f32 %v4056_v49, %v7974_v28  ;;  %v4020_v23 = vmax.f32 %v6096_v47, 0.0  ;;  %v3908_v53 = vpop.f32.mrb[141].mxu0  ;;  %6142 = vmatmul.mubr.msk.f32.gmra.mrb[134].mxu1 %vm4191_vm2, %v4155_v59  ;;  %v4157_v60 = vmax.f32 %v4125_v37, 0.0 }
 0x1f2   :  { %v4156_v0 = vmax.f32 %v4124_v9, 0.0  ;;  %v4087_v45 = vadd.f32 %v4055_v38, %v7978_v58  ;;  %v4019_v56 = vmax.f32 %v3908_v53, 0.0 }
 0x1f3   :  { %v4127_v51 = vadd.f32 %v8087_v39, %v4088_v44  ;;  %v4058_v40 = vmul.f32 %v8075_v50, %v4020_v23 }
 0x1f4   :  { %v4126_v36 = vadd.f32 %v8087_v39, %v4087_v45  ;;  %v4057_v16 = vmul.f32 %v8075_v50, %v4019_v56  ;;  %v6099_v22 = vpop.f32.mrb[142].mxu0  ;;  %6144 = vmatprep.mubr.msk.f32.mxu1 %vm4191_vm2, %v4156_v0 }
 0x1f5   :  { %v4090_v28 = vadd.f32 %v4058_v40, %v7984_v55  ;;  %v4022_v21 = vmax.f32 %v6099_v22, 0.0  ;;  %v3918_v54 = vpop.f32.mrb[143].mxu0  ;;  %6145 = vmatmul.mubr.msk.f32.gmra.mrb[136].mxu1 %vm4191_vm2, %v4157_v60  ;;  %v4159_v57 = vmax.f32 %v4127_v51, 0.0 }
 0x1f6   :  { %v4158_v58 = vmax.f32 %v4126_v36, 0.0  ;;  %v4089_v11 = vadd.f32 %v4057_v16, %v7988_v32  ;;  %v4021_v52 = vmax.f32 %v3918_v54, 0.0 }
 0x1f7   :  { %v4129_v24 = vadd.f32 %v8087_v39, %v4090_v28  ;;  %v4060_v15 = vmul.f32 %v8075_v50, %v4022_v21 }
 0x1f8   :  { %v4128_v14 = vadd.f32 %v8087_v39, %v4089_v11  ;;  %v4059_v5 = vmul.f32 %v8075_v50, %v4021_v52  ;;  %v6102_v33 = vpop.f32.mrb[144].mxu0  ;;  %6147 = vmatprep.mubr.msk.f32.mxu1 %vm4191_vm2, %v4158_v58 }
 0x1f9   :  { %v4092_v55 = vadd.f32 %v4060_v15, %v7994_v25  ;;  %v4024_v18 = vmax.f32 %v6102_v33, 0.0  ;;  %v3928_v35 = vpop.f32.mrb[145].mxu0  ;;  %6148 = vmatmul.mubr.msk.f32.gmra.mrb[138].mxu1 %vm4191_vm2, %v4159_v57  ;;  %v4161_v8 = vmax.f32 %v4129_v24, 0.0 }
 0x1fa   :  { %v4160_v32 = vmax.f32 %v4128_v14, 0.0  ;;  %v4091_v19 = vadd.f32 %v4059_v5, %v7998_v4  ;;  %v4023_v3 = vmax.f32 %v3928_v35, 0.0 }
 0x1fb   :  { %v4131_v1 = vadd.f32 %v8087_v39, %v4092_v55  ;;  %v4062_v30 = vmul.f32 %v8075_v50, %v4024_v18 }
 0x1fc   :  { %v4130_v41 = vadd.f32 %v8087_v39, %v4091_v19  ;;  %v4061_v12 = vmul.f32 %v8075_v50, %v4023_v3  ;;  %v6105_v42 = vpop.f32.mrb[146].mxu0  ;;  %6150 = vmatprep.mubr.msk.f32.mxu1 %vm4191_vm2, %v4160_v32 }
 0x1fd   :  { %v4094_v25 = vadd.f32 %v4062_v30, %v8004_v27  ;;  %v4026_v7 = vmax.f32 %v6105_v42, 0.0  ;;  %v3938_v6 = vpop.f32.mrb[147].mxu0  ;;  %6151 = vmatmul.mubr.msk.f32.gmra.mrb[140].mxu1 %vm4191_vm2, %v4161_v8  ;;  %v4163_v49 = vmax.f32 %v4131_v1, 0.0 }
 0x1fe   :  { %v4162_v4 = vmax.f32 %v4130_v41, 0.0  ;;  %v4093_v59 = vadd.f32 %v4061_v12, %v8008_v34  ;;  %v4025_v37 = vmax.f32 %v3938_v6, 0.0 }
 0x1ff   :  { %v4133_v9 = vadd.f32 %v8087_v39, %v4094_v25  ;;  %v4064_v38 = vmul.f32 %v8075_v50, %v4026_v7 }
 0x200   :  { %v4132_v47 = vadd.f32 %v8087_v39, %v4093_v59  ;;  %v4063_v44 = vmul.f32 %v8075_v50, %v4025_v37  ;;  %v6108_v23 = vpop.f32.mrb[148].mxu0  ;;  %6153 = vmatprep.mubr.msk.f32.mxu1 %vm4191_vm2, %v4162_v4 }
 0x201   :  { %v4096_v27 = vadd.f32 %v4064_v38, %v8014_v31  ;;  %v4028_v53 = vmax.f32 %v6108_v23, 0.0  ;;  %v3948_v0 = vpop.f32.mrb[149].mxu0  ;;  %6154 = vmatmul.mubr.msk.f32.gmra.mrb[142].mxu1 %vm4191_vm2, %v4163_v49  ;;  %v4165_v60 = vmax.f32 %v4133_v9, 0.0 }
 0x202   :  { %v4164_v34 = vmax.f32 %v4132_v47, 0.0  ;;  %v4095_v45 = vadd.f32 %v4063_v44, %v8018_v63  ;;  %v4027_v56 = vmax.f32 %v3948_v0, 0.0 }
 0x203   :  { %v4135_v51 = vadd.f32 %v8087_v39, %v4096_v27  ;;  %v4066_v40 = vmul.f32 %v8075_v50, %v4028_v53 }
 0x204   :  { %v4134_v36 = vadd.f32 %v8087_v39, %v4095_v45  ;;  %v4065_v16 = vmul.f32 %v8075_v50, %v4027_v56  ;;  %v6111_v22 = vpop.f32.mrb[150].mxu0  ;;  %6156 = vmatprep.mubr.msk.f32.mxu1 %vm4191_vm2, %v4164_v34 }
 0x205   :  { %v4098_v31 = vadd.f32 %v4066_v40, %v8024_v17  ;;  %v4030_v28 = vmax.f32 %v6111_v22, 0.0  ;;  %v3958_v21 = vpop.f32.mrb[151].mxu0  ;;  %6157 = vmatmul.mubr.msk.f32.gmra.mrb[144].mxu1 %vm4191_vm2, %v4165_v60  ;;  %v4167_v11 = vmax.f32 %v4135_v51, 0.0 }
 0x206   :  { %v4166_v63 = vmax.f32 %v4134_v36, 0.0  ;;  %v4097_v54 = vadd.f32 %v4065_v16, %v8028_v43  ;;  %v4029_v58 = vmax.f32 %v3958_v21, 0.0 }
 0x207   :  { %v4137_v52 = vadd.f32 %v8087_v39, %v4098_v31  ;;  %v4068_v57 = vmul.f32 %v8075_v50, %v4030_v28 }
 0x208   :  { %v4136_v24 = vadd.f32 %v8087_v39, %v4097_v54  ;;  %v4067_v15 = vmul.f32 %v8075_v50, %v4029_v58  ;;  %v6114_v14 = vpop.f32.mrb[152].mxu0  ;;  %6159 = vmatprep.mubr.msk.f32.mxu1 %vm4191_vm2, %v4166_v63 }
 0x209   :  { %v4100_v17 = vadd.f32 %v4068_v57, %v8034_v61  ;;  %v4032_v5 = vmax.f32 %v6114_v14, 0.0  ;;  %v3968_v33 = vpop.f32.mrb[153].mxu0  ;;  %6160 = vmatmul.mubr.msk.f32.gmra.mrb[146].mxu1 %vm4191_vm2, %v4167_v11  ;;  %v4169_v35 = vmax.f32 %v4137_v52, 0.0 }
 0x20a   :  { %v4168_v43 = vmax.f32 %v4136_v24, 0.0  ;;  %v4099_v55 = vadd.f32 %v4067_v15, %v8038_v13  ;;  %v4031_v18 = vmax.f32 %v3968_v33, 0.0 }
 0x20b   :  { %v4139_v32 = vadd.f32 %v8087_v39, %v4100_v17  ;;  %v4070_v19 = vmul.f32 %v8075_v50, %v4032_v5 }
 0x20c   :  { %v4138_v3 = vadd.f32 %v8087_v39, %v4099_v55  ;;  %v4069_v8 = vmul.f32 %v8075_v50, %v4031_v18  ;;  %v6117_v1 = vpop.f32.mrb[154].mxu0  ;;  %6162 = vmatprep.mubr.msk.f32.mxu1 %vm4191_vm2, %v4168_v43 }
 0x20d   :  { %v4102_v61 = vadd.f32 %v4070_v19, %v8044_v46  ;;  %v4034_v30 = vmax.f32 %v6117_v1, 0.0  ;;  %v3978_v41 = vpop.f32.mrb[155].mxu0  ;;  %6163 = vmatmul.mubr.msk.f32.gmra.mrb[148].mxu1 %vm4191_vm2, %v4169_v35  ;;  %v4171_v25 = vmax.f32 %v4139_v32, 0.0 }
 0x20e   :  { %v4170_v13 = vmax.f32 %v4138_v3, 0.0  ;;  %v4101_v12 = vadd.f32 %v4069_v8, %v8048_v48  ;;  %v4033_v42 = vmax.f32 %v3978_v41, 0.0 }
 0x20f   :  { %v4141_v7 = vadd.f32 %v8087_v39, %v4102_v61  ;;  %v4072_v6 = vmul.f32 %v8075_v50, %v4034_v30 }
 0x210   :  { %v4140_v4 = vadd.f32 %v8087_v39, %v4101_v12  ;;  %v4071_v59 = vmul.f32 %v8075_v50, %v4033_v42  ;;  %v6120_v37 = vpop.f32.mrb[156].mxu0  ;;  %6165 = vmatprep.mubr.msk.f32.mxu1 %vm4191_vm2, %v4170_v13 }
 0x211   :  { %v4104_v46 = vadd.f32 %v4072_v6, %v8054_v26  ;;  %v4036_v49 = vmax.f32 %v6120_v37, 0.0  ;;  %v3988_v9 = vpop.f32.mrb[157].mxu0  ;;  %6166 = vmatmul.mubr.msk.f32.gmra.mrb[150].mxu1 %vm4191_vm2, %v4171_v25  ;;  %v4173_v44 = vmax.f32 %v4141_v7, 0.0 }
 0x212   :  { %v4172_v48 = vmax.f32 %v4140_v4, 0.0  ;;  %v4103_v38 = vadd.f32 %v4071_v59, %v8058_v29  ;;  %v4035_v47 = vmax.f32 %v3988_v9, 0.0 }
 0x213   :  { %v4143_v23 = vadd.f32 %v8087_v39, %v4104_v46  ;;  %v4074_v27 = vmul.f32 %v8075_v50, %v4036_v49 }
 0x214   :  { %v4142_v53 = vadd.f32 %v8087_v39, %v4103_v38  ;;  %v4073_v0 = vmul.f32 %v8075_v50, %v4035_v47  ;;  %v6123_v34 = vpop.f32.mrb[158].mxu0  ;;  %6168 = vmatprep.mubr.msk.f32.mxu1 %vm4191_vm2, %v4172_v48 }
 0x215   :  { %v4106_v26 = vadd.f32 %v4074_v27, %v8064_v10  ;;  %v4038_v45 = vmax.f32 %v6123_v34, 0.0  ;;  %v3998_v56 = vpop.f32.mrb[159].mxu0  ;;  %6169 = vmatmul.mubr.msk.f32.gmra.mrb[152].mxu1 %vm4191_vm2, %v4173_v44  ;;  %v4175_v40 = vmax.f32 %v4143_v23, 0.0 }
 0x216   :  { %v4174_v29 = vmax.f32 %v4142_v53, 0.0  ;;  %v4105_v60 = vadd.f32 %v4073_v0, %v8068_v62  ;;  %v4037_v51 = vmax.f32 %v3998_v56, 0.0 }
 0x217   :  { %v4145_v36 = vadd.f32 %v8087_v39, %v4106_v26  ;;  %v4076_v16 = vmul.f32 %v8075_v50, %v4038_v45 }
 0x218   :  { %v4144_v22 = vadd.f32 %v8087_v39, %v4105_v60  ;;  %v4075_v31 = vmul.f32 %v8075_v50, %v4037_v51  ;;  %6171 = vmatprep.mubr.msk.f32.mxu1 %vm4191_vm2, %v4174_v29 }
 0x219   :  { %v4108_v10 = vadd.f32 %v4076_v16, %v8079_v2  ;;  %6172 = vmatmul.mubr.msk.f32.gmra.mrb[154].mxu1 %vm4191_vm2, %v4175_v40  ;;  %v4177_v62 = vmax.f32 %v4145_v36, 0.0  ;;  %v6189_v2 = vmov 0.0  }
 0x21a   :  { %v4176_v28 = vmax.f32 %v4144_v22, 0.0  ;;  %v4107_v21 = vadd.f32 %v4075_v31, %v8082_v20  ;;  %4725 = vst.msk [vmem:[%s8352_s6 + $0x80] sm:$0xff] %vm4708_vm3, %v6189_v2  ;;  %4726 = vst.msk [vmem:[%s8352_s6 + $0x88] sm:$0xff] %vm4708_vm3, %v6189_v2  ;;  %v5308_v20 = vld [vmem:[%s8353_s5] ss:$0 sm:$0xff] }
 0x21b   :  { %v4147_v63 = vadd.f32 %v8087_v39, %v4108_v10  ;;  %4727 = vst.msk [vmem:[%s8352_s6 + $0x90] sm:$0xff] %vm4708_vm3, %v6189_v2  ;;  %4728 = vst.msk [vmem:[%s8352_s6 + $0x98] sm:$0xff] %vm4708_vm3, %v6189_v2 }
 0x21c   :  { %v4146_v54 = vadd.f32 %v8087_v39, %v4107_v21  ;;  %6174 = vmatprep.mubr.msk.f32.mxu1 %vm4191_vm2, %v4176_v28  ;;  %4729 = vst.msk [vmem:[%s8352_s6 + $0xa0] sm:$0xff] %vm4708_vm3, %v6189_v2  ;;  %4730 = vst.msk [vmem:[%s8352_s6 + $0xa8] sm:$0xff] %vm4708_vm3, %v6189_v2 }
 0x21d   :  { %6175 = vmatmul.mubr.msk.f32.gmra.mrb[156].mxu1 %vm4191_vm2, %v4177_v62  ;;  %v4179_v50 = vmax.f32 %v4147_v63, 0.0  ;;  %4731 = vst.msk [vmem:[%s8352_s6 + $0xb0] sm:$0xff] %vm4708_vm3, %v6189_v2  ;;  %4732 = vst.msk [vmem:[%s8352_s6 + $0xb8] sm:$0xff] %vm4708_vm3, %v6189_v2 }
 0x21e   :  { %v4178_v58 = vmax.f32 %v4146_v54, 0.0  ;;  %4733 = vst.msk [vmem:[%s8352_s6 + $0xc0] sm:$0xff] %vm4708_vm3, %v6189_v2  ;;  %4734 = vst.msk [vmem:[%s8352_s6 + $0xc8] sm:$0xff] %vm4708_vm3, %v6189_v2 }
 0x21f   :  { %4735 = vst.msk [vmem:[%s8352_s6 + $0xd0] sm:$0xff] %vm4708_vm3, %v6189_v2  ;;  %4736 = vst.msk [vmem:[%s8352_s6 + $0xd8] sm:$0xff] %vm4708_vm3, %v6189_v2 }
 0x220   :  { %6177 = vmatprep.mubr.msk.f32.mxu1 %vm4191_vm2, %v4178_v58  ;;  %4737 = vst.msk [vmem:[%s8352_s6 + $0xe0] sm:$0xff] %vm4708_vm3, %v6189_v2  ;;  %4738 = vst.msk [vmem:[%s8352_s6 + $0xe8] sm:$0xff] %vm4708_vm3, %v6189_v2 }
 0x221   :  { %6178 = vmatmul.mubr.msk.f32.gmra.mrb[158].mxu1 %vm4191_vm2, %v4179_v50  ;;  %4739 = vst.msk [vmem:[%s8352_s6 + $0xf0] sm:$0xff] %vm4708_vm3, %v6189_v2  ;;  %4740 = vst.msk [vmem:[%s8352_s6 + $0xf8] sm:$0xff] %vm4708_vm3, %v6189_v2 }
 0x2b8   :  { %v6134_v39 = vpop.f32.mrb[128].mxu1 }
 0x2b9   :  { %v4360_v11 = vadd.f32 %v6134_v39, %v5308_v20  ;;  %v4354_v52 = vpop.f32.mrb[129].mxu1 }
 0x2ba   :  { %v4355_v57 = vadd.f32 %v5308_v20, %v4354_v52 }
 0x2bb   :  { %4710 = vst.msk [vmem:[%s8352_s6 + $0x8] sm:$0xff] %vm4708_vm3, %v4360_v11 }
 0x2bc   :  { %4709 = vst.msk [vmem:[%s8352_s6] sm:$0xff] %vm4708_vm3, %v4355_v57  ;;  %v6137_v24 = vpop.f32.mrb[130].mxu1 }
 0x2bd   :  { %v4370_v15 = vadd.f32 %v6137_v24, %v5308_v20  ;;  %v4364_v14 = vpop.f32.mrb[131].mxu1 }
 0x2be   :  { %v4365_v17 = vadd.f32 %v5308_v20, %v4364_v14 }
 0x2bf   :  { %4712 = vst.msk [vmem:[%s8352_s6 + $0x18] sm:$0xff] %vm4708_vm3, %v4370_v15 }
 0x2c0   :  { %4711 = vst.msk [vmem:[%s8352_s6 + $0x10] sm:$0xff] %vm4708_vm3, %v4365_v17  ;;  %v6140_v5 = vpop.f32.mrb[132].mxu1 }
 0x2c1   :  { %v4380_v33 = vadd.f32 %v6140_v5, %v5308_v20  ;;  %v4374_v43 = vpop.f32.mrb[133].mxu1 }
 0x2c2   :  { %v4375_v55 = vadd.f32 %v5308_v20, %v4374_v43 }
 0x2c3   :  { %4714 = vst.msk [vmem:[%s8352_s6 + $0x28] sm:$0xff] %vm4708_vm3, %v4380_v33 }
 0x2c4   :  { %4713 = vst.msk [vmem:[%s8352_s6 + $0x20] sm:$0xff] %vm4708_vm3, %v4375_v55  ;;  %v6143_v18 = vpop.f32.mrb[134].mxu1 }
 0x2c5   :  { %v4390_v35 = vadd.f32 %v6143_v18, %v5308_v20  ;;  %v4384_v32 = vpop.f32.mrb[135].mxu1 }
 0x2c6   :  { %v4385_v19 = vadd.f32 %v5308_v20, %v4384_v32 }
 0x2c7   :  { %4716 = vst.msk [vmem:[%s8352_s6 + $0x38] sm:$0xff] %vm4708_vm3, %v4390_v35 }
 0x2c8   :  { %4715 = vst.msk [vmem:[%s8352_s6 + $0x30] sm:$0xff] %vm4708_vm3, %v4385_v19  ;;  %v6146_v3 = vpop.f32.mrb[136].mxu1 }
 0x2c9   :  { %v4400_v8 = vadd.f32 %v6146_v3, %v5308_v20  ;;  %v4394_v1 = vpop.f32.mrb[137].mxu1 }
 0x2ca   :  { %v4395_v61 = vadd.f32 %v5308_v20, %v4394_v1 }
 0x2cb   :  { %4718 = vst.msk [vmem:[%s8352_s6 + $0x48] sm:$0xff] %vm4708_vm3, %v4400_v8 }
 0x2cc   :  { %4717 = vst.msk [vmem:[%s8352_s6 + $0x40] sm:$0xff] %vm4708_vm3, %v4395_v61  ;;  %v6149_v30 = vpop.f32.mrb[138].mxu1 }
 0x2cd   :  { %v4410_v41 = vadd.f32 %v6149_v30, %v5308_v20  ;;  %v4404_v13 = vpop.f32.mrb[139].mxu1 }
 0x2ce   :  { %v4405_v12 = vadd.f32 %v5308_v20, %v4404_v13 }
 0x2cf   :  { %4720 = vst.msk [vmem:[%s8352_s6 + $0x58] sm:$0xff] %vm4708_vm3, %v4410_v41 }
 0x2d0   :  { %4719 = vst.msk [vmem:[%s8352_s6 + $0x50] sm:$0xff] %vm4708_vm3, %v4405_v12  ;;  %v6152_v42 = vpop.f32.mrb[140].mxu1 }
 0x2d1   :  { %v4420_v25 = vadd.f32 %v6152_v42, %v5308_v20  ;;  %v4414_v7 = vpop.f32.mrb[141].mxu1 }
 0x2d2   :  { %v4415_v6 = vadd.f32 %v5308_v20, %v4414_v7 }
 0x2d3   :  { %4722 = vst.msk [vmem:[%s8352_s6 + $0x68] sm:$0xff] %vm4708_vm3, %v4420_v25 }
 0x2d4   :  { %4721 = vst.msk [vmem:[%s8352_s6 + $0x60] sm:$0xff] %vm4708_vm3, %v4415_v6  ;;  %v6155_v4 = vpop.f32.mrb[142].mxu1 }
 0x2d5   :  { %v4430_v59 = vadd.f32 %v6155_v4, %v5308_v20  ;;  %v4424_v37 = vpop.f32.mrb[143].mxu1 }
 0x2d6   :  { %v4425_v46 = vadd.f32 %v5308_v20, %v4424_v37 }
 0x2d7   :  { %4724 = vst.msk [vmem:[%s8352_s6 + $0x78] sm:$0xff] %vm4708_vm3, %v4430_v59 }
 0x2d8   :  { %4723 = vst.msk [vmem:[%s8352_s6 + $0x70] sm:$0xff] %vm4708_vm3, %v4425_v46  ;;  %v6158_v49 = vpop.f32.mrb[144].mxu1 }
 0x2d9   :  { %v4434_v9 = vpop.f32.mrb[145].mxu1 }
 0x2dc   :  { %v6161_v48 = vpop.f32.mrb[146].mxu1 }
 0x2dd   :  { %v4444_v38 = vpop.f32.mrb[147].mxu1 }
 0x2e0   :  { %v6164_v47 = vpop.f32.mrb[148].mxu1 }
 0x2e1   :  { %v4454_v44 = vpop.f32.mrb[149].mxu1 }
 0x2e4   :  { %v6167_v23 = vpop.f32.mrb[150].mxu1 }
 0x2e5   :  { %v4464_v27 = vpop.f32.mrb[151].mxu1 }
 0x2e8   :  { %v6170_v53 = vpop.f32.mrb[152].mxu1 }
 0x2e9   :  { %v4474_v0 = vpop.f32.mrb[153].mxu1 }
 0x2ec   :  { %v6173_v34 = vpop.f32.mrb[154].mxu1 }
 0x2ed   :  { %v4484_v26 = vpop.f32.mrb[155].mxu1 }
 0x2f0   :  { %v6176_v45 = vpop.f32.mrb[156].mxu1 }
 0x2f1   :  { %v4494_v56 = vpop.f32.mrb[157].mxu1 }
 0x2f4   :  { %v6179_v29 = vpop.f32.mrb[158].mxu1 }
 0x2f5   :  { %v4504_v60 = vpop.f32.mrb[159].mxu1 }

</bundles_post_ra>
